<compile_context>
chip_gen: v6e
topology: v6e:2x2x1
jax: 0.10.0
libtpu: 0.0.40
codegen_flags: <defaults>
</compile_context>

<pallas_src>
import functools

import jax
import jax.numpy as jnp
import numpy as np
from jax import lax
from jax.experimental import pallas as pl
from jax.experimental.pallas import tpu as pltpu

_VMEM = pl.BlockSpec(memory_space=pltpu.MemorySpace.VMEM)
_HALF_LOG_2PI = 0.5 * float(np.log(2.0 * np.pi))

# Storage dtype of all large constant matrices (halves HBM->VMEM DMA bytes on
# every generation).  Math stays float32 in-kernel for exactness on v5e.
WEIGHT_DTYPE = jnp.bfloat16

# Conv stack config (in_c, out_c, kernel, stride, pad) — static, not traced.
CONV_CFG = [
    (1, 4, 4, 2, 1),
    (4, 8, 4, 2, 1),
    (8, 16, 4, 2, 1),
    (16, 32, 4, 2, 1),
    (32, 64, 4, 2, 1),
    (64, 128, 2, 2, 0),
]
INPUT_HW = 64


# ----------------------------------------------------------------------------
# The single fused Pallas kernel
# ----------------------------------------------------------------------------
def fused_policy_kernel(*refs, conv_ks, action_dim):
    """Entire PolicyReplicate forward, all operands VMEM-resident.

    Activations are 2-D "dense rows" slabs (B*OH, OW*C); each conv layer is
    y = LeakyReLU(sum_kh (S_kh @ x) @ M_kh + bias) with constant S/M built at
    setup, so im2col is just MXU matmuls (no strided slices in-kernel).
    """
    n_conv = len(conv_ks)
    it = iter(refs)
    obs_ref = next(it)
    conv_refs = [(next(it), next(it), next(it)) for _ in range(n_conv)]
    (wf_ref, bf_ref, w1_ref, b1_ref, w2_ref, b2_ref, wh_ref, bh_ref,
     logstd_ref, noise_ref, act_ref, val_ref, logp_ref) = [next(it) for _ in range(13)]

    f32 = jnp.float32
    x = obs_ref[...]                                     # (B*64, 64) f32

    # ---- conv1..conv6 (Conv2d + LeakyReLU(0.01)), all in vregs ----
    for (s_ref, m_ref, bias_ref), k in zip(conv_refs, conv_ks):
        y = bias_ref[...]                                # (1, OW*Cout) f32, broadcasts
        for kh in range(k):                              # static unroll
            rows = jnp.dot(s_ref[kh].astype(f32), x,
                           preferred_element_type=f32)   # row gather on the MXU
            y = y + jnp.dot(rows, m_ref[kh].astype(f32),
                            preferred_element_type=f32)  # kw taps x conv weights
        x = jnp.maximum(y, 0.01 * y)                     # LeakyReLU, f32 (v5e-safe)

    # x is now (B, 128): flattened encoder output (spatial 1x1).
    # ---- Encoder.fc1 + sigmoid (exp and reciprocal both land on the EUP) ----
    feat = jnp.dot(x, wf_ref[...].astype(f32),
                   preferred_element_type=f32) + bf_ref[...]
    feat = pl.reciprocal(1.0 + jnp.exp(-feat), approx=True)

    # ---- MlpExtractor pi/vf towers (L1 shares `feat`; L2 block-diagonal) ----
    l1 = jnp.tanh(jnp.dot(feat, w1_ref[...].astype(f32),
                          preferred_element_type=f32) + b1_ref[...])
    l2 = jnp.tanh(jnp.dot(l1, w2_ref[...].astype(f32),
                          preferred_element_type=f32) + b2_ref[...])
    # Heads: [action_net(latent_pi) | value_net(latent_vf)] block-diag GEMM.
    head = jnp.dot(l2, wh_ref[...].astype(f32),
                   preferred_element_type=f32) + bh_ref[...]
    mean = head[:, :action_dim]
    val_ref[...] = head[:, action_dim:action_dim + 1]

    # ---- DiagGaussian rsample + log_prob ((actions-mean)/std == noise) ----
    log_std = logstd_ref[...]
    noise = noise_ref[...]
    act_ref[...] = mean + jnp.exp(log_std) * noise
    per_dim = -0.5 * noise * noise - log_std - _HALF_LOG_2PI
    logp_ref[...] = jnp.sum(per_dim, axis=-1, keepdims=True)


def fused_policy_forward(dense, obs, noise):
    """obs: (B, 1, 64, 64) float32 (preprocess_obs is identity here).
    Returns (actions, values, log_prob)."""
    B = obs.shape[0]
    A = noise.shape[1]
    x0 = obs.reshape(B * INPUT_HW, INPUT_HW)     # NCHW -> dense rows: free (C == 1)

    conv_ks = tuple(k for (_, _, k, _, _) in CONV_CFG)
    operands = [x0]
    for (s, m, b) in dense["convs"]:
        operands += [s, m, b]
    operands += [dense["wfc1"], dense["bfc1"], dense["w1"], dense["b1"],
                 dense["w2"], dense["b2"], dense["wh"], dense["bh"],
                 dense["log_std"], noise]

    kernel = functools.partial(fused_policy_kernel, conv_ks=conv_ks, action_dim=A)
    actions, values, logp = pl.pallas_call(
        kernel,
        out_shape=(
            jax.ShapeDtypeStruct((B, A), jnp.float32),   # actions
            jax.ShapeDtypeStruct((B, 1), jnp.float32),   # values
            jax.ShapeDtypeStruct((B, 1), jnp.float32),   # log_prob (per row)
        ),
        in_specs=[_VMEM] * len(operands),
        out_specs=(_VMEM, _VMEM, _VMEM),
    )(*operands)
    return actions, values, logp[:, 0]


# ----------------------------------------------------------------------------
# Parameters (PyTorch-style uniform init).  Conv weights stored HWIO
# (kh, kw, in_c, out_c); real PyTorch OIHW weights must be permuted to this.
# ----------------------------------------------------------------------------
def _uniform(key, shape, bound):
    return jax.random.uniform(key, shape, jnp.float32, -bound, bound)


def _linear(key, fan_in, fan_out):
    k1, k2 = jax.random.split(key)
    bound = 1.0 / np.sqrt(fan_in)
    return _uniform(k1, (fan_in, fan_out), bound), _uniform(k2, (1, fan_out), bound)


def make_params(key, action_dim=2):
    params = {"convs": []}
    for in_c, out_c, k, s, p in CONV_CFG:
        key, k1, k2 = jax.random.split(key, 3)
        fan_in = in_c * k * k
        bound = 1.0 / np.sqrt(fan_in)
        w = _uniform(k1, (k, k, in_c, out_c), bound)
        b = _uniform(k2, (out_c,), bound)
        params["convs"].append((w, b))

    key, sub = jax.random.split(key)
    params["fc1"] = _linear(sub, 128, 64)
    pi, vf = [], []
    for _ in range(2):
        key, sub = jax.random.split(key)
        pi.append(_linear(sub, 64, 64))
        key, sub = jax.random.split(key)
        vf.append(_linear(sub, 64, 64))
    params["pi"], params["vf"] = pi, vf
    key, sub = jax.random.split(key)
    params["value"] = _linear(sub, 64, 1)
    key, sub = jax.random.split(key)
    params["action"] = _linear(sub, 64, action_dim)
    params["log_std"] = jnp.zeros((1, action_dim), jnp.float32)   # log_std_init=0.0
    return params


def build_dense_params(params, batch, action_dim):
    """Setup-time (host) fold of every conv into per-tap (S, M) matrices and of
    the pi/vf towers + heads into concatenated / block-diagonal GEMMs."""
    dense = {"convs": []}
    h = w_sp = INPUT_HW
    for (wk, bk), (c_in, c_out, k, s, p) in zip(params["convs"], CONV_CFG):
        wk = np.asarray(wk)                       # (k, k, c_in, c_out)
        bk = np.asarray(bk)
        oh = (h + 2 * p - k) // s + 1
        ow = (w_sp + 2 * p - k) // s + 1
        S = np.zeros((k, batch * oh, batch * h), np.float32)
        M = np.zeros((k, w_sp * c_in, ow * c_out), np.float32)
        for kh in range(k):
            for bi in range(batch):
                for o in range(oh):
                    r = s * o + kh - p
                    if 0 <= r < h:                 # rows that fall in H-padding stay 0
                        S[kh, bi * oh + o, bi * h + r] = 1.0
            for o in range(ow):
                for kw in range(k):
                    c = s * o + kw - p
                    if 0 <= c < w_sp:              # taps that fall in W-padding stay 0
                        M[kh, c * c_in:(c + 1) * c_in,
                          o * c_out:(o + 1) * c_out] = wk[kh, kw]
        bias = np.tile(bk.reshape(1, c_out), (1, ow)).astype(np.float32)
        dense["convs"].append((jnp.asarray(S, dtype=WEIGHT_DTYPE),
                               jnp.asarray(M, dtype=WEIGHT_DTYPE),
                               jnp.asarray(bias)))
        h, w_sp = oh, ow

    (w1p, b1p), (w2p, b2p) = params["pi"]
    (w1v, b1v), (w2v, b2v) = params["vf"]
    wa, ba = params["action"]
    wv, bv = params["value"]
    H = w1p.shape[0]                                      # 64
    w1 = jnp.concatenate([w1p, w1v], axis=1)              # (64, 128) shared input
    b1 = jnp.concatenate([b1p, b1v], axis=1)
    z = jnp.zeros((H, H), jnp.float32)
    w2 = jnp.block([[w2p, z], [z, w2v]])                  # (128, 128) block-diag
    b2 = jnp.concatenate([b2p, b2v], axis=1)
    wh = jnp.block([[wa, jnp.zeros((H, 1), jnp.float32)],
                    [jnp.zeros((H, action_dim), jnp.float32), wv]])  # (128, A+1)
    bh = jnp.concatenate([ba, bv], axis=1)
    wfc1, bfc1 = params["fc1"]
    dense.update(
        wfc1=wfc1.astype(WEIGHT_DTYPE), bfc1=bfc1,
        w1=w1.astype(WEIGHT_DTYPE), b1=b1,
        w2=w2.astype(WEIGHT_DTYPE), b2=b2,
        wh=wh.astype(WEIGHT_DTYPE), bh=bh,
        log_std=params["log_std"])
    return dense


# ----------------------------------------------------------------------------
# Pure-JAX (XLA) reference for correctness checking.
# ----------------------------------------------------------------------------
def reference_forward(params, obs, noise):
    x = obs
    for (wk, bk), (c_in, c_out, k, s, p) in zip(params["convs"], CONV_CFG):
        x = lax.conv_general_dilated(
            x, wk, window_strides=(s, s), padding=[(p, p), (p, p)],
            dimension_numbers=("NCHW", "HWIO", "NCHW"))
        x = x + bk.reshape(1, c_out, 1, 1)
        x = jnp.maximum(x, 0.01 * x)
    feat = x.reshape(x.shape[0], -1)                      # (B, 128), channel order
    wf, bf = params["fc1"]
    feat = jax.nn.sigmoid(feat @ wf + bf)
    (w1p, b1p), (w2p, b2p) = params["pi"]
    (w1v, b1v), (w2v, b2v) = params["vf"]
    lp = jnp.tanh(jnp.tanh(feat @ w1p + b1p) @ w2p + b2p)
    lv = jnp.tanh(jnp.tanh(feat @ w1v + b1v) @ w2v + b2v)
    wa, ba = params["action"]
    wv, bv = params["value"]
    mean = lp @ wa + ba
    values = lv @ wv + bv
    std = jnp.exp(params["log_std"])
    actions = mean + std * noise
    logp = jnp.sum(-0.5 * ((actions - mean) / std) ** 2
                   - params["log_std"] - _HALF_LOG_2PI, axis=-1)
    return actions, values, logp


# ----------------------------------------------------------------------------
if __name__ == "__main__":
    B = 2
    ACTION_DIM = 2

    key = jax.random.PRNGKey(0)
    key, pkey, okey, nkey = jax.random.split(key, 4)

    params = make_params(pkey, action_dim=ACTION_DIM)
    dense = build_dense_params(params, batch=B, action_dim=ACTION_DIM)

    obs = jax.random.uniform(okey, (B, 1, INPUT_HW, INPUT_HW), jnp.float32)
    # Gaussian sampling noise (deterministic=False path; eps fixed by PRNGKey)
    noise = jax.random.normal(nkey, (B, ACTION_DIM), jnp.float32)

    fwd = jax.jit(fused_policy_forward)
    actions, values, log_prob = fwd(dense, obs, noise)
    jax.block_until_ready((actions, values, log_prob))

    assert actions.shape == (B, ACTION_DIM)
    assert values.shape == (B, 1)
    assert log_prob.shape == (B,)

    # Correctness vs. plain-JAX reference (loose tol: bf16-stored weights +
    # approx reciprocal in the sigmoid; accumulation is f32 throughout).
    a_ref, v_ref, lp_ref = reference_forward(params, obs, noise)
    assert np.allclose(np.asarray(actions), np.asarray(a_ref), rtol=5e-2, atol=5e-2)
    assert np.allclose(np.asarray(values), np.asarray(v_ref), rtol=5e-2, atol=5e-2)
    assert np.allclose(np.asarray(log_prob), np.asarray(lp_ref), rtol=5e-2, atol=5e-2)

    print("KERNEL_OK")
</pallas_src>

<mosaic_0001>
module attributes {stable_mosaic.version = 11 : i64} {
  func.func @fused_policy_kernel(%arg0: memref<128x64xf32, #tpu.memory_space<vmem>>, %arg1: memref<4x64x128xbf16, #tpu.memory_space<vmem>>, %arg2: memref<4x64x128xbf16, #tpu.memory_space<vmem>>, %arg3: memref<1x128xf32, #tpu.memory_space<vmem>>, %arg4: memref<4x32x64xbf16, #tpu.memory_space<vmem>>, %arg5: memref<4x128x128xbf16, #tpu.memory_space<vmem>>, %arg6: memref<1x128xf32, #tpu.memory_space<vmem>>, %arg7: memref<4x16x32xbf16, #tpu.memory_space<vmem>>, %arg8: memref<4x128x128xbf16, #tpu.memory_space<vmem>>, %arg9: memref<1x128xf32, #tpu.memory_space<vmem>>, %arg10: memref<4x8x16xbf16, #tpu.memory_space<vmem>>, %arg11: memref<4x128x128xbf16, #tpu.memory_space<vmem>>, %arg12: memref<1x128xf32, #tpu.memory_space<vmem>>, %arg13: memref<4x4x8xbf16, #tpu.memory_space<vmem>>, %arg14: memref<4x128x128xbf16, #tpu.memory_space<vmem>>, %arg15: memref<1x128xf32, #tpu.memory_space<vmem>>, %arg16: memref<2x2x4xbf16, #tpu.memory_space<vmem>>, %arg17: memref<2x128x128xbf16, #tpu.memory_space<vmem>>, %arg18: memref<1x128xf32, #tpu.memory_space<vmem>>, %arg19: memref<128x64xbf16, #tpu.memory_space<vmem>>, %arg20: memref<1x64xf32, #tpu.memory_space<vmem>>, %arg21: memref<64x128xbf16, #tpu.memory_space<vmem>>, %arg22: memref<1x128xf32, #tpu.memory_space<vmem>>, %arg23: memref<128x128xbf16, #tpu.memory_space<vmem>>, %arg24: memref<1x128xf32, #tpu.memory_space<vmem>>, %arg25: memref<128x3xbf16, #tpu.memory_space<vmem>>, %arg26: memref<1x3xf32, #tpu.memory_space<vmem>>, %arg27: memref<1x2xf32, #tpu.memory_space<vmem>>, %arg28: memref<2x2xf32, #tpu.memory_space<vmem>>, %arg29: memref<2x2xf32, #tpu.memory_space<vmem>>, %arg30: memref<2x1xf32, #tpu.memory_space<vmem>>, %arg31: memref<2x1xf32, #tpu.memory_space<vmem>>) attributes {dimension_semantics = [], scalar_prefetch = 0 : i64, scratch_operands = 0 : i64, tpu.core_type = #tpu.core_type<tc>} {
    %c0 = arith.constant 0 : index
    %c0_0 = arith.constant 0 : index
    %0 = vector.load %arg0[%c0, %c0_0] : memref<128x64xf32, #tpu.memory_space<vmem>>, vector<128x64xf32>
    %c0_1 = arith.constant 0 : index
    %c0_2 = arith.constant 0 : index
    %1 = vector.load %arg3[%c0_1, %c0_2] : memref<1x128xf32, #tpu.memory_space<vmem>>, vector<1x128xf32>
    %c0_3 = arith.constant 0 : index
    %c0_4 = arith.constant 0 : index
    %c0_5 = arith.constant 0 : index
    %2 = vector.load %arg1[%c0_3, %c0_4, %c0_5] : memref<4x64x128xbf16, #tpu.memory_space<vmem>>, vector<1x64x128xbf16>
    %3 = vector.shape_cast %2 : vector<1x64x128xbf16> to vector<64x128xbf16>
    %4 = arith.extf %3 : vector<64x128xbf16> to vector<64x128xf32>
    %cst = arith.constant dense<0.000000e+00> : vector<64x64xf32>
    %5 = tpu.matmul %4, %0, %cst {dimension_numbers = #tpu.dot_dimension_numbers<[1], [0], [0], [1], [0, 0, 1, 1], [], []>} : vector<64x128xf32>, vector<128x64xf32>, vector<64x64xf32> -> vector<64x64xf32>
    %c0_6 = arith.constant 0 : index
    %c0_7 = arith.constant 0 : index
    %c0_8 = arith.constant 0 : index
    %6 = vector.load %arg2[%c0_6, %c0_7, %c0_8] : memref<4x64x128xbf16, #tpu.memory_space<vmem>>, vector<1x64x128xbf16>
    %7 = vector.shape_cast %6 : vector<1x64x128xbf16> to vector<64x128xbf16>
    %8 = arith.extf %7 : vector<64x128xbf16> to vector<64x128xf32>
    %cst_9 = arith.constant dense<0.000000e+00> : vector<64x128xf32>
    %9 = tpu.matmul %5, %8, %cst_9 {dimension_numbers = #tpu.dot_dimension_numbers<[1], [0], [0], [1], [0, 0, 1, 1], [], []>} : vector<64x64xf32>, vector<64x128xf32>, vector<64x128xf32> -> vector<64x128xf32>
    %10 = vector.broadcast %1 : vector<1x128xf32> to vector<64x128xf32>
    %11 = arith.addf %10, %9 : vector<64x128xf32>
    %c1 = arith.constant 1 : index
    %c0_10 = arith.constant 0 : index
    %c0_11 = arith.constant 0 : index
    %12 = vector.load %arg1[%c1, %c0_10, %c0_11] : memref<4x64x128xbf16, #tpu.memory_space<vmem>>, vector<1x64x128xbf16>
    %13 = vector.shape_cast %12 : vector<1x64x128xbf16> to vector<64x128xbf16>
    %14 = arith.extf %13 : vector<64x128xbf16> to vector<64x128xf32>
    %cst_12 = arith.constant dense<0.000000e+00> : vector<64x64xf32>
    %15 = tpu.matmul %14, %0, %cst_12 {dimension_numbers = #tpu.dot_dimension_numbers<[1], [0], [0], [1], [0, 0, 1, 1], [], []>} : vector<64x128xf32>, vector<128x64xf32>, vector<64x64xf32> -> vector<64x64xf32>
    %c1_13 = arith.constant 1 : index
    %c0_14 = arith.constant 0 : index
    %c0_15 = arith.constant 0 : index
    %16 = vector.load %arg2[%c1_13, %c0_14, %c0_15] : memref<4x64x128xbf16, #tpu.memory_space<vmem>>, vector<1x64x128xbf16>
    %17 = vector.shape_cast %16 : vector<1x64x128xbf16> to vector<64x128xbf16>
    %18 = arith.extf %17 : vector<64x128xbf16> to vector<64x128xf32>
    %cst_16 = arith.constant dense<0.000000e+00> : vector<64x128xf32>
    %19 = tpu.matmul %15, %18, %cst_16 {dimension_numbers = #tpu.dot_dimension_numbers<[1], [0], [0], [1], [0, 0, 1, 1], [], []>} : vector<64x64xf32>, vector<64x128xf32>, vector<64x128xf32> -> vector<64x128xf32>
    %20 = arith.addf %11, %19 : vector<64x128xf32>
    %c2 = arith.constant 2 : index
    %c0_17 = arith.constant 0 : index
    %c0_18 = arith.constant 0 : index
    %21 = vector.load %arg1[%c2, %c0_17, %c0_18] : memref<4x64x128xbf16, #tpu.memory_space<vmem>>, vector<1x64x128xbf16>
    %22 = vector.shape_cast %21 : vector<1x64x128xbf16> to vector<64x128xbf16>
    %23 = arith.extf %22 : vector<64x128xbf16> to vector<64x128xf32>
    %cst_19 = arith.constant dense<0.000000e+00> : vector<64x64xf32>
    %24 = tpu.matmul %23, %0, %cst_19 {dimension_numbers = #tpu.dot_dimension_numbers<[1], [0], [0], [1], [0, 0, 1, 1], [], []>} : vector<64x128xf32>, vector<128x64xf32>, vector<64x64xf32> -> vector<64x64xf32>
    %c2_20 = arith.constant 2 : index
    %c0_21 = arith.constant 0 : index
    %c0_22 = arith.constant 0 : index
    %25 = vector.load %arg2[%c2_20, %c0_21, %c0_22] : memref<4x64x128xbf16, #tpu.memory_space<vmem>>, vector<1x64x128xbf16>
    %26 = vector.shape_cast %25 : vector<1x64x128xbf16> to vector<64x128xbf16>
    %27 = arith.extf %26 : vector<64x128xbf16> to vector<64x128xf32>
    %cst_23 = arith.constant dense<0.000000e+00> : vector<64x128xf32>
    %28 = tpu.matmul %24, %27, %cst_23 {dimension_numbers = #tpu.dot_dimension_numbers<[1], [0], [0], [1], [0, 0, 1, 1], [], []>} : vector<64x64xf32>, vector<64x128xf32>, vector<64x128xf32> -> vector<64x128xf32>
    %29 = arith.addf %20, %28 : vector<64x128xf32>
    %c3 = arith.constant 3 : index
    %c0_24 = arith.constant 0 : index
    %c0_25 = arith.constant 0 : index
    %30 = vector.load %arg1[%c3, %c0_24, %c0_25] : memref<4x64x128xbf16, #tpu.memory_space<vmem>>, vector<1x64x128xbf16>
    %31 = vector.shape_cast %30 : vector<1x64x128xbf16> to vector<64x128xbf16>
    %32 = arith.extf %31 : vector<64x128xbf16> to vector<64x128xf32>
    %cst_26 = arith.constant dense<0.000000e+00> : vector<64x64xf32>
    %33 = tpu.matmul %32, %0, %cst_26 {dimension_numbers = #tpu.dot_dimension_numbers<[1], [0], [0], [1], [0, 0, 1, 1], [], []>} : vector<64x128xf32>, vector<128x64xf32>, vector<64x64xf32> -> vector<64x64xf32>
    %c3_27 = arith.constant 3 : index
    %c0_28 = arith.constant 0 : index
    %c0_29 = arith.constant 0 : index
    %34 = vector.load %arg2[%c3_27, %c0_28, %c0_29] : memref<4x64x128xbf16, #tpu.memory_space<vmem>>, vector<1x64x128xbf16>
    %35 = vector.shape_cast %34 : vector<1x64x128xbf16> to vector<64x128xbf16>
    %36 = arith.extf %35 : vector<64x128xbf16> to vector<64x128xf32>
    %cst_30 = arith.constant dense<0.000000e+00> : vector<64x128xf32>
    %37 = tpu.matmul %33, %36, %cst_30 {dimension_numbers = #tpu.dot_dimension_numbers<[1], [0], [0], [1], [0, 0, 1, 1], [], []>} : vector<64x64xf32>, vector<64x128xf32>, vector<64x128xf32> -> vector<64x128xf32>
    %38 = arith.addf %29, %37 : vector<64x128xf32>
    %cst_31 = arith.constant 0.00999999977 : f32
    %39 = vector.broadcast %cst_31 : f32 to vector<64x128xf32>
    %40 = arith.mulf %39, %38 : vector<64x128xf32>
    %41 = arith.maximumf %38, %40 : vector<64x128xf32>
    %c0_32 = arith.constant 0 : index
    %c0_33 = arith.constant 0 : index
    %42 = vector.load %arg6[%c0_32, %c0_33] : memref<1x128xf32, #tpu.memory_space<vmem>>, vector<1x128xf32>
    %c0_34 = arith.constant 0 : index
    %c0_35 = arith.constant 0 : index
    %c0_36 = arith.constant 0 : index
    %43 = vector.load %arg4[%c0_34, %c0_35, %c0_36] : memref<4x32x64xbf16, #tpu.memory_space<vmem>>, vector<1x32x64xbf16>
    %44 = vector.shape_cast %43 : vector<1x32x64xbf16> to vector<32x64xbf16>
    %45 = arith.extf %44 : vector<32x64xbf16> to vector<32x64xf32>
    %cst_37 = arith.constant dense<0.000000e+00> : vector<32x128xf32>
    %46 = tpu.matmul %45, %41, %cst_37 {dimension_numbers = #tpu.dot_dimension_numbers<[1], [0], [0], [1], [0, 0, 1, 1], [], []>} : vector<32x64xf32>, vector<64x128xf32>, vector<32x128xf32> -> vector<32x128xf32>
    %c0_38 = arith.constant 0 : index
    %c0_39 = arith.constant 0 : index
    %c0_40 = arith.constant 0 : index
    %47 = vector.load %arg5[%c0_38, %c0_39, %c0_40] : memref<4x128x128xbf16, #tpu.memory_space<vmem>>, vector<1x128x128xbf16>
    %48 = vector.shape_cast %47 : vector<1x128x128xbf16> to vector<128x128xbf16>
    %49 = arith.extf %48 : vector<128x128xbf16> to vector<128x128xf32>
    %cst_41 = arith.constant dense<0.000000e+00> : vector<32x128xf32>
    %50 = tpu.matmul %46, %49, %cst_41 {dimension_numbers = #tpu.dot_dimension_numbers<[1], [0], [0], [1], [0, 0, 1, 1], [], []>} : vector<32x128xf32>, vector<128x128xf32>, vector<32x128xf32> -> vector<32x128xf32>
    %51 = vector.broadcast %42 : vector<1x128xf32> to vector<32x128xf32>
    %52 = arith.addf %51, %50 : vector<32x128xf32>
    %c1_42 = arith.constant 1 : index
    %c0_43 = arith.constant 0 : index
    %c0_44 = arith.constant 0 : index
    %53 = vector.load %arg4[%c1_42, %c0_43, %c0_44] : memref<4x32x64xbf16, #tpu.memory_space<vmem>>, vector<1x32x64xbf16>
    %54 = vector.shape_cast %53 : vector<1x32x64xbf16> to vector<32x64xbf16>
    %55 = arith.extf %54 : vector<32x64xbf16> to vector<32x64xf32>
    %cst_45 = arith.constant dense<0.000000e+00> : vector<32x128xf32>
    %56 = tpu.matmul %55, %41, %cst_45 {dimension_numbers = #tpu.dot_dimension_numbers<[1], [0], [0], [1], [0, 0, 1, 1], [], []>} : vector<32x64xf32>, vector<64x128xf32>, vector<32x128xf32> -> vector<32x128xf32>
    %c1_46 = arith.constant 1 : index
    %c0_47 = arith.constant 0 : index
    %c0_48 = arith.constant 0 : index
    %57 = vector.load %arg5[%c1_46, %c0_47, %c0_48] : memref<4x128x128xbf16, #tpu.memory_space<vmem>>, vector<1x128x128xbf16>
    %58 = vector.shape_cast %57 : vector<1x128x128xbf16> to vector<128x128xbf16>
    %59 = arith.extf %58 : vector<128x128xbf16> to vector<128x128xf32>
    %cst_49 = arith.constant dense<0.000000e+00> : vector<32x128xf32>
    %60 = tpu.matmul %56, %59, %cst_49 {dimension_numbers = #tpu.dot_dimension_numbers<[1], [0], [0], [1], [0, 0, 1, 1], [], []>} : vector<32x128xf32>, vector<128x128xf32>, vector<32x128xf32> -> vector<32x128xf32>
    %61 = arith.addf %52, %60 : vector<32x128xf32>
    %c2_50 = arith.constant 2 : index
    %c0_51 = arith.constant 0 : index
    %c0_52 = arith.constant 0 : index
    %62 = vector.load %arg4[%c2_50, %c0_51, %c0_52] : memref<4x32x64xbf16, #tpu.memory_space<vmem>>, vector<1x32x64xbf16>
    %63 = vector.shape_cast %62 : vector<1x32x64xbf16> to vector<32x64xbf16>
    %64 = arith.extf %63 : vector<32x64xbf16> to vector<32x64xf32>
    %cst_53 = arith.constant dense<0.000000e+00> : vector<32x128xf32>
    %65 = tpu.matmul %64, %41, %cst_53 {dimension_numbers = #tpu.dot_dimension_numbers<[1], [0], [0], [1], [0, 0, 1, 1], [], []>} : vector<32x64xf32>, vector<64x128xf32>, vector<32x128xf32> -> vector<32x128xf32>
    %c2_54 = arith.constant 2 : index
    %c0_55 = arith.constant 0 : index
    %c0_56 = arith.constant 0 : index
    %66 = vector.load %arg5[%c2_54, %c0_55, %c0_56] : memref<4x128x128xbf16, #tpu.memory_space<vmem>>, vector<1x128x128xbf16>
    %67 = vector.shape_cast %66 : vector<1x128x128xbf16> to vector<128x128xbf16>
    %68 = arith.extf %67 : vector<128x128xbf16> to vector<128x128xf32>
    %cst_57 = arith.constant dense<0.000000e+00> : vector<32x128xf32>
    %69 = tpu.matmul %65, %68, %cst_57 {dimension_numbers = #tpu.dot_dimension_numbers<[1], [0], [0], [1], [0, 0, 1, 1], [], []>} : vector<32x128xf32>, vector<128x128xf32>, vector<32x128xf32> -> vector<32x128xf32>
    %70 = arith.addf %61, %69 : vector<32x128xf32>
    %c3_58 = arith.constant 3 : index
    %c0_59 = arith.constant 0 : index
    %c0_60 = arith.constant 0 : index
    %71 = vector.load %arg4[%c3_58, %c0_59, %c0_60] : memref<4x32x64xbf16, #tpu.memory_space<vmem>>, vector<1x32x64xbf16>
    %72 = vector.shape_cast %71 : vector<1x32x64xbf16> to vector<32x64xbf16>
    %73 = arith.extf %72 : vector<32x64xbf16> to vector<32x64xf32>
    %cst_61 = arith.constant dense<0.000000e+00> : vector<32x128xf32>
    %74 = tpu.matmul %73, %41, %cst_61 {dimension_numbers = #tpu.dot_dimension_numbers<[1], [0], [0], [1], [0, 0, 1, 1], [], []>} : vector<32x64xf32>, vector<64x128xf32>, vector<32x128xf32> -> vector<32x128xf32>
    %c3_62 = arith.constant 3 : index
    %c0_63 = arith.constant 0 : index
    %c0_64 = arith.constant 0 : index
    %75 = vector.load %arg5[%c3_62, %c0_63, %c0_64] : memref<4x128x128xbf16, #tpu.memory_space<vmem>>, vector<1x128x128xbf16>
    %76 = vector.shape_cast %75 : vector<1x128x128xbf16> to vector<128x128xbf16>
    %77 = arith.extf %76 : vector<128x128xbf16> to vector<128x128xf32>
    %cst_65 = arith.constant dense<0.000000e+00> : vector<32x128xf32>
    %78 = tpu.matmul %74, %77, %cst_65 {dimension_numbers = #tpu.dot_dimension_numbers<[1], [0], [0], [1], [0, 0, 1, 1], [], []>} : vector<32x128xf32>, vector<128x128xf32>, vector<32x128xf32> -> vector<32x128xf32>
    %79 = arith.addf %70, %78 : vector<32x128xf32>
    %cst_66 = arith.constant 0.00999999977 : f32
    %80 = vector.broadcast %cst_66 : f32 to vector<32x128xf32>
    %81 = arith.mulf %80, %79 : vector<32x128xf32>
    %82 = arith.maximumf %79, %81 : vector<32x128xf32>
    %c0_67 = arith.constant 0 : index
    %c0_68 = arith.constant 0 : index
    %83 = vector.load %arg9[%c0_67, %c0_68] : memref<1x128xf32, #tpu.memory_space<vmem>>, vector<1x128xf32>
    %c0_69 = arith.constant 0 : index
    %c0_70 = arith.constant 0 : index
    %c0_71 = arith.constant 0 : index
    %84 = vector.load %arg7[%c0_69, %c0_70, %c0_71] : memref<4x16x32xbf16, #tpu.memory_space<vmem>>, vector<1x16x32xbf16>
    %85 = vector.shape_cast %84 : vector<1x16x32xbf16> to vector<16x32xbf16>
    %86 = arith.extf %85 : vector<16x32xbf16> to vector<16x32xf32>
    %cst_72 = arith.constant dense<0.000000e+00> : vector<16x128xf32>
    %87 = tpu.matmul %86, %82, %cst_72 {dimension_numbers = #tpu.dot_dimension_numbers<[1], [0], [0], [1], [0, 0, 1, 1], [], []>} : vector<16x32xf32>, vector<32x128xf32>, vector<16x128xf32> -> vector<16x128xf32>
    %c0_73 = arith.constant 0 : index
    %c0_74 = arith.constant 0 : index
    %c0_75 = arith.constant 0 : index
    %88 = vector.load %arg8[%c0_73, %c0_74, %c0_75] : memref<4x128x128xbf16, #tpu.memory_space<vmem>>, vector<1x128x128xbf16>
    %89 = vector.shape_cast %88 : vector<1x128x128xbf16> to vector<128x128xbf16>
    %90 = arith.extf %89 : vector<128x128xbf16> to vector<128x128xf32>
    %cst_76 = arith.constant dense<0.000000e+00> : vector<16x128xf32>
    %91 = tpu.matmul %87, %90, %cst_76 {dimension_numbers = #tpu.dot_dimension_numbers<[1], [0], [0], [1], [0, 0, 1, 1], [], []>} : vector<16x128xf32>, vector<128x128xf32>, vector<16x128xf32> -> vector<16x128xf32>
    %92 = vector.broadcast %83 : vector<1x128xf32> to vector<16x128xf32>
    %93 = arith.addf %92, %91 : vector<16x128xf32>
    %c1_77 = arith.constant 1 : index
    %c0_78 = arith.constant 0 : index
    %c0_79 = arith.constant 0 : index
    %94 = vector.load %arg7[%c1_77, %c0_78, %c0_79] : memref<4x16x32xbf16, #tpu.memory_space<vmem>>, vector<1x16x32xbf16>
    %95 = vector.shape_cast %94 : vector<1x16x32xbf16> to vector<16x32xbf16>
    %96 = arith.extf %95 : vector<16x32xbf16> to vector<16x32xf32>
    %cst_80 = arith.constant dense<0.000000e+00> : vector<16x128xf32>
    %97 = tpu.matmul %96, %82, %cst_80 {dimension_numbers = #tpu.dot_dimension_numbers<[1], [0], [0], [1], [0, 0, 1, 1], [], []>} : vector<16x32xf32>, vector<32x128xf32>, vector<16x128xf32> -> vector<16x128xf32>
    %c1_81 = arith.constant 1 : index
    %c0_82 = arith.constant 0 : index
    %c0_83 = arith.constant 0 : index
    %98 = vector.load %arg8[%c1_81, %c0_82, %c0_83] : memref<4x128x128xbf16, #tpu.memory_space<vmem>>, vector<1x128x128xbf16>
    %99 = vector.shape_cast %98 : vector<1x128x128xbf16> to vector<128x128xbf16>
    %100 = arith.extf %99 : vector<128x128xbf16> to vector<128x128xf32>
    %cst_84 = arith.constant dense<0.000000e+00> : vector<16x128xf32>
    %101 = tpu.matmul %97, %100, %cst_84 {dimension_numbers = #tpu.dot_dimension_numbers<[1], [0], [0], [1], [0, 0, 1, 1], [], []>} : vector<16x128xf32>, vector<128x128xf32>, vector<16x128xf32> -> vector<16x128xf32>
    %102 = arith.addf %93, %101 : vector<16x128xf32>
    %c2_85 = arith.constant 2 : index
    %c0_86 = arith.constant 0 : index
    %c0_87 = arith.constant 0 : index
    %103 = vector.load %arg7[%c2_85, %c0_86, %c0_87] : memref<4x16x32xbf16, #tpu.memory_space<vmem>>, vector<1x16x32xbf16>
    %104 = vector.shape_cast %103 : vector<1x16x32xbf16> to vector<16x32xbf16>
    %105 = arith.extf %104 : vector<16x32xbf16> to vector<16x32xf32>
    %cst_88 = arith.constant dense<0.000000e+00> : vector<16x128xf32>
    %106 = tpu.matmul %105, %82, %cst_88 {dimension_numbers = #tpu.dot_dimension_numbers<[1], [0], [0], [1], [0, 0, 1, 1], [], []>} : vector<16x32xf32>, vector<32x128xf32>, vector<16x128xf32> -> vector<16x128xf32>
    %c2_89 = arith.constant 2 : index
    %c0_90 = arith.constant 0 : index
    %c0_91 = arith.constant 0 : index
    %107 = vector.load %arg8[%c2_89, %c0_90, %c0_91] : memref<4x128x128xbf16, #tpu.memory_space<vmem>>, vector<1x128x128xbf16>
    %108 = vector.shape_cast %107 : vector<1x128x128xbf16> to vector<128x128xbf16>
    %109 = arith.extf %108 : vector<128x128xbf16> to vector<128x128xf32>
    %cst_92 = arith.constant dense<0.000000e+00> : vector<16x128xf32>
    %110 = tpu.matmul %106, %109, %cst_92 {dimension_numbers = #tpu.dot_dimension_numbers<[1], [0], [0], [1], [0, 0, 1, 1], [], []>} : vector<16x128xf32>, vector<128x128xf32>, vector<16x128xf32> -> vector<16x128xf32>
    %111 = arith.addf %102, %110 : vector<16x128xf32>
    %c3_93 = arith.constant 3 : index
    %c0_94 = arith.constant 0 : index
    %c0_95 = arith.constant 0 : index
    %112 = vector.load %arg7[%c3_93, %c0_94, %c0_95] : memref<4x16x32xbf16, #tpu.memory_space<vmem>>, vector<1x16x32xbf16>
    %113 = vector.shape_cast %112 : vector<1x16x32xbf16> to vector<16x32xbf16>
    %114 = arith.extf %113 : vector<16x32xbf16> to vector<16x32xf32>
    %cst_96 = arith.constant dense<0.000000e+00> : vector<16x128xf32>
    %115 = tpu.matmul %114, %82, %cst_96 {dimension_numbers = #tpu.dot_dimension_numbers<[1], [0], [0], [1], [0, 0, 1, 1], [], []>} : vector<16x32xf32>, vector<32x128xf32>, vector<16x128xf32> -> vector<16x128xf32>
    %c3_97 = arith.constant 3 : index
    %c0_98 = arith.constant 0 : index
    %c0_99 = arith.constant 0 : index
    %116 = vector.load %arg8[%c3_97, %c0_98, %c0_99] : memref<4x128x128xbf16, #tpu.memory_space<vmem>>, vector<1x128x128xbf16>
    %117 = vector.shape_cast %116 : vector<1x128x128xbf16> to vector<128x128xbf16>
    %118 = arith.extf %117 : vector<128x128xbf16> to vector<128x128xf32>
    %cst_100 = arith.constant dense<0.000000e+00> : vector<16x128xf32>
    %119 = tpu.matmul %115, %118, %cst_100 {dimension_numbers = #tpu.dot_dimension_numbers<[1], [0], [0], [1], [0, 0, 1, 1], [], []>} : vector<16x128xf32>, vector<128x128xf32>, vector<16x128xf32> -> vector<16x128xf32>
    %120 = arith.addf %111, %119 : vector<16x128xf32>
    %cst_101 = arith.constant 0.00999999977 : f32
    %121 = vector.broadcast %cst_101 : f32 to vector<16x128xf32>
    %122 = arith.mulf %121, %120 : vector<16x128xf32>
    %123 = arith.maximumf %120, %122 : vector<16x128xf32>
    %c0_102 = arith.constant 0 : index
    %c0_103 = arith.constant 0 : index
    %124 = vector.load %arg12[%c0_102, %c0_103] : memref<1x128xf32, #tpu.memory_space<vmem>>, vector<1x128xf32>
    %c0_104 = arith.constant 0 : index
    %c0_105 = arith.constant 0 : index
    %c0_106 = arith.constant 0 : index
    %125 = vector.load %arg10[%c0_104, %c0_105, %c0_106] : memref<4x8x16xbf16, #tpu.memory_space<vmem>>, vector<1x8x16xbf16>
    %126 = vector.shape_cast %125 : vector<1x8x16xbf16> to vector<8x16xbf16>
    %127 = arith.extf %126 : vector<8x16xbf16> to vector<8x16xf32>
    %cst_107 = arith.constant dense<0.000000e+00> : vector<8x128xf32>
    %128 = tpu.matmul %127, %123, %cst_107 {dimension_numbers = #tpu.dot_dimension_numbers<[1], [0], [0], [1], [0, 0, 1, 1], [], []>} : vector<8x16xf32>, vector<16x128xf32>, vector<8x128xf32> -> vector<8x128xf32>
    %c0_108 = arith.constant 0 : index
    %c0_109 = arith.constant 0 : index
    %c0_110 = arith.constant 0 : index
    %129 = vector.load %arg11[%c0_108, %c0_109, %c0_110] : memref<4x128x128xbf16, #tpu.memory_space<vmem>>, vector<1x128x128xbf16>
    %130 = vector.shape_cast %129 : vector<1x128x128xbf16> to vector<128x128xbf16>
    %131 = arith.extf %130 : vector<128x128xbf16> to vector<128x128xf32>
    %cst_111 = arith.constant dense<0.000000e+00> : vector<8x128xf32>
    %132 = tpu.matmul %128, %131, %cst_111 {dimension_numbers = #tpu.dot_dimension_numbers<[1], [0], [0], [1], [0, 0, 1, 1], [], []>} : vector<8x128xf32>, vector<128x128xf32>, vector<8x128xf32> -> vector<8x128xf32>
    %133 = vector.broadcast %124 : vector<1x128xf32> to vector<8x128xf32>
    %134 = arith.addf %133, %132 : vector<8x128xf32>
    %c1_112 = arith.constant 1 : index
    %c0_113 = arith.constant 0 : index
    %c0_114 = arith.constant 0 : index
    %135 = vector.load %arg10[%c1_112, %c0_113, %c0_114] : memref<4x8x16xbf16, #tpu.memory_space<vmem>>, vector<1x8x16xbf16>
    %136 = vector.shape_cast %135 : vector<1x8x16xbf16> to vector<8x16xbf16>
    %137 = arith.extf %136 : vector<8x16xbf16> to vector<8x16xf32>
    %cst_115 = arith.constant dense<0.000000e+00> : vector<8x128xf32>
    %138 = tpu.matmul %137, %123, %cst_115 {dimension_numbers = #tpu.dot_dimension_numbers<[1], [0], [0], [1], [0, 0, 1, 1], [], []>} : vector<8x16xf32>, vector<16x128xf32>, vector<8x128xf32> -> vector<8x128xf32>
    %c1_116 = arith.constant 1 : index
    %c0_117 = arith.constant 0 : index
    %c0_118 = arith.constant 0 : index
    %139 = vector.load %arg11[%c1_116, %c0_117, %c0_118] : memref<4x128x128xbf16, #tpu.memory_space<vmem>>, vector<1x128x128xbf16>
    %140 = vector.shape_cast %139 : vector<1x128x128xbf16> to vector<128x128xbf16>
    %141 = arith.extf %140 : vector<128x128xbf16> to vector<128x128xf32>
    %cst_119 = arith.constant dense<0.000000e+00> : vector<8x128xf32>
    %142 = tpu.matmul %138, %141, %cst_119 {dimension_numbers = #tpu.dot_dimension_numbers<[1], [0], [0], [1], [0, 0, 1, 1], [], []>} : vector<8x128xf32>, vector<128x128xf32>, vector<8x128xf32> -> vector<8x128xf32>
    %143 = arith.addf %134, %142 : vector<8x128xf32>
    %c2_120 = arith.constant 2 : index
    %c0_121 = arith.constant 0 : index
    %c0_122 = arith.constant 0 : index
    %144 = vector.load %arg10[%c2_120, %c0_121, %c0_122] : memref<4x8x16xbf16, #tpu.memory_space<vmem>>, vector<1x8x16xbf16>
    %145 = vector.shape_cast %144 : vector<1x8x16xbf16> to vector<8x16xbf16>
    %146 = arith.extf %145 : vector<8x16xbf16> to vector<8x16xf32>
    %cst_123 = arith.constant dense<0.000000e+00> : vector<8x128xf32>
    %147 = tpu.matmul %146, %123, %cst_123 {dimension_numbers = #tpu.dot_dimension_numbers<[1], [0], [0], [1], [0, 0, 1, 1], [], []>} : vector<8x16xf32>, vector<16x128xf32>, vector<8x128xf32> -> vector<8x128xf32>
    %c2_124 = arith.constant 2 : index
    %c0_125 = arith.constant 0 : index
    %c0_126 = arith.constant 0 : index
    %148 = vector.load %arg11[%c2_124, %c0_125, %c0_126] : memref<4x128x128xbf16, #tpu.memory_space<vmem>>, vector<1x128x128xbf16>
    %149 = vector.shape_cast %148 : vector<1x128x128xbf16> to vector<128x128xbf16>
    %150 = arith.extf %149 : vector<128x128xbf16> to vector<128x128xf32>
    %cst_127 = arith.constant dense<0.000000e+00> : vector<8x128xf32>
    %151 = tpu.matmul %147, %150, %cst_127 {dimension_numbers = #tpu.dot_dimension_numbers<[1], [0], [0], [1], [0, 0, 1, 1], [], []>} : vector<8x128xf32>, vector<128x128xf32>, vector<8x128xf32> -> vector<8x128xf32>
    %152 = arith.addf %143, %151 : vector<8x128xf32>
    %c3_128 = arith.constant 3 : index
    %c0_129 = arith.constant 0 : index
    %c0_130 = arith.constant 0 : index
    %153 = vector.load %arg10[%c3_128, %c0_129, %c0_130] : memref<4x8x16xbf16, #tpu.memory_space<vmem>>, vector<1x8x16xbf16>
    %154 = vector.shape_cast %153 : vector<1x8x16xbf16> to vector<8x16xbf16>
    %155 = arith.extf %154 : vector<8x16xbf16> to vector<8x16xf32>
    %cst_131 = arith.constant dense<0.000000e+00> : vector<8x128xf32>
    %156 = tpu.matmul %155, %123, %cst_131 {dimension_numbers = #tpu.dot_dimension_numbers<[1], [0], [0], [1], [0, 0, 1, 1], [], []>} : vector<8x16xf32>, vector<16x128xf32>, vector<8x128xf32> -> vector<8x128xf32>
    %c3_132 = arith.constant 3 : index
    %c0_133 = arith.constant 0 : index
    %c0_134 = arith.constant 0 : index
    %157 = vector.load %arg11[%c3_132, %c0_133, %c0_134] : memref<4x128x128xbf16, #tpu.memory_space<vmem>>, vector<1x128x128xbf16>
    %158 = vector.shape_cast %157 : vector<1x128x128xbf16> to vector<128x128xbf16>
    %159 = arith.extf %158 : vector<128x128xbf16> to vector<128x128xf32>
    %cst_135 = arith.constant dense<0.000000e+00> : vector<8x128xf32>
    %160 = tpu.matmul %156, %159, %cst_135 {dimension_numbers = #tpu.dot_dimension_numbers<[1], [0], [0], [1], [0, 0, 1, 1], [], []>} : vector<8x128xf32>, vector<128x128xf32>, vector<8x128xf32> -> vector<8x128xf32>
    %161 = arith.addf %152, %160 : vector<8x128xf32>
    %cst_136 = arith.constant 0.00999999977 : f32
    %162 = vector.broadcast %cst_136 : f32 to vector<8x128xf32>
    %163 = arith.mulf %162, %161 : vector<8x128xf32>
    %164 = arith.maximumf %161, %163 : vector<8x128xf32>
    %c0_137 = arith.constant 0 : index
    %c0_138 = arith.constant 0 : index
    %165 = vector.load %arg15[%c0_137, %c0_138] : memref<1x128xf32, #tpu.memory_space<vmem>>, vector<1x128xf32>
    %c0_139 = arith.constant 0 : index
    %c0_140 = arith.constant 0 : index
    %c0_141 = arith.constant 0 : index
    %166 = vector.load %arg13[%c0_139, %c0_140, %c0_141] : memref<4x4x8xbf16, #tpu.memory_space<vmem>>, vector<1x4x8xbf16>
    %167 = vector.shape_cast %166 : vector<1x4x8xbf16> to vector<4x8xbf16>
    %168 = arith.extf %167 : vector<4x8xbf16> to vector<4x8xf32>
    %cst_142 = arith.constant dense<0.000000e+00> : vector<4x128xf32>
    %169 = tpu.matmul %168, %164, %cst_142 {dimension_numbers = #tpu.dot_dimension_numbers<[1], [0], [0], [1], [0, 0, 1, 1], [], []>} : vector<4x8xf32>, vector<8x128xf32>, vector<4x128xf32> -> vector<4x128xf32>
    %c0_143 = arith.constant 0 : index
    %c0_144 = arith.constant 0 : index
    %c0_145 = arith.constant 0 : index
    %170 = vector.load %arg14[%c0_143, %c0_144, %c0_145] : memref<4x128x128xbf16, #tpu.memory_space<vmem>>, vector<1x128x128xbf16>
    %171 = vector.shape_cast %170 : vector<1x128x128xbf16> to vector<128x128xbf16>
    %172 = arith.extf %171 : vector<128x128xbf16> to vector<128x128xf32>
    %cst_146 = arith.constant dense<0.000000e+00> : vector<4x128xf32>
    %173 = tpu.matmul %169, %172, %cst_146 {dimension_numbers = #tpu.dot_dimension_numbers<[1], [0], [0], [1], [0, 0, 1, 1], [], []>} : vector<4x128xf32>, vector<128x128xf32>, vector<4x128xf32> -> vector<4x128xf32>
    %174 = vector.broadcast %165 : vector<1x128xf32> to vector<4x128xf32>
    %175 = arith.addf %174, %173 : vector<4x128xf32>
    %c1_147 = arith.constant 1 : index
    %c0_148 = arith.constant 0 : index
    %c0_149 = arith.constant 0 : index
    %176 = vector.load %arg13[%c1_147, %c0_148, %c0_149] : memref<4x4x8xbf16, #tpu.memory_space<vmem>>, vector<1x4x8xbf16>
    %177 = vector.shape_cast %176 : vector<1x4x8xbf16> to vector<4x8xbf16>
    %178 = arith.extf %177 : vector<4x8xbf16> to vector<4x8xf32>
    %cst_150 = arith.constant dense<0.000000e+00> : vector<4x128xf32>
    %179 = tpu.matmul %178, %164, %cst_150 {dimension_numbers = #tpu.dot_dimension_numbers<[1], [0], [0], [1], [0, 0, 1, 1], [], []>} : vector<4x8xf32>, vector<8x128xf32>, vector<4x128xf32> -> vector<4x128xf32>
    %c1_151 = arith.constant 1 : index
    %c0_152 = arith.constant 0 : index
    %c0_153 = arith.constant 0 : index
    %180 = vector.load %arg14[%c1_151, %c0_152, %c0_153] : memref<4x128x128xbf16, #tpu.memory_space<vmem>>, vector<1x128x128xbf16>
    %181 = vector.shape_cast %180 : vector<1x128x128xbf16> to vector<128x128xbf16>
    %182 = arith.extf %181 : vector<128x128xbf16> to vector<128x128xf32>
    %cst_154 = arith.constant dense<0.000000e+00> : vector<4x128xf32>
    %183 = tpu.matmul %179, %182, %cst_154 {dimension_numbers = #tpu.dot_dimension_numbers<[1], [0], [0], [1], [0, 0, 1, 1], [], []>} : vector<4x128xf32>, vector<128x128xf32>, vector<4x128xf32> -> vector<4x128xf32>
    %184 = arith.addf %175, %183 : vector<4x128xf32>
    %c2_155 = arith.constant 2 : index
    %c0_156 = arith.constant 0 : index
    %c0_157 = arith.constant 0 : index
    %185 = vector.load %arg13[%c2_155, %c0_156, %c0_157] : memref<4x4x8xbf16, #tpu.memory_space<vmem>>, vector<1x4x8xbf16>
    %186 = vector.shape_cast %185 : vector<1x4x8xbf16> to vector<4x8xbf16>
    %187 = arith.extf %186 : vector<4x8xbf16> to vector<4x8xf32>
    %cst_158 = arith.constant dense<0.000000e+00> : vector<4x128xf32>
    %188 = tpu.matmul %187, %164, %cst_158 {dimension_numbers = #tpu.dot_dimension_numbers<[1], [0], [0], [1], [0, 0, 1, 1], [], []>} : vector<4x8xf32>, vector<8x128xf32>, vector<4x128xf32> -> vector<4x128xf32>
    %c2_159 = arith.constant 2 : index
    %c0_160 = arith.constant 0 : index
    %c0_161 = arith.constant 0 : index
    %189 = vector.load %arg14[%c2_159, %c0_160, %c0_161] : memref<4x128x128xbf16, #tpu.memory_space<vmem>>, vector<1x128x128xbf16>
    %190 = vector.shape_cast %189 : vector<1x128x128xbf16> to vector<128x128xbf16>
    %191 = arith.extf %190 : vector<128x128xbf16> to vector<128x128xf32>
    %cst_162 = arith.constant dense<0.000000e+00> : vector<4x128xf32>
    %192 = tpu.matmul %188, %191, %cst_162 {dimension_numbers = #tpu.dot_dimension_numbers<[1], [0], [0], [1], [0, 0, 1, 1], [], []>} : vector<4x128xf32>, vector<128x128xf32>, vector<4x128xf32> -> vector<4x128xf32>
    %193 = arith.addf %184, %192 : vector<4x128xf32>
    %c3_163 = arith.constant 3 : index
    %c0_164 = arith.constant 0 : index
    %c0_165 = arith.constant 0 : index
    %194 = vector.load %arg13[%c3_163, %c0_164, %c0_165] : memref<4x4x8xbf16, #tpu.memory_space<vmem>>, vector<1x4x8xbf16>
    %195 = vector.shape_cast %194 : vector<1x4x8xbf16> to vector<4x8xbf16>
    %196 = arith.extf %195 : vector<4x8xbf16> to vector<4x8xf32>
    %cst_166 = arith.constant dense<0.000000e+00> : vector<4x128xf32>
    %197 = tpu.matmul %196, %164, %cst_166 {dimension_numbers = #tpu.dot_dimension_numbers<[1], [0], [0], [1], [0, 0, 1, 1], [], []>} : vector<4x8xf32>, vector<8x128xf32>, vector<4x128xf32> -> vector<4x128xf32>
    %c3_167 = arith.constant 3 : index
    %c0_168 = arith.constant 0 : index
    %c0_169 = arith.constant 0 : index
    %198 = vector.load %arg14[%c3_167, %c0_168, %c0_169] : memref<4x128x128xbf16, #tpu.memory_space<vmem>>, vector<1x128x128xbf16>
    %199 = vector.shape_cast %198 : vector<1x128x128xbf16> to vector<128x128xbf16>
    %200 = arith.extf %199 : vector<128x128xbf16> to vector<128x128xf32>
    %cst_170 = arith.constant dense<0.000000e+00> : vector<4x128xf32>
    %201 = tpu.matmul %197, %200, %cst_170 {dimension_numbers = #tpu.dot_dimension_numbers<[1], [0], [0], [1], [0, 0, 1, 1], [], []>} : vector<4x128xf32>, vector<128x128xf32>, vector<4x128xf32> -> vector<4x128xf32>
    %202 = arith.addf %193, %201 : vector<4x128xf32>
    %cst_171 = arith.constant 0.00999999977 : f32
    %203 = vector.broadcast %cst_171 : f32 to vector<4x128xf32>
    %204 = arith.mulf %203, %202 : vector<4x128xf32>
    %205 = arith.maximumf %202, %204 : vector<4x128xf32>
    %c0_172 = arith.constant 0 : index
    %c0_173 = arith.constant 0 : index
    %206 = vector.load %arg18[%c0_172, %c0_173] : memref<1x128xf32, #tpu.memory_space<vmem>>, vector<1x128xf32>
    %c0_174 = arith.constant 0 : index
    %c0_175 = arith.constant 0 : index
    %c0_176 = arith.constant 0 : index
    %207 = vector.load %arg16[%c0_174, %c0_175, %c0_176] : memref<2x2x4xbf16, #tpu.memory_space<vmem>>, vector<1x2x4xbf16>
    %208 = vector.shape_cast %207 : vector<1x2x4xbf16> to vector<2x4xbf16>
    %209 = arith.extf %208 : vector<2x4xbf16> to vector<2x4xf32>
    %cst_177 = arith.constant dense<0.000000e+00> : vector<2x128xf32>
    %210 = tpu.matmul %209, %205, %cst_177 {dimension_numbers = #tpu.dot_dimension_numbers<[1], [0], [0], [1], [0, 0, 1, 1], [], []>} : vector<2x4xf32>, vector<4x128xf32>, vector<2x128xf32> -> vector<2x128xf32>
    %c0_178 = arith.constant 0 : index
    %c0_179 = arith.constant 0 : index
    %c0_180 = arith.constant 0 : index
    %211 = vector.load %arg17[%c0_178, %c0_179, %c0_180] : memref<2x128x128xbf16, #tpu.memory_space<vmem>>, vector<1x128x128xbf16>
    %212 = vector.shape_cast %211 : vector<1x128x128xbf16> to vector<128x128xbf16>
    %213 = arith.extf %212 : vector<128x128xbf16> to vector<128x128xf32>
    %cst_181 = arith.constant dense<0.000000e+00> : vector<2x128xf32>
    %214 = tpu.matmul %210, %213, %cst_181 {dimension_numbers = #tpu.dot_dimension_numbers<[1], [0], [0], [1], [0, 0, 1, 1], [], []>} : vector<2x128xf32>, vector<128x128xf32>, vector<2x128xf32> -> vector<2x128xf32>
    %215 = vector.broadcast %206 : vector<1x128xf32> to vector<2x128xf32>
    %216 = arith.addf %215, %214 : vector<2x128xf32>
    %c1_182 = arith.constant 1 : index
    %c0_183 = arith.constant 0 : index
    %c0_184 = arith.constant 0 : index
    %217 = vector.load %arg16[%c1_182, %c0_183, %c0_184] : memref<2x2x4xbf16, #tpu.memory_space<vmem>>, vector<1x2x4xbf16>
    %218 = vector.shape_cast %217 : vector<1x2x4xbf16> to vector<2x4xbf16>
    %219 = arith.extf %218 : vector<2x4xbf16> to vector<2x4xf32>
    %cst_185 = arith.constant dense<0.000000e+00> : vector<2x128xf32>
    %220 = tpu.matmul %219, %205, %cst_185 {dimension_numbers = #tpu.dot_dimension_numbers<[1], [0], [0], [1], [0, 0, 1, 1], [], []>} : vector<2x4xf32>, vector<4x128xf32>, vector<2x128xf32> -> vector<2x128xf32>
    %c1_186 = arith.constant 1 : index
    %c0_187 = arith.constant 0 : index
    %c0_188 = arith.constant 0 : index
    %221 = vector.load %arg17[%c1_186, %c0_187, %c0_188] : memref<2x128x128xbf16, #tpu.memory_space<vmem>>, vector<1x128x128xbf16>
    %222 = vector.shape_cast %221 : vector<1x128x128xbf16> to vector<128x128xbf16>
    %223 = arith.extf %222 : vector<128x128xbf16> to vector<128x128xf32>
    %cst_189 = arith.constant dense<0.000000e+00> : vector<2x128xf32>
    %224 = tpu.matmul %220, %223, %cst_189 {dimension_numbers = #tpu.dot_dimension_numbers<[1], [0], [0], [1], [0, 0, 1, 1], [], []>} : vector<2x128xf32>, vector<128x128xf32>, vector<2x128xf32> -> vector<2x128xf32>
    %225 = arith.addf %216, %224 : vector<2x128xf32>
    %cst_190 = arith.constant 0.00999999977 : f32
    %226 = vector.broadcast %cst_190 : f32 to vector<2x128xf32>
    %227 = arith.mulf %226, %225 : vector<2x128xf32>
    %228 = arith.maximumf %225, %227 : vector<2x128xf32>
    %c0_191 = arith.constant 0 : index
    %c0_192 = arith.constant 0 : index
    %229 = vector.load %arg19[%c0_191, %c0_192] : memref<128x64xbf16, #tpu.memory_space<vmem>>, vector<128x64xbf16>
    %230 = arith.extf %229 : vector<128x64xbf16> to vector<128x64xf32>
    %cst_193 = arith.constant dense<0.000000e+00> : vector<2x64xf32>
    %231 = tpu.matmul %228, %230, %cst_193 {dimension_numbers = #tpu.dot_dimension_numbers<[1], [0], [0], [1], [0, 0, 1, 1], [], []>} : vector<2x128xf32>, vector<128x64xf32>, vector<2x64xf32> -> vector<2x64xf32>
    %c0_194 = arith.constant 0 : index
    %c0_195 = arith.constant 0 : index
    %232 = vector.load %arg20[%c0_194, %c0_195] : memref<1x64xf32, #tpu.memory_space<vmem>>, vector<1x64xf32>
    %233 = vector.broadcast %232 : vector<1x64xf32> to vector<2x64xf32>
    %234 = arith.addf %231, %233 : vector<2x64xf32>
    %cst_196 = arith.constant 0.000000e+00 : f32
    %235 = vector.broadcast %cst_196 : f32 to vector<2x64xf32>
    %236 = arith.subf %235, %234 : vector<2x64xf32>
    %237 = math.exp %236 : vector<2x64xf32>
    %cst_197 = arith.constant 1.000000e+00 : f32
    %238 = vector.broadcast %cst_197 : f32 to vector<2x64xf32>
    %239 = arith.addf %238, %237 : vector<2x64xf32>
    %240 = tpu.reciprocal %239 {approx = true} : vector<2x64xf32> -> vector<2x64xf32>
    %c0_198 = arith.constant 0 : index
    %c0_199 = arith.constant 0 : index
    %241 = vector.load %arg21[%c0_198, %c0_199] : memref<64x128xbf16, #tpu.memory_space<vmem>>, vector<64x128xbf16>
    %242 = arith.extf %241 : vector<64x128xbf16> to vector<64x128xf32>
    %cst_200 = arith.constant dense<0.000000e+00> : vector<2x128xf32>
    %243 = tpu.matmul %240, %242, %cst_200 {dimension_numbers = #tpu.dot_dimension_numbers<[1], [0], [0], [1], [0, 0, 1, 1], [], []>} : vector<2x64xf32>, vector<64x128xf32>, vector<2x128xf32> -> vector<2x128xf32>
    %c0_201 = arith.constant 0 : index
    %c0_202 = arith.constant 0 : index
    %244 = vector.load %arg22[%c0_201, %c0_202] : memref<1x128xf32, #tpu.memory_space<vmem>>, vector<1x128xf32>
    %245 = vector.broadcast %244 : vector<1x128xf32> to vector<2x128xf32>
    %246 = arith.addf %243, %245 : vector<2x128xf32>
    %247 = math.tanh %246 : vector<2x128xf32>
    %c0_203 = arith.constant 0 : index
    %c0_204 = arith.constant 0 : index
    %248 = vector.load %arg23[%c0_203, %c0_204] : memref<128x128xbf16, #tpu.memory_space<vmem>>, vector<128x128xbf16>
    %249 = arith.extf %248 : vector<128x128xbf16> to vector<128x128xf32>
    %cst_205 = arith.constant dense<0.000000e+00> : vector<2x128xf32>
    %250 = tpu.matmul %247, %249, %cst_205 {dimension_numbers = #tpu.dot_dimension_numbers<[1], [0], [0], [1], [0, 0, 1, 1], [], []>} : vector<2x128xf32>, vector<128x128xf32>, vector<2x128xf32> -> vector<2x128xf32>
    %c0_206 = arith.constant 0 : index
    %c0_207 = arith.constant 0 : index
    %251 = vector.load %arg24[%c0_206, %c0_207] : memref<1x128xf32, #tpu.memory_space<vmem>>, vector<1x128xf32>
    %252 = vector.broadcast %251 : vector<1x128xf32> to vector<2x128xf32>
    %253 = arith.addf %250, %252 : vector<2x128xf32>
    %254 = math.tanh %253 : vector<2x128xf32>
    %c0_208 = arith.constant 0 : index
    %c0_209 = arith.constant 0 : index
    %255 = vector.load %arg25[%c0_208, %c0_209] : memref<128x3xbf16, #tpu.memory_space<vmem>>, vector<128x3xbf16>
    %256 = arith.extf %255 : vector<128x3xbf16> to vector<128x3xf32>
    %cst_210 = arith.constant dense<0.000000e+00> : vector<2x3xf32>
    %257 = tpu.matmul %254, %256, %cst_210 {dimension_numbers = #tpu.dot_dimension_numbers<[1], [0], [0], [1], [0, 0, 1, 1], [], []>} : vector<2x128xf32>, vector<128x3xf32>, vector<2x3xf32> -> vector<2x3xf32>
    %c0_211 = arith.constant 0 : index
    %c0_212 = arith.constant 0 : index
    %258 = vector.load %arg26[%c0_211, %c0_212] : memref<1x3xf32, #tpu.memory_space<vmem>>, vector<1x3xf32>
    %259 = vector.broadcast %258 : vector<1x3xf32> to vector<2x3xf32>
    %260 = arith.addf %257, %259 : vector<2x3xf32>
    %261 = vector.extract_strided_slice %260 {offsets = [0, 0], sizes = [2, 2], strides = [1, 1]} : vector<2x3xf32> to vector<2x2xf32>
    %262 = vector.extract_strided_slice %260 {offsets = [0, 2], sizes = [2, 1], strides = [1, 1]} : vector<2x3xf32> to vector<2x1xf32>
    %c0_213 = arith.constant 0 : index
    %c0_214 = arith.constant 0 : index
    %263 = vector.load %arg30[%c0_213, %c0_214] : memref<2x1xf32, #tpu.memory_space<vmem>>, vector<2x1xf32>
    tpu.vector_store %arg30[%c0_213, %c0_214], %262 {strides = array<i32>} : memref<2x1xf32, #tpu.memory_space<vmem>>, vector<2x1xf32>,
    %c0_215 = arith.constant 0 : index
    %c0_216 = arith.constant 0 : index
    %264 = vector.load %arg27[%c0_215, %c0_216] : memref<1x2xf32, #tpu.memory_space<vmem>>, vector<1x2xf32>
    %c0_217 = arith.constant 0 : index
    %c0_218 = arith.constant 0 : index
    %265 = vector.load %arg28[%c0_217, %c0_218] : memref<2x2xf32, #tpu.memory_space<vmem>>, vector<2x2xf32>
    %266 = math.exp %264 : vector<1x2xf32>
    %267 = vector.broadcast %266 : vector<1x2xf32> to vector<2x2xf32>
    %268 = arith.mulf %267, %265 : vector<2x2xf32>
    %269 = arith.addf %261, %268 : vector<2x2xf32>
    %c0_219 = arith.constant 0 : index
    %c0_220 = arith.constant 0 : index
    %270 = vector.load %arg29[%c0_219, %c0_220] : memref<2x2xf32, #tpu.memory_space<vmem>>, vector<2x2xf32>
    tpu.vector_store %arg29[%c0_219, %c0_220], %269 {strides = array<i32>} : memref<2x2xf32, #tpu.memory_space<vmem>>, vector<2x2xf32>,
    %cst_221 = arith.constant -5.000000e-01 : f32
    %271 = vector.broadcast %cst_221 : f32 to vector<2x2xf32>
    %272 = arith.mulf %271, %265 : vector<2x2xf32>
    %273 = arith.mulf %272, %265 : vector<2x2xf32>
    %274 = vector.broadcast %264 : vector<1x2xf32> to vector<2x2xf32>
    %275 = arith.subf %273, %274 : vector<2x2xf32>
    %cst_222 = arith.constant 0.918938517 : f32
    %276 = vector.broadcast %cst_222 : f32 to vector<2x2xf32>
    %277 = arith.subf %275, %276 : vector<2x2xf32>
    %cst_223 = arith.constant dense<0.000000e+00> : vector<2xf32>
    %278 = vector.multi_reduction <add>, %277, %cst_223 [1] : vector<2x2xf32> to vector<2xf32>
    %279 = vector.shape_cast %278 : vector<2xf32> to vector<2x1xf32>
    %c0_224 = arith.constant 0 : index
    %c0_225 = arith.constant 0 : index
    %280 = vector.load %arg31[%c0_224, %c0_225] : memref<2x1xf32, #tpu.memory_space<vmem>>, vector<2x1xf32>
    tpu.vector_store %arg31[%c0_224, %c0_225], %279 {strides = array<i32>} : memref<2x1xf32, #tpu.memory_space<vmem>>, vector<2x1xf32>,
    return
  }
}

</mosaic_0001>

<bundles_post_ra>
// kernel: fused_policy_forward.1
= control target key start
LH: loop header
LB: loop body
LE: loop exit
PB: predicated region body
PF: predicated region fallthrough
CT: control target
= control target key end

     0   :  { %s9166_s6 = smov 1   ;;  %s9167_s10 = smov 2   ;;  %s10227_s0 = inlined_call_operand.smem [shape: u32[32], index: -1, kind: input, shape index: {}] }
   0x1   :  { %s9234_s5 = sld [smem:[%s10227_s0]]   ;;  %s9168_s14 = smov 3  }
   0x2   :  { %s9239_s9 = sld [smem:[%s10227_s0 + %s9166_s6]]   ;;  %s9169_s18 = smov 4  }
   0x3   :  { %s9244_s13 = sld [smem:[%s10227_s0 + %s9167_s10]]   ;;  %s9170_s22 = smov 5  }
   0x4   :  { %s9249_s17 = sld [smem:[%s10227_s0 + %s9168_s14]]   ;;  %s9171_s26 = smov 6  }
   0x5   :  { %s9254_s21 = sld [smem:[%s10227_s0 + %s9169_s18]]   ;;  %s9172_s30 = smov 7  }
   0x6   :  { %s9259_s25 = sld [smem:[%s10227_s0 + %s9170_s22]]   ;;  %s9173_s4 = smov 8  }
   0x7   :  { %10234 = sst [smem:[#allocation48_spill]] %s9234_s5  ;;  %s9174_s10 = smov 9  }
   0x8   :  { %s9264_s29 = sld [smem:[%s10227_s0 + %s9171_s26]]   ;;  %s9175_s15 = smov 10  }
   0x9   :  { %s9269_s3 = sld [smem:[%s10227_s0 + %s9172_s30]]   ;;  %s9176_s20 = smov 11  }
   0xa   :  { %10235 = sst [smem:[#allocation49_spill]] %s9249_s17  ;;  %s9177_s26 = smov 12  }
   0xb   :  { %10236 = sst [smem:[#allocation50_spill]] %s9254_s21  ;;  %s9178_s1 = smov 13  }
   0xc   :  { %s9274_s8 = sld [smem:[%s10227_s0 + %s9173_s4]]   ;;  %s9179_s7 = smov 14  }
   0xd   :  { %s9279_s14 = sld [smem:[%s10227_s0 + %s9174_s10]]   ;;  %s9181_s22 = smov 16  }
   0xe   :  { %s9284_s19 = sld [smem:[%s10227_s0 + %s9175_s15]]   ;;  %s9180_s15 = smov 15  }
   0xf   :  { %s9289_s24 = sld [smem:[%s10227_s0 + %s9176_s20]]   ;;  %s9182_s28 = smov 17  }
  0x10   :  { %s9294_s30 = sld [smem:[%s10227_s0 + %s9177_s26]]  }
  0x11   :  { %s9299_s6 = sld [smem:[%s10227_s0 + %s9178_s1]]  }
  0x12   :  { %s9304_s12 = sld [smem:[%s10227_s0 + %s9179_s7]]   ;;  %s9183_s7 = smov 18  }
  0x13   :  { %s9309_s20 = sld [smem:[%s10227_s0 + %s9180_s15]]   ;;  %s9184_s15 = smov 19  }
  0x14   :  { %10237 = sst [smem:[#allocation51_spill]] %s9284_s19 }
  0x15   :  { %s9314_s27 = sld [smem:[%s10227_s0 + %s9181_s22]]   ;;  %s9185_s22 = smov 20  }
  0x16   :  { %10238 = sst [smem:[#allocation52_spill]] %s9294_s30 }
  0x17   :  { %s9319_s4 = sld [smem:[%s10227_s0 + %s9182_s28]]   ;;  %s9186_s28 = smov 21  }
  0x18   :  { %10239 = sst [smem:[#allocation53_spill]] %s9304_s12 }
  0x19   :  { %s9324_s19 = sld [smem:[%s10227_s0 + %s9183_s7]]   ;;  %s9187_s7 = smov 22  }
  0x1a   :  { %s9329_s21 = sld [smem:[%s10227_s0 + %s9184_s15]]   ;;  %s9188_s15 = smov 23  }
  0x1b   :  { %10240 = sst [smem:[#allocation54_spill]] %s9314_s27 }
  0x1c   :  { %s9334_s27 = sld [smem:[%s10227_s0 + %s9185_s22]]   ;;  %s9189_s22 = smov 24  }
  0x1d   :  { %10241 = sst [smem:[#allocation55_spill]] %s9319_s4 }
  0x1e   :  { %s9339_s17 = sld [smem:[%s10227_s0 + %s9186_s28]]   ;;  %s9190_s28 = smov 25  }
  0x1f   :  { %s9344_s5 = sld [smem:[%s10227_s0 + %s9187_s7]]   ;;  %s9191_s7 = smov 26  }
  0x20   :  { %10242 = sst [smem:[#allocation56_spill]] %s9329_s21 }
  0x21   :  { %s9349_s21 = sld [smem:[%s10227_s0 + %s9188_s15]]   ;;  %s9192_s15 = smov 27  }
  0x22   :  { %10243 = sst [smem:[#allocation57_spill]] %s9334_s27 }
  0x23   :  { %s9354_s27 = sld [smem:[%s10227_s0 + %s9189_s22]]   ;;  %s9193_s22 = smov 28  }
  0x24   :  { %s9359_s4 = sld [smem:[%s10227_s0 + %s9190_s28]]   ;;  %s9194_s28 = smov 29  }
  0x25   :  { %10244 = sst [smem:[#allocation58_spill]] %s9344_s5 }
  0x26   :  { %s9364_s5 = sld [smem:[%s10227_s0 + %s9191_s7]]   ;;  %s9195_s7 = smov 30  }
  0x27   :  { %s9369_s12 = sld [smem:[%s10227_s0 + %s9192_s15]]   ;;  %s9196_s15 = smov 31  }
  0x28   :  { %s9384_s30 = sld [smem:[%s10227_s0 + %s9195_s7]]  }
  0x29   :  { %10245 = sst [smem:[#allocation59_spill]] %s9354_s27 }
  0x2a   :  { %10246 = sst [smem:[#allocation60_spill]] %s9359_s4 }
  0x2b   :  { %s9374_s27 = sld [smem:[%s10227_s0 + %s9193_s22]]  }
  0x2c   :  { %s9379_s4 = sld [smem:[%s10227_s0 + %s9194_s28]]  }
  0x2d   :  { %10247 = sst [smem:[#allocation61_spill]] %s9369_s12 }
  0x2e   :  { %s9389_s12 = sld [smem:[%s10227_s0 + %s9196_s15]]  }
  0x2f   :  { %69 = vsyncpa [#allocation3], 0 }
  0x30   :  { %70 = vsyncpa [#allocation6], 0 }
  0x31   :  { %71 = vsyncpa [#allocation9], 0 }
  0x32   :  { %72 = vsyncpa [#allocation12], 0 }
  0x33   :  { %73 = vsyncpa [#allocation15], 0 }
  0x34   :  { %74 = vsyncpa [#allocation18], 0 }
  0x35   :  { %75 = vsyncpa [#allocation21], 0 }
  0x36   :  { %76 = vsyncpa [#allocation24], 0 }
  0x37   :  { %77 = vsyncpa [#allocation27], 0 }
  0x38   :  { %78 = vsyncpa [#allocation30], 0 }
  0x39   :  { %79 = vsyncpa [#allocation33], 0 }
  0x3a   :  { %80 = vsyncpa [#allocation4], 0  ;;  %s9197_s22 = smov [#allocation5]   ;;  %s9198_s26 = smov [#allocation8]  }
  0x3b   :  { %s100_s23 = sshll.u32 %s9197_s22, 4  ;;  %s129_s28 = sshll.u32 %s9198_s26, 4  ;;  %s101_s23 = int_to_ptr.vmem [resolvable:$true] %s100_s23  ;;  %s130_s28 = int_to_ptr.vmem [resolvable:$true] %s129_s28 }
  0x3c   :  { %s8710_s0 = scalar_lea.vmem %s101_s23, 2048  ;;  %p8715_p1 = scmp.lt.s32.totalorder %s101_s23, %s101_s23 }
  0x3d   :  { %p8711_p0 = scmp.ne.s32.totalorder %s101_s23, %s8710_s0  ;;  %p8716_p2 = scmp.lt.s32.totalorder %s8710_s0, %s8710_s0 }
  0x3f   :  { %p8717_p3 = por %p8716_p2, %p8715_p1 }
  0x41   :  { %p8718_p4 = pnand %p8717_p3, %p8711_p0 }
  0x43   :  { %8721 = shalt.err (!%p8718_p4)
}
  0x44   :  { %s9199_s1 = smov 64   ;;  %s9200_s2 = smov 4  }
  0x45   :  { %106 = dma.hbm_to_vmem [thread:$0]  %s9244_s13, 2048, %s101_s23, [#allocation6], %s9199_s1, %s9199_s1, %s9200_s2  }
  0x46   :  { %s8730_s7 = scalar_lea.vmem %s130_s28, 16  ;;  %s8734_s10 = scalar_lea.vmem %s130_s28, 32 }
  0x47   :  { %p8731_p5 = scmp.ne.s32.totalorder %s130_s28, %s8730_s7  ;;  %p8735_p6 = scmp.lt.s32.totalorder %s130_s28, %s130_s28 }
  0x48   :  { %p8736_p7 = scmp.lt.s32.totalorder %s8734_s10, %s8730_s7 }
  0x4a   :  { %p8737_p8 = por %p8736_p7, %p8735_p6 }
  0x4c   :  { %p8738_p9 = pnand %p8737_p8, %p8731_p5 }
  0x4e   :  { %8741 = shalt.err (!%p8738_p9)
}
  0x4f   :  { %132 = dma.hbm_to_vmem [thread:$0]  %s9264_s29, 16, %s130_s28, [#allocation9]  }
  0x50   :  { %s9201_s11 = smov [#allocation11]   ;;  %s9202_s16 = smov [#allocation14]  }
  0x51   :  { %s150_s15 = sshll.u32 %s9201_s11, 4  ;;  %s174_s18 = sshll.u32 %s9202_s16, 4  ;;  %s151_s15 = int_to_ptr.vmem [resolvable:$true] %s150_s15  ;;  %s175_s18 = int_to_ptr.vmem [resolvable:$true] %s174_s18 }
  0x52   :  { %s8750_s22 = scalar_lea.vmem %s151_s15, 4096  ;;  %p8755_p11 = scmp.lt.s32.totalorder %s151_s15, %s151_s15 }
  0x53   :  { %p8751_p10 = scmp.ne.s32.totalorder %s151_s15, %s8750_s22  ;;  %p8756_p12 = scmp.lt.s32.totalorder %s8750_s22, %s8750_s22 }
  0x55   :  { %p8757_p13 = por %p8756_p12, %p8755_p11 }
  0x57   :  { %p8758_p0 = pnand %p8757_p13, %p8751_p10 }
  0x59   :  { %8761 = shalt.err (!%p8758_p0)
}
  0x5a   :  { %156 = dma.hbm_to_vmem [thread:$0]  %s9274_s8, 4096, %s151_s15, [#allocation12], %s9199_s1, %s9199_s1, %s9200_s2  }
  0x5b   :  { %s8770_s13 = scalar_lea.vmem %s175_s18, 4096  ;;  %p8775_p2 = scmp.lt.s32.totalorder %s175_s18, %s175_s18 }
  0x5c   :  { %p8771_p1 = scmp.ne.s32.totalorder %s175_s18, %s8770_s13  ;;  %p8776_p3 = scmp.lt.s32.totalorder %s8770_s13, %s8770_s13 }
  0x5e   :  { %p8777_p4 = por %p8776_p3, %p8775_p2 }
  0x60   :  { %p8778_p5 = pnand %p8777_p4, %p8771_p1 }
  0x62   :  { %8781 = shalt.err (!%p8778_p5)
}
  0x63   :  { %180 = dma.hbm_to_vmem [thread:$0]  %s9289_s24, 4096, %s175_s18, [#allocation15], %s9199_s1, %s9199_s1, %s9200_s2  }
  0x64   :  { %s9203_s29 = smov [#allocation17]  }
  0x65   :  { %s196_s23 = sshll.u32 %s9203_s29, 4  ;;  %s197_s23 = int_to_ptr.vmem [resolvable:$true] %s196_s23 }
  0x66   :  { %s8790_s26 = scalar_lea.vmem %s197_s23, 128  ;;  %p8795_p7 = scmp.lt.s32.totalorder %s197_s23, %s197_s23 }
  0x67   :  { %p8791_p6 = scmp.ne.s32.totalorder %s197_s23, %s8790_s26  ;;  %p8796_p8 = scmp.lt.s32.totalorder %s8790_s26, %s8790_s26 }
  0x69   :  { %p8797_p9 = por %p8796_p8, %p8795_p7 }
  0x6b   :  { %p8798_p10 = pnand %p8797_p9, %p8791_p6 }
  0x6d   :  { %8801 = shalt.err (!%p8798_p10)
}
  0x6e   :  { %s9204_s8 = smov 32   ;;  %s9205_s28 = smov 2  }
  0x6f   :  { %202 = dma.hbm_to_vmem [thread:$0]  %s9299_s6, 128, %s197_s23, [#allocation18], %s9204_s8, %s9204_s8, %s9205_s28  }
  0x70   :  { %s9206_s0 = smov [#allocation20]   ;;  %s9207_s10 = smov [#allocation23]  }
  0x71   :  { %s221_s7 = sshll.u32 %s9206_s0, 4  ;;  %s245_s11 = sshll.u32 %s9207_s10, 4  ;;  %s222_s7 = int_to_ptr.vmem [resolvable:$true] %s221_s7  ;;  %s246_s11 = int_to_ptr.vmem [resolvable:$true] %s245_s11 }
  0x72   :  { %s8810_s24 = scalar_lea.vmem %s222_s7, 16  ;;  %s8814_s15 = scalar_lea.vmem %s222_s7, 32 }
  0x73   :  { %p8811_p11 = scmp.ne.s32.totalorder %s222_s7, %s8810_s24  ;;  %p8815_p12 = scmp.lt.s32.totalorder %s222_s7, %s222_s7 }
  0x74   :  { %p8816_p13 = scmp.lt.s32.totalorder %s8814_s15, %s8810_s24 }
  0x76   :  { %p8817_p0 = por %p8816_p13, %p8815_p12 }
  0x78   :  { %p8818_p1 = pnand %p8817_p0, %p8811_p11 }
  0x7a   :  { %8821 = shalt.err (!%p8818_p1)
}
  0x7b   :  { %224 = dma.hbm_to_vmem [thread:$0]  %s9309_s20, 16, %s222_s7, [#allocation21]  }
  0x7c   :  { %s8830_s16 = scalar_lea.vmem %s246_s11, 16  ;;  %s8834_s18 = scalar_lea.vmem %s246_s11, 32 }
  0x7d   :  { %p8831_p2 = scmp.ne.s32.totalorder %s246_s11, %s8830_s16  ;;  %p8835_p3 = scmp.lt.s32.totalorder %s246_s11, %s246_s11 }
  0x7e   :  { %p8836_p4 = scmp.lt.s32.totalorder %s8834_s18, %s8830_s16 }
  0x80   :  { %p8837_p5 = por %p8836_p4, %p8835_p3 }
  0x82   :  { %p8838_p6 = pnand %p8837_p5, %p8831_p2 }
  0x84   :  { %8841 = shalt.err (!%p8838_p6)
}
  0x85   :  { %248 = dma.hbm_to_vmem [thread:$0]  %s9324_s19, 16, %s246_s11, [#allocation24]  }
  0x86   :  { %s9208_s6 = smov [#allocation26]   ;;  %s9209_s13 = smov [#allocation29]  }
  0x87   :  { %s266_s22 = sshll.u32 %s9208_s6, 4  ;;  %s288_s29 = sshll.u32 %s9209_s13, 4  ;;  %s267_s22 = int_to_ptr.vmem [resolvable:$true] %s266_s22  ;;  %s289_s29 = int_to_ptr.vmem [resolvable:$true] %s288_s29 }
  0x88   :  { %s8850_s23 = scalar_lea.vmem %s267_s22, 512  ;;  %p8855_p8 = scmp.lt.s32.totalorder %s267_s22, %s267_s22 }
  0x89   :  { %p8851_p7 = scmp.ne.s32.totalorder %s267_s22, %s8850_s23  ;;  %p8856_p9 = scmp.lt.s32.totalorder %s8850_s23, %s8850_s23 }
  0x8b   :  { %p8857_p10 = por %p8856_p9, %p8855_p8 }
  0x8d   :  { %p8858_p11 = pnand %p8857_p10, %p8851_p7 }
  0x8f   :  { %8861 = shalt.err (!%p8858_p11)
}
  0x90   :  { %272 = dma.hbm_to_vmem [thread:$0]  %s9339_s17, 512, %s267_s22, [#allocation27], %s9199_s1, %s9199_s1, %s9200_s2  }
  0x91   :  { %s8870_s20 = scalar_lea.vmem %s289_s29, 1024  ;;  %p8875_p13 = scmp.lt.s32.totalorder %s289_s29, %s289_s29 }
  0x92   :  { %p8871_p12 = scmp.ne.s32.totalorder %s289_s29, %s8870_s20  ;;  %p8876_p0 = scmp.lt.s32.totalorder %s8870_s20, %s8870_s20 }
  0x94   :  { %p8877_p1 = por %p8876_p0, %p8875_p13 }
  0x96   :  { %p8878_p2 = pnand %p8877_p1, %p8871_p12 }
  0x98   :  { %8881 = shalt.err (!%p8878_p2)
}
  0x99   :  { %294 = dma.hbm_to_vmem [thread:$0]  %s9349_s21, 1024, %s289_s29, [#allocation30], %s9199_s1, %s9199_s1, %s9200_s2  }
  0x9a   :  { %s9210_s19 = smov [#allocation32]   ;;  %s9211_s8 = smov [#allocation2]  }
  0x9b   :  { %s313_s26 = sshll.u32 %s9210_s19, 4  ;;  %s88_s28 = sshll.u32 %s9211_s8, 4  ;;  %s314_s26 = int_to_ptr.vmem [resolvable:$true] %s313_s26  ;;  %s89_s28 = int_to_ptr.vmem [resolvable:$true] %s88_s28 }
  0x9c   :  { %s8890_s0 = scalar_lea.vmem %s314_s26, 16  ;;  %s8894_s17 = scalar_lea.vmem %s314_s26, 32 }
  0x9d   :  { %p8891_p3 = scmp.ne.s32.totalorder %s314_s26, %s8890_s0  ;;  %p8895_p4 = scmp.lt.s32.totalorder %s314_s26, %s314_s26 }
  0x9e   :  { %p8896_p5 = scmp.lt.s32.totalorder %s8894_s17, %s8890_s0 }
  0xa0   :  { %p8897_p6 = por %p8896_p5, %p8895_p4 }
  0xa2   :  { %p8898_p7 = pnand %p8897_p6, %p8891_p3 }
  0xa4   :  { %8901 = shalt.err (!%p8898_p7)
}
  0xa5   :  { %316 = dma.hbm_to_vmem [thread:$0]  %s9364_s5, 16, %s314_s26, [#allocation33]  }
  0xa6   :  { %s8910_s7 = scalar_lea.vmem %s89_s28, 2048  ;;  %p8915_p9 = scmp.lt.s32.totalorder %s89_s28, %s89_s28 }
  0xa7   :  { %p8911_p8 = scmp.ne.s32.totalorder %s89_s28, %s8910_s7  ;;  %p8916_p10 = scmp.lt.s32.totalorder %s8910_s7, %s8910_s7 }
  0xa9   :  { %p8917_p11 = por %p8916_p10, %p8915_p9 }
  0xab   :  { %p8918_p12 = pnand %p8917_p11, %p8911_p8 }
  0xad   :  { %8921 = shalt.err (!%p8918_p12)
}
  0xae   :  { %94 = dma.hbm_to_vmem [thread:$0]  %s9239_s9, 2048, %s89_s28, [#allocation3], %s9199_s1, %s9199_s1, %s9200_s2  }
  0xaf   :  { %s9212_s21 = smov [#allocation7]   ;;  %s9213_s11 = smov [#allocation10]  }
  0xb0   :  { %s116_s10 = sshll.u32 %s9212_s21, 4  ;;  %s138_s24 = sshll.u32 %s9213_s11, 4  ;;  %s117_s10 = int_to_ptr.vmem [resolvable:$true] %s116_s10  ;;  %s139_s24 = int_to_ptr.vmem [resolvable:$true] %s138_s24 }
  0xb1   :  { %s8930_s15 = scalar_lea.vmem %s117_s10, 4096  ;;  %p8935_p0 = scmp.lt.s32.totalorder %s117_s10, %s117_s10 }
  0xb2   :  { %p8931_p13 = scmp.ne.s32.totalorder %s117_s10, %s8930_s15  ;;  %p8936_p1 = scmp.lt.s32.totalorder %s8930_s15, %s8930_s15 }
  0xb4   :  { %p8937_p2 = por %p8936_p1, %p8935_p0 }
  0xb6   :  { %p8938_p3 = pnand %p8937_p2, %p8931_p13 }
  0xb8   :  { %8941 = shalt.err (!%p8938_p3)
}
  0xb9   :  { %122 = dma.hbm_to_vmem [thread:$0]  %s9259_s25, 4096, %s117_s10, [#allocation6], %s9199_s1, %s9199_s1, %s9200_s2  }
  0xba   :  { %s8950_s5 = scalar_lea.vmem %s139_s24, 512  ;;  %p8955_p5 = scmp.lt.s32.totalorder %s139_s24, %s139_s24 }
  0xbb   :  { %p8951_p4 = scmp.ne.s32.totalorder %s139_s24, %s8950_s5  ;;  %p8956_p6 = scmp.lt.s32.totalorder %s8950_s5, %s8950_s5 }
  0xbd   :  { %p8957_p7 = por %p8956_p6, %p8955_p5 }
  0xbf   :  { %p8958_p8 = pnand %p8957_p7, %p8951_p4 }
  0xc1   :  { %8961 = shalt.err (!%p8958_p8)
}
  0xc2   :  { %144 = dma.hbm_to_vmem [thread:$0]  %s9269_s3, 512, %s139_s24, [#allocation9], %s9199_s1, %s9199_s1, %s9200_s2  }
  0xc3   :  { %s9214_s9 = smov [#allocation13]   ;;  %s9215_s18 = smov [#allocation16]  }
  0xc4   :  { %s163_s16 = sshll.u32 %s9214_s9, 4  ;;  %s187_s6 = sshll.u32 %s9215_s18, 4  ;;  %s164_s16 = int_to_ptr.vmem [resolvable:$true] %s163_s16  ;;  %s188_s6 = int_to_ptr.vmem [resolvable:$true] %s187_s6 }
  0xc5   :  { %s8970_s22 = scalar_lea.vmem %s164_s16, 16  ;;  %s8974_s25 = scalar_lea.vmem %s164_s16, 32 }
  0xc6   :  { %p8971_p9 = scmp.ne.s32.totalorder %s164_s16, %s8970_s22  ;;  %p8975_p10 = scmp.lt.s32.totalorder %s164_s16, %s164_s16 }
  0xc7   :  { %p8976_p11 = scmp.lt.s32.totalorder %s8974_s25, %s8970_s22 }
  0xc9   :  { %p8977_p12 = por %p8976_p11, %p8975_p10 }
  0xcb   :  { %p8978_p13 = pnand %p8977_p12, %p8971_p9 }
  0xcd   :  { %8981 = shalt.err (!%p8978_p13)
}
  0xce   :  { %166 = dma.hbm_to_vmem [thread:$0]  %s9279_s14, 16, %s164_s16, [#allocation12]  }
  0xcf   :  { %s8990_s13 = scalar_lea.vmem %s188_s6, 16  ;;  %s8994_s29 = scalar_lea.vmem %s188_s6, 32 }
  0xd0   :  { %p8991_p0 = scmp.ne.s32.totalorder %s188_s6, %s8990_s13  ;;  %p8995_p1 = scmp.lt.s32.totalorder %s188_s6, %s188_s6 }
  0xd1   :  { %p8996_p2 = scmp.lt.s32.totalorder %s8994_s29, %s8990_s13 }
  0xd3   :  { %p8997_p3 = por %p8996_p2, %p8995_p1 }
  0xd5   :  { %p8998_p4 = pnand %p8997_p3, %p8991_p0 }
  0xd7   :  { %9001 = shalt.err (!%p8998_p4)
}
  0xd8   :  { %s10248_s3 = sld [smem:[#allocation52_spill]]  ;;  %s9216_s23 = smov [#allocation19]  }
  0xd9   :  { %s208_s20 = sshll.u32 %s9216_s23, 4  ;;  %s9217_s19 = smov [#allocation22]   ;;  %s209_s20 = int_to_ptr.vmem [resolvable:$true] %s208_s20 }
  0xda   :  { %s232_s26 = sshll.u32 %s9217_s19, 4  ;;  %s9010_s8 = scalar_lea.vmem %s209_s20, 4096  ;;  %s233_s26 = int_to_ptr.vmem [resolvable:$true] %s232_s26 }
  0xdb   :  { %p9011_p5 = scmp.ne.s32.totalorder %s209_s20, %s9010_s8  ;;  %p9015_p6 = scmp.lt.s32.totalorder %s209_s20, %s209_s20 }
  0xdc   :  { %p9016_p7 = scmp.lt.s32.totalorder %s9010_s8, %s9010_s8 }
  0xde   :  { %190 = dma.hbm_to_vmem [thread:$0]  %s10248_s3, 16, %s188_s6, [#allocation15]  }
  0xdf   :  { %p9017_p8 = por %p9016_p7, %p9015_p6 }
  0xe1   :  { %p9018_p9 = pnand %p9017_p8, %p9011_p5 }
  0xe3   :  { %9021 = shalt.err (!%p9018_p9)
}
  0xe4   :  { %s10249_s14 = sld [smem:[#allocation53_spill]]  ;;  %s9030_s28 = scalar_lea.vmem %s233_s26, 2048 }
  0xe5   :  { %p9031_p10 = scmp.ne.s32.totalorder %s233_s26, %s9030_s28  ;;  %p9035_p11 = scmp.lt.s32.totalorder %s233_s26, %s233_s26 }
  0xe6   :  { %p9036_p12 = scmp.lt.s32.totalorder %s9030_s28, %s9030_s28 }
  0xe8   :  { %p9037_p13 = por %p9036_p12, %p9035_p11 }
  0xea   :  { %214 = dma.hbm_to_vmem [thread:$0]  %s10249_s14, 4096, %s209_s20, [#allocation18], %s9199_s1, %s9199_s1, %s9200_s2  }
  0xeb   :  { %p9038_p0 = pnand %p9037_p13, %p9031_p10 }
  0xed   :  { %9041 = shalt.err (!%p9038_p0)
}
  0xee   :  { %s10250_s0 = sld [smem:[#allocation55_spill]]  ;;  %s9218_s17 = smov [#allocation25]  }
  0xef   :  { %s257_s7 = sshll.u32 %s9218_s17, 4  ;;  %s9219_s21 = smov [#allocation28]   ;;  %s258_s7 = int_to_ptr.vmem [resolvable:$true] %s257_s7 }
  0xf0   :  { %s279_s10 = sshll.u32 %s9219_s21, 4  ;;  %s9050_s11 = scalar_lea.vmem %s258_s7, 16  ;;  %s280_s10 = int_to_ptr.vmem [resolvable:$true] %s279_s10 }
  0xf1   :  { %p9051_p1 = scmp.ne.s32.totalorder %s258_s7, %s9050_s11  ;;  %s9054_s24 = scalar_lea.vmem %s258_s7, 32 }
  0xf2   :  { %p9055_p2 = scmp.lt.s32.totalorder %s258_s7, %s258_s7  ;;  %p9056_p3 = scmp.lt.s32.totalorder %s9054_s24, %s9050_s11 }
  0xf4   :  { %238 = dma.hbm_to_vmem [thread:$0]  %s10250_s0, 2048, %s233_s26, [#allocation21], %s9199_s1, %s9199_s1, %s9200_s2  }
  0xf5   :  { %p9057_p4 = por %p9056_p3, %p9055_p2 }
  0xf7   :  { %p9058_p5 = pnand %p9057_p4, %p9051_p1 }
  0xf9   :  { %9061 = shalt.err (!%p9058_p5)
}
  0xfa   :  { %s10251_s15 = sld [smem:[#allocation57_spill]]  ;;  %s9070_s5 = scalar_lea.vmem %s280_s10, 16 }
  0xfb   :  { %p9071_p6 = scmp.ne.s32.totalorder %s280_s10, %s9070_s5  ;;  %s9074_s9 = scalar_lea.vmem %s280_s10, 32 }
  0xfc   :  { %p9075_p7 = scmp.lt.s32.totalorder %s280_s10, %s280_s10  ;;  %p9076_p8 = scmp.lt.s32.totalorder %s9074_s9, %s9070_s5 }
  0xfe   :  { %p9077_p9 = por %p9076_p8, %p9075_p7 }
 0x100   :  { %260 = dma.hbm_to_vmem [thread:$0]  %s10251_s15, 16, %s258_s7, [#allocation24]  }
 0x101   :  { %p9078_p10 = pnand %p9077_p9, %p9071_p6 }
 0x103   :  { %9081 = shalt.err (!%p9078_p10)
}
 0x104   :  { %s10252_s1 = sld [smem:[#allocation58_spill]]  ;;  %s9220_s2 = smov [#allocation31]  }
 0x105   :  { %s301_s16 = sshll.u32 %s9220_s2, 4  ;;  %s9221_s18 = smov [#allocation34]   ;;  %s302_s16 = int_to_ptr.vmem [resolvable:$true] %s301_s16 }
 0x106   :  { %s323_s6 = sshll.u32 %s9221_s18, 4  ;;  %s9090_s22 = scalar_lea.vmem %s302_s16, 16  ;;  %s324_s6 = int_to_ptr.vmem [resolvable:$true] %s323_s6 }
 0x107   :  { %p9091_p11 = scmp.ne.s32.totalorder %s302_s16, %s9090_s22  ;;  %s9094_s25 = scalar_lea.vmem %s302_s16, 32 }
 0x108   :  { %p9095_p12 = scmp.lt.s32.totalorder %s302_s16, %s302_s16  ;;  %p9096_p13 = scmp.lt.s32.totalorder %s9094_s25, %s9090_s22 }
 0x10a   :  { %282 = dma.hbm_to_vmem [thread:$0]  %s10252_s1, 16, %s280_s10, [#allocation27]  }
 0x10b   :  { %p9097_p0 = por %p9096_p13, %p9095_p12 }
 0x10d   :  { %p9098_p1 = pnand %p9097_p0, %p9091_p11 }
 0x10f   :  { %9101 = shalt.err (!%p9098_p1)
}
 0x110   :  { %s10253_s13 = sld [smem:[#allocation59_spill]]  ;;  %s9110_s29 = scalar_lea.vmem %s324_s6, 16 }
 0x111   :  { %p9111_p2 = scmp.ne.s32.totalorder %s324_s6, %s9110_s29  ;;  %s9114_s3 = scalar_lea.vmem %s324_s6, 32 }
 0x112   :  { %p9115_p3 = scmp.lt.s32.totalorder %s324_s6, %s324_s6  ;;  %p9116_p4 = scmp.lt.s32.totalorder %s9114_s3, %s9110_s29 }
 0x114   :  { %p9117_p5 = por %p9116_p4, %p9115_p3 }
 0x116   :  { %304 = dma.hbm_to_vmem [thread:$0]  %s10253_s13, 16, %s302_s16, [#allocation30]  }
 0x117   :  { %p9118_p6 = pnand %p9117_p5, %p9111_p2 }
 0x119   :  { %9121 = shalt.err (!%p9118_p6)
}
 0x11a   :  { %s10254_s23 = sld [smem:[#allocation61_spill]] }
 0x120   :  { %326 = dma.hbm_to_vmem [thread:$0]  %s10254_s23, 16, %s324_s6, [#allocation33]  }
 0x121   :  { %9142 = dma.done.wait [#allocation3], 2048  }
 0x122   :  { %9143 = vsyncadd [#allocation3], 4294965248 }
 0x123   :  { %9144 = dma.done.wait [#allocation6], 6144  }
 0x124   :  { %9145 = vsyncadd [#allocation6], 4294961152 }
 0x125   :  { %9146 = dma.done.wait [#allocation9], 528  }
 0x126   :  { %9147 = vsyncadd [#allocation9], 4294966768 }
 0x127   :  { %9148 = dma.done.wait [#allocation12], 4112  }
 0x128   :  { %9149 = vsyncadd [#allocation12], 4294963184 }
 0x129   :  { %9150 = dma.done.wait [#allocation15], 4112  }
 0x12a   :  { %9151 = vsyncadd [#allocation15], 4294963184 }
 0x12b   :  { %9152 = dma.done.wait [#allocation18], 4224  }
 0x12c   :  { %9153 = vsyncadd [#allocation18], 4294963072 }
 0x12d   :  { %9154 = dma.done.wait [#allocation21], 2064  }
 0x12e   :  { %9155 = vsyncadd [#allocation21], 4294965232 }
 0x12f   :  { %9156 = dma.done.wait [#allocation24], 32  }
 0x130   :  { %9157 = vsyncadd [#allocation24], 4294967264 }
 0x131   :  { %9158 = dma.done.wait [#allocation27], 528  }
 0x132   :  { %9159 = vsyncadd [#allocation27], 4294966768 }
 0x133   :  { %9160 = dma.done.wait [#allocation30], 1040  }
 0x134   :  { %9161 = vsyncadd [#allocation30], 4294966256 }
 0x135   :  { %9162 = dma.done.wait [#allocation33], 32  }
 0x136   :  { %9163 = vsyncadd [#allocation33], 4294967264  ;;  %s10255_s20 = sld [smem:[#allocation48_spill]]  ;;  %v9459_v4 = vld [vmem:[#allocation2] sm:$0xff]   ;;  %v6574_v7 = vld [vmem:[#allocation5 + $0x18] sm:$0xff]   ;;  %vm546_vm0 = vcmask 523264  }
 0x137   :  { %v5707_v6 = vunpack.c.l.bf16 %v9459_v4  ;;  %v6573_v8 = vld [vmem:[#allocation5 + $0x10] sm:$0xff]   ;;  %v5735_v10 = vunpack.c.l.bf16 %v6574_v7  ;;  %v5736_v11 = vunpack.c.h.bf16 %v6574_v7  ;;  %v6572_v14 = vld [vmem:[#allocation5 + $0x8] sm:$0xff]   ;;  %v5722_v19 = vld [vmem:[#allocation5] sm:$0xff]   ;;  %v5708_v30 = vunpack.c.h.bf16 %v9459_v4  ;;  %s10256_s19 = sld [smem:[#allocation49_spill]]  ;;  %s9225_s7 = smov 126  }
 0x138   :  { %v5732_v13 = vunpack.c.h.bf16 %v6573_v8  ;;  %v5731_v16 = vunpack.c.l.bf16 %v6573_v8  ;;  %v5728_v18 = vunpack.c.h.bf16 %v6572_v14  ;;  %v5727_v21 = vunpack.c.l.bf16 %v6572_v14  ;;  %v6569_v28 = vld [vmem:[#allocation2 + $0x8] sm:$0xff]   ;;  %v6570_v32 = vld [vmem:[#allocation2 + $0x10] sm:$0xff]   ;;  %v6571_v35 = vld [vmem:[#allocation2 + $0x18] sm:$0xff]   ;;  %s10257_s26 = sld [smem:[#allocation50_spill]] }
 0x139   :  { %7420 = vmatprep.mubr.f32.mxu0 %v5707_v6  ;;  %7432 = vmatprep.subr.mxu1 %v5736_v11  ;;  %v5724_v23 = vunpack.c.h.bf16 %v5722_v19  ;;  %v5711_v31 = vunpack.c.l.bf16 %v6569_v28  ;;  %v5712_v33 = vunpack.c.h.bf16 %v6569_v28  ;;  %v5715_v34 = vunpack.c.l.bf16 %v6570_v32  ;;  %v5738_v46 = vld [vmem:[#allocation2 + $0x20] sm:$0xff]   ;;  %v6575_v50 = vld [vmem:[#allocation2 + $0x28] sm:$0xff]   ;;  %v6576_v53 = vld [vmem:[#allocation2 + $0x30] sm:$0xff]   ;;  %s10258_s8 = sld [smem:[#allocation51_spill]] }
 0x13a   :  { %7433 = vmatpush3.msra.mxu1 %v5736_v11  ;;  %v5716_v36 = vunpack.c.h.bf16 %v6570_v32  ;;  %v5719_v37 = vunpack.c.l.bf16 %v6571_v35  ;;  %v5720_v38 = vunpack.c.h.bf16 %v6571_v35  ;;  %v5723_v39 = vunpack.c.l.bf16 %v5722_v19  ;;  %v6577_v56 = vld [vmem:[#allocation2 + $0x38] sm:$0xff]   ;;  %v6579_v63 = vld [vmem:[#allocation5 + $0x30] sm:$0xff]   ;;  %v6578_v7 = vld [vmem:[#allocation5 + $0x28] sm:$0xff]   ;;  %s10259_s14 = sld [smem:[#allocation54_spill]] }
 0x13b   :  { %7434 = vmatprep.subr.mxu1 %v5735_v10  ;;  %v5739_v48 = vunpack.c.l.bf16 %v5738_v46  ;;  %v5740_v51 = vunpack.c.h.bf16 %v5738_v46  ;;  %v5743_v52 = vunpack.c.l.bf16 %v6575_v50  ;;  %v5744_v54 = vunpack.c.h.bf16 %v6575_v50  ;;  %v6580_v60 = vld [vmem:[#allocation5 + $0x38] sm:$0xff]   ;;  %s10260_s28 = sld [smem:[#allocation56_spill]] }
 0x13c   :  { %v9443_v0 = vld [vmem:[%s10255_s20 + $0x78] sm:$0xff]  ;;  %v9446_v1 = vld [vmem:[%s10255_s20 + $0x70] sm:$0xff]  ;;  %v9451_v2 = vld [vmem:[%s10255_s20 + $0x68] sm:$0xff]  ;;  %7435 = vmatpush3.msra.mxu1 %v5735_v10  ;;  %v5747_v55 = vunpack.c.l.bf16 %v6576_v53  ;;  %v5748_v57 = vunpack.c.h.bf16 %v6576_v53  ;;  %v5751_v58 = vunpack.c.l.bf16 %v6577_v56  ;;  %v5752_v59 = vunpack.c.h.bf16 %v6577_v56  ;;  %s10261_s0 = sld [smem:[#allocation60_spill]] }
 0x13d   :  { %7388 = vmatprep.subr.mxu0 %v9443_v0  ;;  %v9456_v3 = vld [vmem:[%s10255_s20 + $0x60] sm:$0xff]  ;;  %v9463_v5 = vld [vmem:[%s10255_s20 + $0x58] sm:$0xff]  ;;  %v9469_v9 = vld [vmem:[%s10255_s20 + $0x50] sm:$0xff]  ;;  %7436 = vmatprep.subr.mxu1 %v5732_v13  ;;  %v5768_v61 = vunpack.c.h.bf16 %v6580_v60  ;;  %v5767_v62 = vunpack.c.l.bf16 %v6580_v60  ;;  %v5764_v4 = vunpack.c.h.bf16 %v6579_v63  ;;  %v5763_v6 = vunpack.c.l.bf16 %v6579_v63 }
 0x13e   :  { %7389 = vmatpush3.msra.mxu0 %v9443_v0  ;;  %v9474_v12 = vld [vmem:[%s10255_s20 + $0x48] sm:$0xff]  ;;  %v9479_v15 = vld [vmem:[%s10255_s20 + $0x40] sm:$0xff]  ;;  %v9484_v17 = vld [vmem:[%s10255_s20 + $0x38] sm:$0xff]  ;;  %7437 = vmatpush3.msra.mxu1 %v5732_v13  ;;  %v5760_v8 = vunpack.c.h.bf16 %v6578_v7  ;;  %v5759_v11 = vunpack.c.l.bf16 %v6578_v7  ;;  %vm2464_vm1 = vcmask 261120   ;;  %vm9223_vm2 = vmmov 0  }
 0x13f   :  { %7390 = vmatprep.subr.mxu0 %v9446_v1  ;;  %v9489_v20 = vld [vmem:[%s10255_s20 + $0x30] sm:$0xff]  ;;  %7438 = vmatprep.subr.mxu1 %v5731_v16  ;;  %v9494_v22 = vld [vmem:[%s10255_s20 + $0x28] sm:$0xff]  ;;  %v9499_v24 = vld [vmem:[%s10255_s20 + $0x20] sm:$0xff]  ;;  %vm3256_vm3 = vcmask 130048   ;;  %vm3984_vm4 = vcmask 64512   ;;  %vm4716_vm5 = vcmask 1043456  }
 0x140   :  { %7391 = vmatpush3.msra.mxu0 %v9446_v1  ;;  %7439 = vmatpush3.msra.mxu1 %v5731_v16  ;;  %v9504_v25 = vld [vmem:[%s10255_s20 + $0x18] sm:$0xff]  ;;  %v9509_v26 = vld [vmem:[%s10255_s20 + $0x10] sm:$0xff]  ;;  %v9514_v27 = vld [vmem:[%s10255_s20 + $0x8] sm:$0xff]  ;;  %vm4712_vm6 = vcmask 31744   ;;  %vm5529_vm7 = vcmask 9216   ;;  %vm5515_vm8 = vcmask 1024  }
 0x141   :  { %7392 = vmatprep.subr.mxu0 %v9451_v2  ;;  %7440 = vmatprep.subr.mxu1 %v5728_v18  ;;  %v9519_v29 = vld [vmem:[%s10255_s20] sm:$0xff]  ;;  %v6585_v53 = vld [vmem:[#allocation5 + $0x50] sm:$0xff]  }
 0x142   :  { %7393 = vmatpush3.msra.mxu0 %v9451_v2  ;;  %7441 = vmatpush3.msra.mxu1 %v5728_v18  ;;  %v5754_v10 = vld [vmem:[#allocation5 + $0x20] sm:$0xff]   ;;  %v5796_v56 = vunpack.c.h.bf16 %v6585_v53 }
 0x143   :  { %7394 = vmatprep.subr.mxu0 %v9456_v3  ;;  %7442 = vmatprep.subr.mxu1 %v5727_v21  ;;  %v5756_v13 = vunpack.c.h.bf16 %v5754_v10  ;;  %v5755_v14 = vunpack.c.l.bf16 %v5754_v10  ;;  %v5786_v60 = vld [vmem:[#allocation5 + $0x40] sm:$0xff]  }
 0x144   :  { %7395 = vmatpush3.msra.mxu0 %v9456_v3  ;;  %7443 = vmatpush3.msra.mxu1 %v5727_v21  ;;  %v5787_v63 = vunpack.c.l.bf16 %v5786_v60 }
 0x145   :  { %7396 = vmatprep.subr.mxu0 %v9463_v5  ;;  %7444 = vmatprep.subr.mxu1 %v5724_v23 }
 0x146   :  { %7397 = vmatpush3.msra.mxu0 %v9463_v5  ;;  %7445 = vmatpush3.msra.mxu1 %v5724_v23 }
 0x147   :  { %7398 = vmatprep.subr.mxu0 %v9469_v9  ;;  %7446 = vmatprep.subr.mxu1 %v5723_v39 }
 0x148   :  { %7399 = vmatpush3.msra.mxu0 %v9469_v9  ;;  %7447 = vmatpush3.msra.mxu1 %v5723_v39 }
 0x149   :  { %7400 = vmatprep.subr.mxu0 %v9474_v12  ;;  %7460 = vmatprep.subr.mxu1 %v9443_v0 }
 0x14a   :  { %7401 = vmatpush3.msra.mxu0 %v9474_v12 }
 0x14b   :  { %7402 = vmatprep.subr.mxu0 %v9479_v15 }
 0x14c   :  { %7403 = vmatpush3.msra.mxu0 %v9479_v15 }
 0x14d   :  { %7404 = vmatprep.subr.mxu0 %v9484_v17 }
 0x14e   :  { %7405 = vmatpush3.msra.mxu0 %v9484_v17 }
 0x14f   :  { %7406 = vmatprep.subr.mxu0 %v9489_v20 }
 0x150   :  { %7407 = vmatpush3.msra.mxu0 %v9489_v20 }
 0x151   :  { %7408 = vmatprep.subr.mxu0 %v9494_v22 }
 0x152   :  { %7409 = vmatpush3.msra.mxu0 %v9494_v22 }
 0x153   :  { %7410 = vmatprep.subr.mxu0 %v9499_v24 }
 0x154   :  { %7411 = vmatpush3.msra.mxu0 %v9499_v24 }
 0x155   :  { %7412 = vmatprep.subr.mxu0 %v9504_v25 }
 0x156   :  { %7413 = vmatpush3.msra.mxu0 %v9504_v25 }
 0x157   :  { %7414 = vmatprep.subr.mxu0 %v9509_v26 }
 0x158   :  { %7415 = vmatpush3.msra.mxu0 %v9509_v26 }
 0x159   :  { %7416 = vmatprep.subr.mxu0 %v9514_v27 }
 0x15a   :  { %7417 = vmatpush3.msra.mxu0 %v9514_v27 }
 0x15b   :  { %7418 = vmatprep.subr.mxu0 %v9519_v29 }
 0x15c   :  { %7419 = vmatpush3.msra.mxu0 %v9519_v29 }
 0x15d   :  { %7421 = vmatmul.mubr.f32.vlgmr.msra.gmra.mxu0 %v5708_v30  ;;  %7504 = vmatprep.subr.mxu0 %v5768_v61 }
 0x15e   :  { %7423 = vmatprep.mubr.f32.mxu0 %v5711_v31  ;;  %7505 = vmatpush3.msra.mxu0 %v5768_v61 }
 0x15f   :  { %7506 = vmatprep.subr.mxu0 %v5767_v62 }
 0x160   :  { %7507 = vmatpush3.msra.mxu0 %v5767_v62  ;;  %v5788_v62 = vunpack.c.h.bf16 %v5786_v60 }
 0x161   :  { %7424 = vmatmul.mubr.f32.gmra.mxu0 %v5712_v33  ;;  %7508 = vmatprep.subr.mxu0 %v5764_v4 }
 0x162   :  { %7426 = vmatprep.mubr.f32.mxu0 %v5715_v34  ;;  %7509 = vmatpush3.msra.mxu0 %v5764_v4  ;;  %v5617_v4 = vld [vmem:[%s10256_s19] ss:$0 sm:$0xff] }
 0x163   :  { %7510 = vmatprep.subr.mxu0 %v5763_v6 }
 0x164   :  { %7511 = vmatpush3.msra.mxu0 %v5763_v6 }
 0x165   :  { %7427 = vmatmul.mubr.f32.gmra.mxu0 %v5716_v36  ;;  %7512 = vmatprep.subr.mxu0 %v5760_v8 }
 0x166   :  { %7429 = vmatprep.mubr.f32.mxu0 %v5719_v37  ;;  %7513 = vmatpush3.msra.mxu0 %v5760_v8 }
 0x167   :  { %7514 = vmatprep.subr.mxu0 %v5759_v11 }
 0x168   :  { %7515 = vmatpush3.msra.mxu0 %v5759_v11 }
 0x169   :  { %7430 = vmatmul.mubr.f32.gmra.mxu0 %v5720_v38  ;;  %7516 = vmatprep.subr.mxu0 %v5756_v13  ;;  %v5770_v38 = vld [vmem:[#allocation2 + $0x40] sm:$0xff]  }
 0x16a   :  { %7517 = vmatpush3.msra.mxu0 %v5756_v13 }
 0x16b   :  { %7518 = vmatprep.subr.mxu0 %v5755_v14 }
 0x16c   :  { %7519 = vmatpush3.msra.mxu0 %v5755_v14 }
 0x16d   :  { %7532 = vmatprep.subr.mxu0 %v9443_v0 }
 0x21d   :  { %v7422_v40 = vpop.f32.mrf.mxu0 }
 0x21f   :  { %v491_v41 = vpop.f32.mrf.mxu0 }
 0x220   :  { %7448 = vmatprep.mubr.msk.f32.mxu1 %vm546_vm0, %v491_v41 }
 0x221   :  { %7449 = vmatmul.mubr.msk.f32.vlgmr.msra.gmra.mxu1 %vm546_vm0, %v7422_v40  ;;  %v7425_v42 = vpop.f32.mrf.mxu0  ;;  %v5771_v40 = vunpack.c.l.bf16 %v5770_v38 }
 0x222   :  { %7461 = vmatpush3.msra.mxu1 %v9443_v0 }
 0x223   :  { %7462 = vmatprep.subr.mxu1 %v9446_v1  ;;  %v501_v43 = vpop.f32.mrf.mxu0 }
 0x224   :  { %7463 = vmatpush3.msra.mxu1 %v9446_v1  ;;  %7451 = vmatprep.mubr.msk.f32.mxu1 %vm546_vm0, %v501_v43  ;;  %v5772_v43 = vunpack.c.h.bf16 %v5770_v38 }
 0x225   :  { %7464 = vmatprep.subr.mxu1 %v9451_v2  ;;  %v7428_v44 = vpop.f32.mrf.mxu0  ;;  %7452 = vmatmul.mubr.msk.f32.gmra.mxu1 %vm546_vm0, %v7425_v42  ;;  %v6581_v42 = vld [vmem:[#allocation2 + $0x48] sm:$0xff]  }
 0x226   :  { %7465 = vmatpush3.msra.mxu1 %v9451_v2  ;;  %v5776_v46 = vunpack.c.h.bf16 %v6581_v42 }
 0x227   :  { %7466 = vmatprep.subr.mxu1 %v9456_v3  ;;  %v511_v45 = vpop.f32.mrf.mxu0 }
 0x228   :  { %7467 = vmatpush3.msra.mxu1 %v9456_v3  ;;  %7454 = vmatprep.mubr.msk.f32.mxu1 %vm546_vm0, %v511_v45  ;;  %v6582_v45 = vld [vmem:[#allocation2 + $0x50] sm:$0xff]  }
 0x229   :  { %7468 = vmatprep.subr.mxu1 %v9463_v5  ;;  %v7431_v47 = vpop.f32.mrf.mxu0  ;;  %7455 = vmatmul.mubr.msk.f32.gmra.mxu1 %vm546_vm0, %v7428_v44  ;;  %v5775_v44 = vunpack.c.l.bf16 %v6581_v42 }
 0x22a   :  { %7469 = vmatpush3.msra.mxu1 %v9463_v5 }
 0x22b   :  { %7470 = vmatprep.subr.mxu1 %v9469_v9  ;;  %v521_v49 = vpop.f32.mrf.mxu0 }
 0x22c   :  { %7471 = vmatpush3.msra.mxu1 %v9469_v9  ;;  %7457 = vmatprep.mubr.msk.f32.mxu1 %vm546_vm0, %v521_v49  ;;  %v5780_v49 = vunpack.c.h.bf16 %v6582_v45 }
 0x22d   :  { %7472 = vmatprep.subr.mxu1 %v9474_v12  ;;  %7458 = vmatmul.mubr.msk.f32.gmra.mxu1 %vm546_vm0, %v7431_v47  ;;  %v5779_v47 = vunpack.c.l.bf16 %v6582_v45 }
 0x22e   :  { %7473 = vmatpush3.msra.mxu1 %v9474_v12  ;;  %7492 = vmatprep.mubr.f32.mxu1 %v5739_v48  ;;  %v6583_v48 = vld [vmem:[#allocation2 + $0x58] sm:$0xff]  }
 0x22f   :  { %7474 = vmatprep.subr.mxu1 %v9479_v15  ;;  %v5783_v50 = vunpack.c.l.bf16 %v6583_v48 }
 0x230   :  { %7475 = vmatpush3.msra.mxu1 %v9479_v15 }
 0x231   :  { %7476 = vmatprep.subr.mxu1 %v9484_v17 }
 0x232   :  { %7477 = vmatpush3.msra.mxu1 %v9484_v17 }
 0x233   :  { %7478 = vmatprep.subr.mxu1 %v9489_v20 }
 0x234   :  { %7479 = vmatpush3.msra.mxu1 %v9489_v20 }
 0x235   :  { %7480 = vmatprep.subr.mxu1 %v9494_v22 }
 0x236   :  { %7481 = vmatpush3.msra.mxu1 %v9494_v22 }
 0x237   :  { %7482 = vmatprep.subr.mxu1 %v9499_v24 }
 0x238   :  { %7483 = vmatpush3.msra.mxu1 %v9499_v24 }
 0x239   :  { %7484 = vmatprep.subr.mxu1 %v9504_v25 }
 0x23a   :  { %7485 = vmatpush3.msra.mxu1 %v9504_v25 }
 0x23b   :  { %7486 = vmatprep.subr.mxu1 %v9509_v26 }
 0x23c   :  { %7487 = vmatpush3.msra.mxu1 %v9509_v26 }
 0x23d   :  { %7488 = vmatprep.subr.mxu1 %v9514_v27 }
 0x23e   :  { %7489 = vmatpush3.msra.mxu1 %v9514_v27 }
 0x23f   :  { %7490 = vmatprep.subr.mxu1 %v9519_v29 }
 0x240   :  { %7491 = vmatpush3.msra.mxu1 %v9519_v29 }
 0x241   :  { %7493 = vmatmul.mubr.f32.vlgmr.msra.gmra.mxu1 %v5740_v51  ;;  %v5784_v51 = vunpack.c.h.bf16 %v6583_v48 }
 0x242   :  { %7495 = vmatprep.mubr.f32.mxu1 %v5743_v52  ;;  %v6586_v52 = vld [vmem:[#allocation5 + $0x58] sm:$0xff]  }
 0x245   :  { %7496 = vmatmul.mubr.f32.gmra.mxu1 %v5744_v54  ;;  %v5800_v54 = vunpack.c.h.bf16 %v6586_v52 }
 0x246   :  { %7498 = vmatprep.mubr.f32.mxu1 %v5747_v55  ;;  %v5799_v55 = vunpack.c.l.bf16 %v6586_v52 }
 0x247   :  { %7576 = vmatprep.subr.mxu1 %v5800_v54 }
 0x248   :  { %7577 = vmatpush3.msra.mxu1 %v5800_v54  ;;  %v5818_v54 = vld [vmem:[#allocation5 + $0x60] sm:$0xff]  }
 0x249   :  { %7499 = vmatmul.mubr.f32.gmra.mxu1 %v5748_v57  ;;  %v6584_v57 = vld [vmem:[#allocation5 + $0x48] sm:$0xff]   ;;  %7578 = vmatprep.subr.mxu1 %v5799_v55 }
 0x24a   :  { %7501 = vmatprep.mubr.f32.mxu1 %v5751_v58  ;;  %v5795_v58 = vunpack.c.l.bf16 %v6585_v53  ;;  %7579 = vmatpush3.msra.mxu1 %v5799_v55  ;;  %v5791_v61 = vunpack.c.l.bf16 %v6584_v57  ;;  %v5820_v55 = vunpack.c.h.bf16 %v5818_v54 }
 0x24b   :  { %7580 = vmatprep.subr.mxu1 %v5796_v56 }
 0x24c   :  { %7581 = vmatpush3.msra.mxu1 %v5796_v56  ;;  %v5819_v56 = vunpack.c.l.bf16 %v5818_v54 }
 0x24d   :  { %7502 = vmatmul.mubr.f32.gmra.mxu1 %v5752_v59  ;;  %v5792_v59 = vunpack.c.h.bf16 %v6584_v57  ;;  %7582 = vmatprep.subr.mxu1 %v5795_v58  ;;  %v6600_v57 = vld [vmem:[#allocation7 + $0x38] sm:$0xff]  }
 0x24e   :  { %7583 = vmatpush3.msra.mxu1 %v5795_v58  ;;  %v6599_v58 = vld [vmem:[#allocation7 + $0x30] sm:$0xff]   ;;  %v5871_v60 = vunpack.c.l.bf16 %v6600_v57 }
 0x24f   :  { %7584 = vmatprep.subr.mxu1 %v5792_v59 }
 0x250   :  { %7585 = vmatpush3.msra.mxu1 %v5792_v59  ;;  %v5872_v59 = vunpack.c.h.bf16 %v6600_v57 }
 0x251   :  { %7586 = vmatprep.subr.mxu1 %v5791_v61 }
 0x252   :  { %7587 = vmatpush3.msra.mxu1 %v5791_v61  ;;  %v5868_v61 = vunpack.c.h.bf16 %v6599_v58 }
 0x253   :  { %7588 = vmatprep.subr.mxu1 %v5788_v62 }
 0x254   :  { %7589 = vmatpush3.msra.mxu1 %v5788_v62  ;;  %v6598_v62 = vld [vmem:[#allocation7 + $0x28] sm:$0xff]  }
 0x255   :  { %7590 = vmatprep.subr.mxu1 %v5787_v63 }
 0x256   :  { %7591 = vmatpush3.msra.mxu1 %v5787_v63  ;;  %v5867_v63 = vunpack.c.l.bf16 %v6599_v58 }
 0x257   :  { %7604 = vmatprep.subr.mxu1 %v9443_v0 }
 0x2e1   :  { %v9567_v16 = vpop.f32.mrf.mxu1 }
 0x2e2   :  { %v683_v6 = vadd.f32 %v9567_v16, %v5617_v4 }
 0x2e3   :  { %v9569_v18 = vpop.f32.mrf.mxu1 }
 0x2e4   :  { %v682_v8 = vadd.f32 %v5617_v4, %v9569_v18 }
 0x2e5   :  { %v9571_v19 = vpop.f32.mrf.mxu1 }
 0x2e6   :  { %v685_v13 = vadd.f32 %v9571_v19, %v5617_v4 }
 0x2e7   :  { %v9573_v21 = vpop.f32.mrf.mxu1 }
 0x2e9   :  { %v9575_v23 = vpop.f32.mrf.mxu1 }
 0x2eb   :  { %v9577_v28 = vpop.f32.mrf.mxu1 }
 0x2ec   :  { %v686_v18 = vadd.f32 %v5617_v4, %v9577_v28 }
 0x2ed   :  { %v9579_v30 = vpop.f32.mrf.mxu1 }
 0x2ee   :  { %v689_v19 = vadd.f32 %v9579_v30, %v5617_v4 }
 0x2ef   :  { %v9581_v31 = vpop.f32.mrf.mxu1 }
 0x301   :  { %v7494_v32 = vpop.f32.mrf.mxu1 }
 0x303   :  { %v773_v33 = vpop.f32.mrf.mxu1 }
 0x304   :  { %7520 = vmatprep.mubr.msk.f32.mxu0 %vm546_vm0, %v773_v33  ;;  %v684_v33 = vadd.f32 %v5617_v4, %v9573_v21  ;;  %v688_v21 = vadd.f32 %v5617_v4, %v9581_v31 }
 0x305   :  { %v7497_v34 = vpop.f32.mrf.mxu1  ;;  %7521 = vmatmul.mubr.msk.f32.vlgmr.msra.gmra.mxu0 %vm546_vm0, %v7494_v32 }
 0x306   :  { %7533 = vmatpush3.msra.mxu0 %v9443_v0 }
 0x307   :  { %7534 = vmatprep.subr.mxu0 %v9446_v1  ;;  %v783_v35 = vpop.f32.mrf.mxu1 }
 0x308   :  { %7535 = vmatpush3.msra.mxu0 %v9446_v1  ;;  %7523 = vmatprep.mubr.msk.f32.mxu0 %vm546_vm0, %v783_v35 }
 0x309   :  { %7536 = vmatprep.subr.mxu0 %v9451_v2  ;;  %v7500_v36 = vpop.f32.mrf.mxu1  ;;  %7524 = vmatmul.mubr.msk.f32.gmra.mxu0 %vm546_vm0, %v7497_v34 }
 0x30a   :  { %7537 = vmatpush3.msra.mxu0 %v9451_v2 }
 0x30b   :  { %7538 = vmatprep.subr.mxu0 %v9456_v3  ;;  %v793_v37 = vpop.f32.mrf.mxu1 }
 0x30c   :  { %7539 = vmatpush3.msra.mxu0 %v9456_v3  ;;  %7526 = vmatprep.mubr.msk.f32.mxu0 %vm546_vm0, %v793_v37 }
 0x30d   :  { %7540 = vmatprep.subr.mxu0 %v9463_v5  ;;  %v7503_v39 = vpop.f32.mrf.mxu1  ;;  %7527 = vmatmul.mubr.msk.f32.gmra.mxu0 %vm546_vm0, %v7500_v36  ;;  %v687_v36 = vadd.f32 %v9575_v23, %v5617_v4  ;;  %v5864_v4 = vunpack.c.h.bf16 %v6598_v62 }
 0x30e   :  { %7541 = vmatpush3.msra.mxu0 %v9463_v5 }
 0x30f   :  { %7542 = vmatprep.subr.mxu0 %v9469_v9  ;;  %v803_v41 = vpop.f32.mrf.mxu1 }
 0x310   :  { %7543 = vmatpush3.msra.mxu0 %v9469_v9  ;;  %7529 = vmatprep.mubr.msk.f32.mxu0 %vm546_vm0, %v803_v41 }
 0x311   :  { %7544 = vmatprep.subr.mxu0 %v9474_v12  ;;  %7530 = vmatmul.mubr.msk.f32.gmra.mxu0 %vm546_vm0, %v7503_v39 }
 0x312   :  { %7545 = vmatpush3.msra.mxu0 %v9474_v12  ;;  %7564 = vmatprep.mubr.f32.mxu0 %v5771_v40 }
 0x313   :  { %7546 = vmatprep.subr.mxu0 %v9479_v15 }
 0x314   :  { %7547 = vmatpush3.msra.mxu0 %v9479_v15 }
 0x315   :  { %7548 = vmatprep.subr.mxu0 %v9484_v17 }
 0x316   :  { %7549 = vmatpush3.msra.mxu0 %v9484_v17 }
 0x317   :  { %7550 = vmatprep.subr.mxu0 %v9489_v20 }
 0x318   :  { %7551 = vmatpush3.msra.mxu0 %v9489_v20 }
 0x319   :  { %7552 = vmatprep.subr.mxu0 %v9494_v22 }
 0x31a   :  { %7553 = vmatpush3.msra.mxu0 %v9494_v22 }
 0x31b   :  { %7554 = vmatprep.subr.mxu0 %v9499_v24 }
 0x31c   :  { %7555 = vmatpush3.msra.mxu0 %v9499_v24 }
 0x31d   :  { %7556 = vmatprep.subr.mxu0 %v9504_v25 }
 0x31e   :  { %7557 = vmatpush3.msra.mxu0 %v9504_v25 }
 0x31f   :  { %7558 = vmatprep.subr.mxu0 %v9509_v26 }
 0x320   :  { %7559 = vmatpush3.msra.mxu0 %v9509_v26 }
 0x321   :  { %7560 = vmatprep.subr.mxu0 %v9514_v27 }
 0x322   :  { %7561 = vmatpush3.msra.mxu0 %v9514_v27 }
 0x323   :  { %7562 = vmatprep.subr.mxu0 %v9519_v29 }
 0x324   :  { %7563 = vmatpush3.msra.mxu0 %v9519_v29 }
 0x325   :  { %7565 = vmatmul.mubr.f32.vlgmr.msra.gmra.mxu0 %v5772_v43 }
 0x326   :  { %7567 = vmatprep.mubr.f32.mxu0 %v5775_v44 }
 0x329   :  { %7568 = vmatmul.mubr.f32.gmra.mxu0 %v5776_v46 }
 0x32a   :  { %7570 = vmatprep.mubr.f32.mxu0 %v5779_v47  ;;  %v5802_v47 = vld [vmem:[#allocation2 + $0x60] sm:$0xff]  }
 0x32d   :  { %7571 = vmatmul.mubr.f32.gmra.mxu0 %v5780_v49 }
 0x32e   :  { %7573 = vmatprep.mubr.f32.mxu0 %v5783_v50 }
 0x331   :  { %7574 = vmatmul.mubr.f32.gmra.mxu0 %v5784_v51 }
 0x3c5   :  { %v7522_v7 = vpop.f32.mrf.mxu0 }
 0x3c6   :  { %v9626_v10 = vadd.f32 %v7522_v7, %v683_v6  ;;  %v6597_v6 = vld [vmem:[#allocation7 + $0x20] sm:$0xff]   ;;  %v5863_v7 = vunpack.c.l.bf16 %v6598_v62 }
 0x3c7   :  { %v919_v11 = vpop.f32.mrf.mxu0 }
 0x3c8   :  { %v9629_v14 = vadd.f32 %v919_v11, %v682_v8  ;;  %v5860_v8 = vunpack.c.h.bf16 %v6597_v6 }
 0x3c9   :  { %v7525_v32 = vpop.f32.mrf.mxu0 }
 0x3ca   :  { %v9632_v34 = vadd.f32 %v7525_v32, %v685_v13 }
 0x3cb   :  { %v929_v35 = vpop.f32.mrf.mxu0 }
 0x3cc   :  { %v9635_v37 = vadd.f32 %v929_v35, %v684_v33 }
 0x3cd   :  { %v7528_v16 = vpop.f32.mrf.mxu0 }
 0x3ce   :  { %v9638_v38 = vadd.f32 %v7528_v16, %v687_v36 }
 0x3cf   :  { %v939_v39 = vpop.f32.mrf.mxu0 }
 0x3d0   :  { %v9641_v40 = vadd.f32 %v939_v39, %v686_v18 }
 0x3d1   :  { %v7531_v41 = vpop.f32.mrf.mxu0 }
 0x3d2   :  { %v9644_v42 = vadd.f32 %v7531_v41, %v689_v19 }
 0x3d3   :  { %v949_v43 = vpop.f32.mrf.mxu0 }
 0x3d4   :  { %v9646_v44 = vadd.f32 %v949_v43, %v688_v21 }
 0x3e5   :  { %v7566_v23 = vpop.f32.mrf.mxu0 }
 0x3e7   :  { %v1049_v45 = vpop.f32.mrf.mxu0 }
 0x3e8   :  { %7592 = vmatprep.mubr.msk.f32.mxu1 %vm546_vm0, %v1049_v45 }
 0x3e9   :  { %v7569_v28 = vpop.f32.mrf.mxu0  ;;  %7593 = vmatmul.mubr.msk.f32.vlgmr.msra.gmra.mxu1 %vm546_vm0, %v7566_v23 }
 0x3ea   :  { %7605 = vmatpush3.msra.mxu1 %v9443_v0 }
 0x3eb   :  { %7606 = vmatprep.subr.mxu1 %v9446_v1  ;;  %v1059_v30 = vpop.f32.mrf.mxu0 }
 0x3ec   :  { %7607 = vmatpush3.msra.mxu1 %v9446_v1  ;;  %7595 = vmatprep.mubr.msk.f32.mxu1 %vm546_vm0, %v1059_v30  ;;  %v5803_v1 = vunpack.c.l.bf16 %v5802_v47  ;;  %v5859_v30 = vunpack.c.l.bf16 %v6597_v6 }
 0x3ed   :  { %7608 = vmatprep.subr.mxu1 %v9451_v2  ;;  %v7572_v31 = vpop.f32.mrf.mxu0  ;;  %7596 = vmatmul.mubr.msk.f32.gmra.mxu1 %vm546_vm0, %v7569_v28 }
 0x3ee   :  { %7609 = vmatpush3.msra.mxu1 %v9451_v2  ;;  %v6587_v2 = vld [vmem:[#allocation2 + $0x68] sm:$0xff]  }
 0x3ef   :  { %7610 = vmatprep.subr.mxu1 %v9456_v3  ;;  %v1069_v46 = vpop.f32.mrf.mxu0 }
 0x3f0   :  { %7611 = vmatpush3.msra.mxu1 %v9456_v3  ;;  %7598 = vmatprep.mubr.msk.f32.mxu1 %vm546_vm0, %v1069_v46  ;;  %v5804_v3 = vunpack.c.h.bf16 %v5802_v47 }
 0x3f1   :  { %7612 = vmatprep.subr.mxu1 %v9463_v5  ;;  %v7575_v0 = vpop.f32.mrf.mxu0  ;;  %7599 = vmatmul.mubr.msk.f32.gmra.mxu1 %vm546_vm0, %v7572_v31  ;;  %v6596_v31 = vld [vmem:[#allocation7 + $0x18] sm:$0xff]  }
 0x3f2   :  { %7613 = vmatpush3.msra.mxu1 %v9463_v5  ;;  %v5807_v5 = vunpack.c.l.bf16 %v6587_v2  ;;  %v5856_v46 = vunpack.c.h.bf16 %v6596_v31  ;;  %v5855_v47 = vunpack.c.l.bf16 %v6596_v31  ;;  %v6606_v31 = vld [vmem:[#allocation7 + $0x60] sm:$0xff]  }
 0x3f3   :  { %7614 = vmatprep.subr.mxu1 %v9469_v9  ;;  %v1079_v48 = vpop.f32.mrf.mxu0 }
 0x3f4   :  { %7615 = vmatpush3.msra.mxu1 %v9469_v9  ;;  %7601 = vmatprep.mubr.msk.f32.mxu1 %vm546_vm0, %v1079_v48  ;;  %v6588_v9 = vld [vmem:[#allocation2 + $0x70] sm:$0xff]  }
 0x3f5   :  { %7616 = vmatprep.subr.mxu1 %v9474_v12  ;;  %7602 = vmatmul.mubr.msk.f32.gmra.mxu1 %vm546_vm0, %v7575_v0  ;;  %v6595_v0 = vld [vmem:[#allocation7 + $0x10] sm:$0xff]  }
 0x3f6   :  { %7617 = vmatpush3.msra.mxu1 %v9474_v12  ;;  %7636 = vmatprep.mubr.f32.mxu1 %v5803_v1  ;;  %v5808_v12 = vunpack.c.h.bf16 %v6587_v2  ;;  %v5852_v1 = vunpack.c.h.bf16 %v6595_v0  ;;  %v5851_v48 = vunpack.c.l.bf16 %v6595_v0  ;;  %v6594_v2 = vld [vmem:[#allocation7 + $0x8] sm:$0xff]   ;;  %v6605_v0 = vld [vmem:[#allocation7 + $0x58] sm:$0xff]  }
 0x3f7   :  { %7618 = vmatprep.subr.mxu1 %v9479_v15 }
 0x3f8   :  { %7619 = vmatpush3.msra.mxu1 %v9479_v15  ;;  %v5811_v15 = vunpack.c.l.bf16 %v6588_v9 }
 0x3f9   :  { %7620 = vmatprep.subr.mxu1 %v9484_v17 }
 0x3fa   :  { %7621 = vmatpush3.msra.mxu1 %v9484_v17  ;;  %v6589_v17 = vld [vmem:[#allocation2 + $0x78] sm:$0xff]  }
 0x3fb   :  { %7622 = vmatprep.subr.mxu1 %v9489_v20 }
 0x3fc   :  { %7623 = vmatpush3.msra.mxu1 %v9489_v20  ;;  %v5812_v20 = vunpack.c.h.bf16 %v6588_v9  ;;  %v5842_v9 = vld [vmem:[#allocation7] sm:$0xff]  }
 0x3fd   :  { %7624 = vmatprep.subr.mxu1 %v9494_v22 }
 0x3fe   :  { %7625 = vmatpush3.msra.mxu1 %v9494_v22  ;;  %v5815_v22 = vunpack.c.l.bf16 %v6589_v17 }
 0x3ff   :  { %7626 = vmatprep.subr.mxu1 %v9499_v24 }
 0x400   :  { %7627 = vmatpush3.msra.mxu1 %v9499_v24  ;;  %v5816_v24 = vunpack.c.h.bf16 %v6589_v17  ;;  %v5834_v17 = vld [vmem:[%s10257_s26] sm:$0xff]  }
 0x401   :  { %7628 = vmatprep.subr.mxu1 %v9504_v25 }
 0x402   :  { %7629 = vmatpush3.msra.mxu1 %v9504_v25  ;;  %v6592_v25 = vld [vmem:[#allocation5 + $0x78] sm:$0xff]  }
 0x403   :  { %7630 = vmatprep.subr.mxu1 %v9509_v26  ;;  %v5831_v49 = vunpack.c.l.bf16 %v6592_v25 }
 0x404   :  { %7631 = vmatpush3.msra.mxu1 %v9509_v26  ;;  %v6591_v26 = vld [vmem:[#allocation5 + $0x70] sm:$0xff]  }
 0x405   :  { %7632 = vmatprep.subr.mxu1 %v9514_v27  ;;  %v5828_v50 = vunpack.c.h.bf16 %v6591_v26  ;;  %v5827_v51 = vunpack.c.l.bf16 %v6591_v26 }
 0x406   :  { %7633 = vmatpush3.msra.mxu1 %v9514_v27  ;;  %v5832_v27 = vunpack.c.h.bf16 %v6592_v25 }
 0x407   :  { %7634 = vmatprep.subr.mxu1 %v9519_v29 }
 0x408   :  { %7635 = vmatpush3.msra.mxu1 %v9519_v29  ;;  %7648 = vmatprep.subr.mxu0 %v5832_v27  ;;  %v6590_v29 = vld [vmem:[#allocation5 + $0x68] sm:$0xff]  }
 0x409   :  { %7637 = vmatmul.mubr.f32.vlgmr.msra.gmra.mxu1 %v5804_v3  ;;  %7649 = vmatpush3.msra.mxu0 %v5832_v27  ;;  %v5824_v52 = vunpack.c.h.bf16 %v6590_v29  ;;  %v5823_v53 = vunpack.c.l.bf16 %v6590_v29  ;;  %v5848_v3 = vunpack.c.h.bf16 %v6594_v2 }
 0x40a   :  { %7639 = vmatprep.mubr.f32.mxu1 %v5807_v5  ;;  %7650 = vmatprep.subr.mxu0 %v5831_v49  ;;  %v5847_v5 = vunpack.c.l.bf16 %v6594_v2  ;;  %v6604_v2 = vld [vmem:[#allocation7 + $0x50] sm:$0xff]  }
 0x40b   :  { %7651 = vmatpush3.msra.mxu0 %v5831_v49  ;;  %7698 = vmatprep.subr.mxu1 %v5872_v59 }
 0x40c   :  { %7652 = vmatprep.subr.mxu0 %v5828_v50  ;;  %7699 = vmatpush3.msra.mxu1 %v5872_v59 }
 0x40d   :  { %7640 = vmatmul.mubr.f32.gmra.mxu1 %v5808_v12  ;;  %7653 = vmatpush3.msra.mxu0 %v5828_v50  ;;  %v5844_v12 = vunpack.c.h.bf16 %v5842_v9 }
 0x40e   :  { %7642 = vmatprep.mubr.f32.mxu1 %v5811_v15  ;;  %7654 = vmatprep.subr.mxu0 %v5827_v51  ;;  %v5843_v15 = vunpack.c.l.bf16 %v5842_v9  ;;  %v6603_v9 = vld [vmem:[#allocation7 + $0x48] sm:$0xff]  }
 0x40f   :  { %7655 = vmatpush3.msra.mxu0 %v5827_v51  ;;  %7700 = vmatprep.subr.mxu1 %v5871_v60 }
 0x410   :  { %7656 = vmatprep.subr.mxu0 %v5824_v52  ;;  %7701 = vmatpush3.msra.mxu1 %v5871_v60 }
 0x411   :  { %7643 = vmatmul.mubr.f32.gmra.mxu1 %v5812_v20  ;;  %7657 = vmatpush3.msra.mxu0 %v5824_v52  ;;  %v5835_v20 = vunpack.c.l.bf16 %v5834_v17 }
 0x412   :  { %7645 = vmatprep.mubr.f32.mxu1 %v5815_v22  ;;  %7658 = vmatprep.subr.mxu0 %v5823_v53 }
 0x413   :  { %7659 = vmatpush3.msra.mxu0 %v5823_v53  ;;  %7702 = vmatprep.subr.mxu1 %v5868_v61 }
 0x414   :  { %7660 = vmatprep.subr.mxu0 %v5820_v55  ;;  %7703 = vmatpush3.msra.mxu1 %v5868_v61 }
 0x415   :  { %7646 = vmatmul.mubr.f32.gmra.mxu1 %v5816_v24  ;;  %7661 = vmatpush3.msra.mxu0 %v5820_v55 }
 0x416   :  { %7662 = vmatprep.subr.mxu0 %v5819_v56  ;;  %7704 = vmatprep.subr.mxu1 %v5867_v63 }
 0x417   :  { %7663 = vmatpush3.msra.mxu0 %v5819_v56  ;;  %7705 = vmatpush3.msra.mxu1 %v5867_v63 }
 0x418   :  { %7706 = vmatprep.subr.mxu1 %v5864_v4 }
 0x419   :  { %7707 = vmatpush3.msra.mxu1 %v5864_v4 }
 0x41a   :  { %7708 = vmatprep.subr.mxu1 %v5863_v7 }
 0x41b   :  { %7709 = vmatpush3.msra.mxu1 %v5863_v7 }
 0x41c   :  { %7710 = vmatprep.subr.mxu1 %v5860_v8 }
 0x41d   :  { %7711 = vmatpush3.msra.mxu1 %v5860_v8 }
 0x41e   :  { %7712 = vmatprep.subr.mxu1 %v5859_v30 }
 0x41f   :  { %7713 = vmatpush3.msra.mxu1 %v5859_v30 }
 0x420   :  { %7714 = vmatprep.subr.mxu1 %v5856_v46 }
 0x421   :  { %7715 = vmatpush3.msra.mxu1 %v5856_v46 }
 0x422   :  { %7716 = vmatprep.subr.mxu1 %v5855_v47 }
 0x423   :  { %7717 = vmatpush3.msra.mxu1 %v5855_v47  ;;  %v5900_v47 = vunpack.c.h.bf16 %v6606_v31 }
 0x424   :  { %7718 = vmatprep.subr.mxu1 %v5852_v1 }
 0x425   :  { %7719 = vmatpush3.msra.mxu1 %v5852_v1  ;;  %v5899_v1 = vunpack.c.l.bf16 %v6606_v31 }
 0x426   :  { %7720 = vmatprep.subr.mxu1 %v5851_v48 }
 0x427   :  { %7721 = vmatpush3.msra.mxu1 %v5851_v48  ;;  %v5896_v48 = vunpack.c.h.bf16 %v6605_v0 }
 0x428   :  { %7722 = vmatprep.subr.mxu1 %v5848_v3 }
 0x429   :  { %7723 = vmatpush3.msra.mxu1 %v5848_v3  ;;  %v5895_v3 = vunpack.c.l.bf16 %v6605_v0  ;;  %v6624_v0 = vld [vmem:[#allocation7 + $0xe0] sm:$0xff]  }
 0x42a   :  { %7724 = vmatprep.subr.mxu1 %v5847_v5 }
 0x42b   :  { %7725 = vmatpush3.msra.mxu1 %v5847_v5  ;;  %v5892_v5 = vunpack.c.h.bf16 %v6604_v2 }
 0x42c   :  { %7726 = vmatprep.subr.mxu1 %v5844_v12 }
 0x42d   :  { %7727 = vmatpush3.msra.mxu1 %v5844_v12  ;;  %v5891_v12 = vunpack.c.l.bf16 %v6604_v2 }
 0x42e   :  { %7728 = vmatprep.subr.mxu1 %v5843_v15 }
 0x42f   :  { %7729 = vmatpush3.msra.mxu1 %v5843_v15  ;;  %v5888_v15 = vunpack.c.h.bf16 %v6603_v9 }
 0x4a9   :  { %v7594_v11 = vpop.f32.mrf.mxu1 }
 0x4aa   :  { %v9688_v13 = vadd.f32 %v7594_v11, %v9626_v10 }
 0x4ab   :  { %v1195_v32 = vpop.f32.mrf.mxu1 }
 0x4ac   :  { %v9691_v33 = vadd.f32 %v1195_v32, %v9629_v14 }
 0x4ad   :  { %v7597_v35 = vpop.f32.mrf.mxu1 }
 0x4ae   :  { %v9694_v36 = vadd.f32 %v7597_v35, %v9632_v34 }
 0x4af   :  { %v1205_v16 = vpop.f32.mrf.mxu1 }
 0x4b0   :  { %v9697_v18 = vadd.f32 %v1205_v16, %v9635_v37  ;;  %v6593_v16 = vld [vmem:[%s10257_s26 + $0x8] sm:$0xff]  }
 0x4b1   :  { %v7600_v39 = vpop.f32.mrf.mxu1 }
 0x4b2   :  { %v9700_v19 = vadd.f32 %v7600_v39, %v9638_v38  ;;  %v5836_v39 = vunpack.c.h.bf16 %v5834_v17  ;;  %v5882_v17 = vld [vmem:[#allocation7 + $0x40] sm:$0xff]  }
 0x4b3   :  { %v1215_v41 = vpop.f32.mrf.mxu1 }
 0x4b4   :  { %v9703_v10 = vadd.f32 %v1215_v41, %v9641_v40  ;;  %v6601_v41 = vld [vmem:[%s10257_s26 + $0x10] sm:$0xff]  }
 0x4b5   :  { %v7603_v21 = vpop.f32.mrf.mxu1 }
 0x4b6   :  { %v1241_v14 = vadd.f32 %v7603_v21, %v9644_v42  ;;  %v5875_v21 = vunpack.c.l.bf16 %v6601_v41 }
 0x4b7   :  { %v1225_v43 = vpop.f32.mrf.mxu1 }
 0x4b8   :  { %v9707_v23 = vadd.f32 %v1225_v43, %v9646_v44  ;;  %v6602_v43 = vld [vmem:[%s10257_s26 + $0x18] sm:$0xff]  }
 0x4c9   :  { %v7638_v34 = vpop.f32.mrf.mxu1 }
 0x4cb   :  { %v1325_v45 = vpop.f32.mrf.mxu1 }
 0x4cc   :  { %7664 = vmatprep.mubr.msk.f32.mxu0 %vm546_vm0, %v1325_v45  ;;  %v5879_v45 = vunpack.c.l.bf16 %v6602_v43 }
 0x4cd   :  { %v7641_v37 = vpop.f32.mrf.mxu1  ;;  %7665 = vmatmul.mubr.msk.f32.vlgmr.msra.gmra.mxu0 %vm546_vm0, %v7638_v34 }
 0x4cf   :  { %v1335_v38 = vpop.f32.mrf.mxu1 }
 0x4d0   :  { %7667 = vmatprep.mubr.msk.f32.mxu0 %vm546_vm0, %v1335_v38 }
 0x4d1   :  { %v7644_v28 = vpop.f32.mrf.mxu1  ;;  %7668 = vmatmul.mubr.msk.f32.gmra.mxu0 %vm546_vm0, %v7641_v37  ;;  %v6608_v37 = vld [vmem:[#allocation7 + $0x70] sm:$0xff]  }
 0x4d3   :  { %v1345_v40 = vpop.f32.mrf.mxu1 }
 0x4d4   :  { %7670 = vmatprep.mubr.msk.f32.mxu0 %vm546_vm0, %v1345_v40  ;;  %v5908_v40 = vunpack.c.h.bf16 %v6608_v37 }
 0x4d5   :  { %v7647_v42 = vpop.f32.mrf.mxu1  ;;  %7671 = vmatmul.mubr.msk.f32.gmra.mxu0 %vm546_vm0, %v7644_v28  ;;  %v5880_v28 = vunpack.c.h.bf16 %v6602_v43 }
 0x4d7   :  { %v1355_v44 = vpop.f32.mrf.mxu1 }
 0x4d8   :  { %7673 = vmatprep.mubr.msk.f32.mxu0 %vm546_vm0, %v1355_v44  ;;  %v5907_v44 = vunpack.c.l.bf16 %v6608_v37 }
 0x4d9   :  { %7674 = vmatmul.mubr.msk.f32.gmra.mxu0 %vm546_vm0, %v7647_v42  ;;  %v6607_v42 = vld [vmem:[#allocation7 + $0x68] sm:$0xff]  }
 0x4da   :  { %7692 = vmatprep.mubr.msk.f32.mxu0 %vm546_vm0, %v5835_v20  ;;  %v5904_v30 = vunpack.c.h.bf16 %v6607_v42  ;;  %v5903_v46 = vunpack.c.l.bf16 %v6607_v42  ;;  %v5887_v20 = vunpack.c.l.bf16 %v6603_v9  ;;  %v6625_v42 = vld [vmem:[#allocation7 + $0xe8] sm:$0xff]  }
 0x58d   :  { %v7666_v22 = vpop.f32.mrf.mxu0 }
 0x58e   :  { %v1511_v63 = vadd.f32 %v7666_v22, %v9688_v13  ;;  %v5884_v22 = vunpack.c.h.bf16 %v5882_v17 }
 0x58f   :  { %v1471_v24 = vpop.f32.mrf.mxu0 }
 0x590   :  { %v1510_v7 = vadd.f32 %v1471_v24, %v9691_v33  ;;  %v1519_v32 = vmul.f32 0.01, %v1511_v63  ;;  %v5883_v24 = vunpack.c.l.bf16 %v5882_v17 }
 0x591   :  { %v7669_v25 = vpop.f32.mrf.mxu0 }
 0x592   :  { %v1513_v56 = vadd.f32 %v7669_v25, %v9694_v36  ;;  %v1518_v13 = vmul.f32 0.01, %v1510_v7  ;;  %v9749_v33 = vmax.f32 %v1511_v63, %v1519_v32 }
 0x593   :  { %v1481_v26 = vpop.f32.mrf.mxu0 }
 0x594   :  { %v1512_v60 = vadd.f32 %v1481_v26, %v9697_v18  ;;  %v1521_v4 = vmul.f32 0.01, %v1513_v56  ;;  %v9754_v18 = vmax.f32 %v1510_v7, %v1518_v13  ;;  %v6617_v7 = vld [vmem:[#allocation7 + $0xb0] sm:$0xff]  }
 0x595   :  { %v7672_v27 = vpop.f32.mrf.mxu0  ;;  %v5948_v32 = vunpack.c.h.bf16 %v6617_v7  ;;  %v5947_v13 = vunpack.c.l.bf16 %v6617_v7 }
 0x596   :  { %v1515_v29 = vadd.f32 %v7672_v27, %v9700_v19  ;;  %v1520_v8 = vmul.f32 0.01, %v1512_v60  ;;  %v9741_v35 = vmax.f32 %v1513_v56, %v1521_v4  ;;  %v5839_v19 = vunpack.c.l.bf16 %v6593_v16  ;;  %v6610_v27 = vld [vmem:[%s10257_s26 + $0x20] sm:$0xff]  }
 0x597   :  { %v1491_v49 = vpop.f32.mrf.mxu0 }
 0x598   :  { %v1514_v53 = vadd.f32 %v1491_v49, %v9703_v10  ;;  %v1523_v57 = vmul.f32 0.01, %v1515_v29  ;;  %v9745_v36 = vmax.f32 %v1512_v60, %v1520_v8  ;;  %v5840_v10 = vunpack.c.h.bf16 %v6593_v16  ;;  %v6615_v16 = vld [vmem:[#allocation7 + $0xa0] sm:$0xff]  }
 0x599   :  { %v7675_v50 = vpop.f32.mrf.mxu0 }
 0x59a   :  { %v1517_v51 = vadd.f32 %v7675_v50, %v1241_v14  ;;  %v1522_v61 = vmul.f32 0.01, %v1514_v53  ;;  %v9732_v6 = vmax.f32 %v1515_v29, %v1523_v57  ;;  %v6609_v14 = vld [vmem:[#allocation7 + $0x78] sm:$0xff]   ;;  %v5915_v50 = vunpack.c.l.bf16 %v6610_v27 }
 0x59b   :  { %v1501_v52 = vpop.f32.mrf.mxu0  ;;  %v5912_v34 = vunpack.c.h.bf16 %v6609_v14  ;;  %v5911_v38 = vunpack.c.l.bf16 %v6609_v14 }
 0x59c   :  { %v1525_v54 = vmul.f32 0.01, %v1517_v51  ;;  %v1516_v55 = vadd.f32 %v1501_v52, %v9707_v23  ;;  %v9737_v11 = vmax.f32 %v1514_v53, %v1522_v61  ;;  %v5876_v23 = vunpack.c.h.bf16 %v6601_v41  ;;  %v6618_v52 = vld [vmem:[#allocation7 + $0xb8] sm:$0xff]  }
 0x59d   :  { %v5952_v57 = vunpack.c.h.bf16 %v6618_v52  ;;  %v5951_v8 = vunpack.c.l.bf16 %v6618_v52 }
 0x59e   :  { %v9723_v58 = vmax.f32 %v1517_v51, %v1525_v54  ;;  %v1524_v59 = vmul.f32 0.01, %v1516_v55  ;;  %v6611_v51 = vld [vmem:[%s10257_s26 + $0x28] sm:$0xff]   ;;  %v5916_v54 = vunpack.c.h.bf16 %v6610_v27 }
 0x59f   :  { %v5920_v61 = vunpack.c.h.bf16 %v6611_v51 }
 0x5a0   :  { %v9726_v62 = vmax.f32 %v1516_v55, %v1524_v59  ;;  %7676 = vmatprep.subr.mxu0 %v9723_v58  ;;  %7796 = vmatprep.subr.mxu1 %v9723_v58  ;;  %v5919_v55 = vunpack.c.l.bf16 %v6611_v51  ;;  %v6619_v59 = vld [vmem:[%s10257_s26 + $0x30] sm:$0xff]  }
 0x5a1   :  { %7677 = vmatpush3.msra.mxu0 %v9723_v58  ;;  %v5955_v4 = vunpack.c.l.bf16 %v6619_v59 }
 0x5a2   :  { %7678 = vmatprep.subr.mxu0 %v9726_v62 }
 0x5a3   :  { %7679 = vmatpush3.msra.mxu0 %v9726_v62 }
 0x5a4   :  { %7680 = vmatprep.subr.mxu0 %v9732_v6 }
 0x5a5   :  { %7681 = vmatpush3.msra.mxu0 %v9732_v6 }
 0x5a6   :  { %7682 = vmatprep.subr.mxu0 %v9737_v11 }
 0x5a7   :  { %7683 = vmatpush3.msra.mxu0 %v9737_v11 }
 0x5a8   :  { %7684 = vmatprep.subr.mxu0 %v9741_v35 }
 0x5a9   :  { %7685 = vmatpush3.msra.mxu0 %v9741_v35 }
 0x5aa   :  { %7686 = vmatprep.subr.mxu0 %v9745_v36 }
 0x5ab   :  { %7687 = vmatpush3.msra.mxu0 %v9745_v36 }
 0x5ac   :  { %7688 = vmatprep.subr.mxu0 %v9749_v33 }
 0x5ad   :  { %7689 = vmatpush3.msra.mxu0 %v9749_v33 }
 0x5ae   :  { %7690 = vmatprep.subr.mxu0 %v9754_v18 }
 0x5af   :  { %7691 = vmatpush3.msra.mxu0 %v9754_v18 }
 0x5b0   :  { %7693 = vmatmul.mubr.msk.f32.vlgmr.msra.gmra.mxu0 %vm546_vm0, %v5836_v39  ;;  %7736 = vmatprep.subr.mxu0 %v9723_v58 }
 0x5b1   :  { %7737 = vmatpush3.msra.mxu0 %v9723_v58  ;;  %7695 = vmatprep.mubr.msk.f32.mxu0 %vm546_vm0, %v5839_v19  ;;  %v5940_v19 = vunpack.c.h.bf16 %v6615_v16 }
 0x5b2   :  { %7738 = vmatprep.subr.mxu0 %v9726_v62 }
 0x5b3   :  { %7739 = vmatpush3.msra.mxu0 %v9726_v62 }
 0x5b4   :  { %7740 = vmatprep.subr.mxu0 %v9732_v6  ;;  %7696 = vmatmul.mubr.msk.f32.gmra.mxu0 %vm546_vm0, %v5840_v10  ;;  %v6614_v10 = vld [vmem:[#allocation7 + $0x98] sm:$0xff]  }
 0x5b5   :  { %7741 = vmatpush3.msra.mxu0 %v9732_v6  ;;  %7752 = vmatprep.mubr.msk.f32.mxu0 %vm546_vm0, %v5875_v21  ;;  %v5936_v21 = vunpack.c.h.bf16 %v6614_v10  ;;  %v5935_v43 = vunpack.c.l.bf16 %v6614_v10 }
 0x5b6   :  { %7742 = vmatprep.subr.mxu0 %v9737_v11 }
 0x5b7   :  { %7743 = vmatpush3.msra.mxu0 %v9737_v11 }
 0x5b8   :  { %7744 = vmatprep.subr.mxu0 %v9741_v35 }
 0x5b9   :  { %7745 = vmatpush3.msra.mxu0 %v9741_v35 }
 0x5ba   :  { %7746 = vmatprep.subr.mxu0 %v9745_v36 }
 0x5bb   :  { %7747 = vmatpush3.msra.mxu0 %v9745_v36 }
 0x5bc   :  { %7748 = vmatprep.subr.mxu0 %v9749_v33 }
 0x5bd   :  { %7749 = vmatpush3.msra.mxu0 %v9749_v33 }
 0x5be   :  { %7750 = vmatprep.subr.mxu0 %v9754_v18 }
 0x5bf   :  { %7751 = vmatpush3.msra.mxu0 %v9754_v18 }
 0x5c0   :  { %7753 = vmatmul.mubr.msk.f32.vlgmr.msra.gmra.mxu0 %vm546_vm0, %v5876_v23  ;;  %7758 = vmatprep.subr.mxu0 %v5912_v34 }
 0x5c1   :  { %7759 = vmatpush3.msra.mxu0 %v5912_v34  ;;  %7755 = vmatprep.mubr.msk.f32.mxu0 %vm546_vm0, %v5879_v45  ;;  %v6626_v34 = vld [vmem:[#allocation7 + $0xf0] sm:$0xff]  }
 0x5c2   :  { %7760 = vmatprep.subr.mxu0 %v5911_v38  ;;  %v5988_v37 = vunpack.c.h.bf16 %v6626_v34 }
 0x5c3   :  { %7761 = vmatpush3.msra.mxu0 %v5911_v38 }
 0x5c4   :  { %7756 = vmatmul.mubr.msk.f32.gmra.mxu0 %vm546_vm0, %v5880_v28  ;;  %7762 = vmatprep.subr.mxu0 %v5908_v40  ;;  %v5987_v28 = vunpack.c.l.bf16 %v6626_v34 }
 0x5c5   :  { %7763 = vmatpush3.msra.mxu0 %v5908_v40  ;;  %v6612_v40 = vld [vmem:[#allocation7 + $0x88] sm:$0xff]  }
 0x5c6   :  { %7764 = vmatprep.subr.mxu0 %v5907_v44  ;;  %v5927_v31 = vunpack.c.l.bf16 %v6612_v40 }
 0x5c7   :  { %7765 = vmatpush3.msra.mxu0 %v5907_v44  ;;  %v5928_v44 = vunpack.c.h.bf16 %v6612_v40 }
 0x5c8   :  { %7766 = vmatprep.subr.mxu0 %v5904_v30 }
 0x5c9   :  { %7767 = vmatpush3.msra.mxu0 %v5904_v30  ;;  %v5984_v30 = vunpack.c.h.bf16 %v6625_v42 }
 0x5ca   :  { %7768 = vmatprep.subr.mxu0 %v5903_v46 }
 0x5cb   :  { %7769 = vmatpush3.msra.mxu0 %v5903_v46  ;;  %v5983_v46 = vunpack.c.l.bf16 %v6625_v42 }
 0x5cc   :  { %7770 = vmatprep.subr.mxu0 %v5900_v47 }
 0x5cd   :  { %7771 = vmatpush3.msra.mxu0 %v5900_v47  ;;  %v5922_v47 = vld [vmem:[#allocation7 + $0x80] sm:$0xff]  }
 0x5ce   :  { %7772 = vmatprep.subr.mxu0 %v5899_v1  ;;  %v5923_v2 = vunpack.c.l.bf16 %v5922_v47 }
 0x5cf   :  { %7773 = vmatpush3.msra.mxu0 %v5899_v1  ;;  %v5924_v1 = vunpack.c.h.bf16 %v5922_v47  ;;  %v6034_v47 = vld [vmem:[#allocation11 + $0x40] sm:$0xff]  }
 0x5d0   :  { %7774 = vmatprep.subr.mxu0 %v5896_v48 }
 0x5d1   :  { %7775 = vmatpush3.msra.mxu0 %v5896_v48  ;;  %v5980_v48 = vunpack.c.h.bf16 %v6624_v0 }
 0x5d2   :  { %7776 = vmatprep.subr.mxu0 %v5895_v3 }
 0x5d3   :  { %7777 = vmatpush3.msra.mxu0 %v5895_v3  ;;  %v5979_v3 = vunpack.c.l.bf16 %v6624_v0  ;;  %v6036_v0 = vunpack.c.h.bf16 %v6034_v47 }
 0x5d4   :  { %7778 = vmatprep.subr.mxu0 %v5892_v5 }
 0x5d5   :  { %7779 = vmatpush3.msra.mxu0 %v5892_v5  ;;  %v6623_v5 = vld [vmem:[#allocation7 + $0xd8] sm:$0xff]  }
 0x5d6   :  { %7780 = vmatprep.subr.mxu0 %v5891_v12  ;;  %v5976_v9 = vunpack.c.h.bf16 %v6623_v5 }
 0x5d7   :  { %7781 = vmatpush3.msra.mxu0 %v5891_v12  ;;  %v5975_v12 = vunpack.c.l.bf16 %v6623_v5 }
 0x5d8   :  { %7782 = vmatprep.subr.mxu0 %v5888_v15 }
 0x5d9   :  { %7783 = vmatpush3.msra.mxu0 %v5888_v15  ;;  %v6622_v15 = vld [vmem:[#allocation7 + $0xd0] sm:$0xff]  }
 0x5da   :  { %7784 = vmatprep.subr.mxu0 %v5887_v20  ;;  %v5972_v17 = vunpack.c.h.bf16 %v6622_v15 }
 0x5db   :  { %7785 = vmatpush3.msra.mxu0 %v5887_v20  ;;  %v5971_v20 = vunpack.c.l.bf16 %v6622_v15 }
 0x5dc   :  { %7786 = vmatprep.subr.mxu0 %v5884_v22 }
 0x5dd   :  { %7787 = vmatpush3.msra.mxu0 %v5884_v22  ;;  %v6621_v22 = vld [vmem:[#allocation7 + $0xc8] sm:$0xff]  }
 0x5de   :  { %7788 = vmatprep.subr.mxu0 %v5883_v24 }
 0x5df   :  { %7789 = vmatpush3.msra.mxu0 %v5883_v24  ;;  %v5968_v24 = vunpack.c.h.bf16 %v6621_v22 }
 0x5e0   :  { %7856 = vmatprep.subr.mxu0 %v9723_v58 }
 0x670   :  { %v7694_v25 = vpop.f32.mrf.mxu0 }
 0x672   :  { %v1621_v26 = vpop.f32.mrf.mxu0 }
 0x673   :  { %7730 = vmatprep.mubr.f32.mxu1 %v1621_v26  ;;  %v5962_v26 = vld [vmem:[#allocation7 + $0xc0] sm:$0xff]  }
 0x674   :  { %7731 = vmatmul.mubr.f32.vlgmr.msra.gmra.mxu1 %v7694_v25  ;;  %v7697_v49 = vpop.f32.mrf.mxu0  ;;  %v5967_v25 = vunpack.c.l.bf16 %v6621_v22  ;;  %v5964_v27 = vunpack.c.h.bf16 %v5962_v26 }
 0x675   :  { %7797 = vmatpush3.msra.mxu1 %v9723_v58 }
 0x676   :  { %7798 = vmatprep.subr.mxu1 %v9726_v62  ;;  %v1631_v29 = vpop.f32.mrf.mxu0 }
 0x677   :  { %7799 = vmatpush3.msra.mxu1 %v9726_v62  ;;  %7733 = vmatprep.mubr.f32.mxu1 %v1631_v29 }
 0x678   :  { %7800 = vmatprep.subr.mxu1 %v9732_v6  ;;  %7734 = vmatmul.mubr.f32.gmra.mxu1 %v7697_v49  ;;  %v5963_v49 = vunpack.c.l.bf16 %v5962_v26 }
 0x679   :  { %7801 = vmatpush3.msra.mxu1 %v9732_v6  ;;  %7812 = vmatprep.mubr.msk.f32.mxu1 %vm546_vm0, %v5915_v50  ;;  %v6641_v50 = vld [vmem:[#allocation11 + $0x78] sm:$0xff]  }
 0x67a   :  { %7802 = vmatprep.subr.mxu1 %v9737_v11  ;;  %v6064_v29 = vunpack.c.h.bf16 %v6641_v50 }
 0x67b   :  { %7803 = vmatpush3.msra.mxu1 %v9737_v11 }
 0x67c   :  { %7804 = vmatprep.subr.mxu1 %v9741_v35 }
 0x67d   :  { %7805 = vmatpush3.msra.mxu1 %v9741_v35 }
 0x67e   :  { %7806 = vmatprep.subr.mxu1 %v9745_v36 }
 0x67f   :  { %7807 = vmatpush3.msra.mxu1 %v9745_v36 }
 0x680   :  { %7808 = vmatprep.subr.mxu1 %v9749_v33  ;;  %v7754_v53 = vpop.f32.mrf.mxu0 }
 0x681   :  { %7809 = vmatpush3.msra.mxu1 %v9749_v33 }
 0x682   :  { %7810 = vmatprep.subr.mxu1 %v9754_v18  ;;  %v1854_v56 = vpop.f32.mrf.mxu0 }
 0x683   :  { %7811 = vmatpush3.msra.mxu1 %v9754_v18  ;;  %7790 = vmatprep.mubr.f32.mxu0 %v1854_v56 }
 0x684   :  { %7813 = vmatmul.mubr.msk.f32.vlgmr.msra.gmra.mxu1 %vm546_vm0, %v5916_v54  ;;  %v7757_v60 = vpop.f32.mrf.mxu0  ;;  %7791 = vmatmul.mubr.f32.vlgmr.msra.gmra.mxu0 %v7754_v53  ;;  %v5646_v54 = vld [vmem:[#allocation8] ss:$0 sm:$0xff] }
 0x685   :  { %7857 = vmatpush3.msra.mxu0 %v9723_v58  ;;  %7815 = vmatprep.mubr.msk.f32.mxu1 %vm546_vm0, %v5919_v55  ;;  %v6616_v58 = vld [vmem:[#allocation7 + $0xa8] sm:$0xff]  }
 0x686   :  { %7858 = vmatprep.subr.mxu0 %v9726_v62  ;;  %v1864_v63 = vpop.f32.mrf.mxu0  ;;  %7818 = vmatprep.subr.mxu1 %v5952_v57  ;;  %v5943_v39 = vunpack.c.l.bf16 %v6616_v58 }
 0x687   :  { %7859 = vmatpush3.msra.mxu0 %v9726_v62  ;;  %7793 = vmatprep.mubr.f32.mxu0 %v1864_v63  ;;  %v5944_v62 = vunpack.c.h.bf16 %v6616_v58 }
 0x688   :  { %7816 = vmatmul.mubr.msk.f32.gmra.mxu1 %vm546_vm0, %v5920_v61  ;;  %7860 = vmatprep.subr.mxu0 %v9732_v6 }
 0x689   :  { %7794 = vmatmul.mubr.f32.gmra.mxu0 %v7757_v60  ;;  %7819 = vmatpush3.msra.mxu1 %v5952_v57 }
 0x68a   :  { %7861 = vmatpush3.msra.mxu0 %v9732_v6  ;;  %7872 = vmatprep.mubr.msk.f32.mxu0 %vm546_vm0, %v5955_v4  ;;  %v6620_v6 = vld [vmem:[%s10257_s26 + $0x38] sm:$0xff]  }
 0x68b   :  { %7862 = vmatprep.subr.mxu0 %v9737_v11  ;;  %7820 = vmatprep.subr.mxu1 %v5951_v8  ;;  %v5959_v41 = vunpack.c.l.bf16 %v6620_v6 }
 0x68c   :  { %7863 = vmatpush3.msra.mxu0 %v9737_v11  ;;  %7821 = vmatpush3.msra.mxu1 %v5951_v8  ;;  %v5956_v11 = vunpack.c.h.bf16 %v6619_v59 }
 0x68d   :  { %7864 = vmatprep.subr.mxu0 %v9741_v35  ;;  %7822 = vmatprep.subr.mxu1 %v5948_v32 }
 0x68e   :  { %7865 = vmatpush3.msra.mxu0 %v9741_v35  ;;  %7823 = vmatpush3.msra.mxu1 %v5948_v32  ;;  %v5960_v35 = vunpack.c.h.bf16 %v6620_v6 }
 0x68f   :  { %7866 = vmatprep.subr.mxu0 %v9745_v36  ;;  %7824 = vmatprep.subr.mxu1 %v5947_v13 }
 0x690   :  { %7867 = vmatpush3.msra.mxu0 %v9745_v36  ;;  %7825 = vmatpush3.msra.mxu1 %v5947_v13  ;;  %v5939_v36 = vunpack.c.l.bf16 %v6615_v16 }
 0x691   :  { %7868 = vmatprep.subr.mxu0 %v9749_v33  ;;  %7826 = vmatprep.subr.mxu1 %v5944_v62 }
 0x692   :  { %7869 = vmatpush3.msra.mxu0 %v9749_v33  ;;  %7827 = vmatpush3.msra.mxu1 %v5944_v62  ;;  %v6627_v33 = vld [vmem:[#allocation7 + $0xf8] sm:$0xff]  }
 0x693   :  { %7870 = vmatprep.subr.mxu0 %v9754_v18  ;;  %7828 = vmatprep.subr.mxu1 %v5943_v39  ;;  %v5992_v14 = vunpack.c.h.bf16 %v6627_v33  ;;  %v5991_v23 = vunpack.c.l.bf16 %v6627_v33 }
 0x694   :  { %7871 = vmatpush3.msra.mxu0 %v9754_v18  ;;  %7829 = vmatpush3.msra.mxu1 %v5943_v39  ;;  %v6613_v18 = vld [vmem:[#allocation7 + $0x90] sm:$0xff]  }
 0x695   :  { %7873 = vmatmul.mubr.msk.f32.vlgmr.msra.gmra.mxu0 %vm546_vm0, %v5956_v11  ;;  %7830 = vmatprep.subr.mxu1 %v5940_v19  ;;  %v5932_v45 = vunpack.c.h.bf16 %v6613_v18  ;;  %v5931_v38 = vunpack.c.l.bf16 %v6613_v18  ;;  %v6638_v18 = vld [vmem:[#allocation11 + $0x60] sm:$0xff]  }
 0x696   :  { %7875 = vmatprep.mubr.msk.f32.mxu0 %vm546_vm0, %v5959_v41  ;;  %7831 = vmatpush3.msra.mxu1 %v5940_v19  ;;  %v6640_v19 = vld [vmem:[#allocation11 + $0x70] sm:$0xff]   ;;  %v6052_v34 = vunpack.c.h.bf16 %v6638_v18 }
 0x697   :  { %7832 = vmatprep.subr.mxu1 %v5939_v36  ;;  %7878 = vmatprep.subr.mxu0 %v5992_v14  ;;  %v6060_v10 = vunpack.c.h.bf16 %v6640_v19 }
 0x698   :  { %7833 = vmatpush3.msra.mxu1 %v5939_v36  ;;  %7879 = vmatpush3.msra.mxu0 %v5992_v14  ;;  %v6639_v14 = vld [vmem:[#allocation11 + $0x68] sm:$0xff]  }
 0x699   :  { %7876 = vmatmul.mubr.msk.f32.gmra.mxu0 %vm546_vm0, %v5960_v35  ;;  %7834 = vmatprep.subr.mxu1 %v5936_v21  ;;  %v6063_v35 = vunpack.c.l.bf16 %v6641_v50 }
 0x69a   :  { %7835 = vmatpush3.msra.mxu1 %v5936_v21  ;;  %7880 = vmatprep.subr.mxu0 %v5991_v23  ;;  %v6059_v21 = vunpack.c.l.bf16 %v6640_v19 }
 0x69b   :  { %7836 = vmatprep.subr.mxu1 %v5935_v43  ;;  %7881 = vmatpush3.msra.mxu0 %v5991_v23  ;;  %v6055_v23 = vunpack.c.l.bf16 %v6639_v14 }
 0x69c   :  { %7837 = vmatpush3.msra.mxu1 %v5935_v43  ;;  %7882 = vmatprep.subr.mxu0 %v5988_v37  ;;  %v6056_v43 = vunpack.c.h.bf16 %v6639_v14 }
 0x69d   :  { %7838 = vmatprep.subr.mxu1 %v5932_v45  ;;  %7883 = vmatpush3.msra.mxu0 %v5988_v37  ;;  %v6637_v37 = vld [vmem:[#allocation11 + $0x58] sm:$0xff]  }
 0x69e   :  { %7839 = vmatpush3.msra.mxu1 %v5932_v45  ;;  %7884 = vmatprep.subr.mxu0 %v5987_v28  ;;  %v6051_v45 = vunpack.c.l.bf16 %v6638_v18  ;;  %v6047_v40 = vunpack.c.l.bf16 %v6637_v37 }
 0x69f   :  { %7840 = vmatprep.subr.mxu1 %v5931_v38  ;;  %7885 = vmatpush3.msra.mxu0 %v5987_v28  ;;  %v6636_v28 = vld [vmem:[#allocation11 + $0x50] sm:$0xff]  }
 0x6a0   :  { %7841 = vmatpush3.msra.mxu1 %v5931_v38  ;;  %7886 = vmatprep.subr.mxu0 %v5984_v30  ;;  %v6048_v38 = vunpack.c.h.bf16 %v6637_v37  ;;  %v6044_v42 = vunpack.c.h.bf16 %v6636_v28 }
 0x6a1   :  { %7842 = vmatprep.subr.mxu1 %v5928_v44  ;;  %7887 = vmatpush3.msra.mxu0 %v5984_v30  ;;  %v6635_v30 = vld [vmem:[#allocation11 + $0x48] sm:$0xff]  }
 0x6a2   :  { %7843 = vmatpush3.msra.mxu1 %v5928_v44  ;;  %7888 = vmatprep.subr.mxu0 %v5983_v46  ;;  %v6043_v44 = vunpack.c.l.bf16 %v6636_v28 }
 0x6a3   :  { %7844 = vmatprep.subr.mxu1 %v5927_v31  ;;  %7889 = vmatpush3.msra.mxu0 %v5983_v46  ;;  %v6039_v46 = vunpack.c.l.bf16 %v6635_v30 }
 0x6a4   :  { %7845 = vmatpush3.msra.mxu1 %v5927_v31  ;;  %7890 = vmatprep.subr.mxu0 %v5980_v48  ;;  %v6040_v31 = vunpack.c.h.bf16 %v6635_v30  ;;  %v6648_v30 = vld [vmem:[#allocation11 + $0xb8] sm:$0xff]  }
 0x6a5   :  { %7846 = vmatprep.subr.mxu1 %v5924_v1  ;;  %7891 = vmatpush3.msra.mxu0 %v5980_v48  ;;  %v5994_v48 = vld [vmem:[#allocation10] sm:$0xff]  }
 0x6a6   :  { %7847 = vmatpush3.msra.mxu1 %v5924_v1  ;;  %7892 = vmatprep.subr.mxu0 %v5979_v3  ;;  %v6035_v1 = vunpack.c.l.bf16 %v6034_v47  ;;  %v6647_v47 = vld [vmem:[#allocation11 + $0xb0] sm:$0xff]  }
 0x6a7   :  { %7848 = vmatprep.subr.mxu1 %v5923_v2  ;;  %7893 = vmatpush3.msra.mxu0 %v5979_v3 }
 0x6a8   :  { %7849 = vmatpush3.msra.mxu1 %v5923_v2  ;;  %7894 = vmatprep.subr.mxu0 %v5976_v9  ;;  %v5995_v2 = vunpack.c.l.bf16 %v5994_v48 }
 0x6a9   :  { %7895 = vmatpush3.msra.mxu0 %v5976_v9 }
 0x6aa   :  { %7896 = vmatprep.subr.mxu0 %v5975_v12 }
 0x6ab   :  { %7897 = vmatpush3.msra.mxu0 %v5975_v12 }
 0x6ac   :  { %7898 = vmatprep.subr.mxu0 %v5972_v17 }
 0x6ad   :  { %7899 = vmatpush3.msra.mxu0 %v5972_v17 }
 0x6ae   :  { %7900 = vmatprep.subr.mxu0 %v5971_v20 }
 0x6af   :  { %7901 = vmatpush3.msra.mxu0 %v5971_v20 }
 0x6b0   :  { %7902 = vmatprep.subr.mxu0 %v5968_v24 }
 0x6b1   :  { %7903 = vmatpush3.msra.mxu0 %v5968_v24 }
 0x6b2   :  { %7904 = vmatprep.subr.mxu0 %v5967_v25 }
 0x6b3   :  { %7905 = vmatpush3.msra.mxu0 %v5967_v25 }
 0x6b4   :  { %7906 = vmatprep.subr.mxu0 %v5964_v27 }
 0x6b5   :  { %7907 = vmatpush3.msra.mxu0 %v5964_v27 }
 0x6b6   :  { %7908 = vmatprep.subr.mxu0 %v5963_v49 }
 0x6b7   :  { %7909 = vmatpush3.msra.mxu0 %v5963_v49 }
 0x6b8   :  { %7973 = vmatprep.subr.mxu0 %v6064_v29 }
 0x734   :  { %v7732_v51 = vpop.f32.mrf.mxu1 }
 0x735   :  { %v1764_v56 = vadd.f32 %v7732_v51, %v5646_v54 }
 0x736   :  { %v1738_v52 = vpop.f32.mrf.mxu1 }
 0x737   :  { %v1763_v60 = vadd.f32 %v5646_v54, %v1738_v52 }
 0x738   :  { %v7735_v53 = vpop.f32.mrf.mxu1 }
 0x739   :  { %v1766_v8 = vadd.f32 %v7735_v53, %v5646_v54 }
 0x73a   :  { %v1748_v55 = vpop.f32.mrf.mxu1 }
 0x73b   :  { %v1765_v13 = vadd.f32 %v5646_v54, %v1748_v55 }
 0x744   :  { %v7814_v57 = vpop.f32.mrf.mxu1  ;;  %v7792_v59 = vpop.f32.mrf.mxu0 }
 0x745   :  { %v9828_v61 = vadd.f32 %v7792_v59, %v1764_v56  ;;  %v6634_v59 = vld [vmem:[#allocation11 + $0x38] sm:$0xff]  }
 0x746   :  { %v2082_v63 = vpop.f32.mrf.mxu1  ;;  %v1972_v4 = vpop.f32.mrf.mxu0 }
 0x747   :  { %v9830_v7 = vadd.f32 %v1972_v4, %v1763_v60  ;;  %7850 = vmatprep.mubr.f32.mxu1 %v2082_v63  ;;  %v5996_v63 = vunpack.c.h.bf16 %v5994_v48  ;;  %v6028_v4 = vunpack.c.h.bf16 %v6634_v59  ;;  %v6646_v48 = vld [vmem:[#allocation11 + $0xa8] sm:$0xff]  }
 0x748   :  { %v7817_v32 = vpop.f32.mrf.mxu1  ;;  %7851 = vmatmul.mubr.f32.vlgmr.msra.gmra.mxu1 %v7814_v57 }
 0x749   :  { %v7795_v58 = vpop.f32.mrf.mxu0 }
 0x74a   :  { %v9832_v62 = vadd.f32 %v7795_v58, %v1766_v8  ;;  %v2092_v16 = vpop.f32.mrf.mxu1  ;;  %v6027_v8 = vunpack.c.l.bf16 %v6634_v59  ;;  %v6632_v58 = vld [vmem:[#allocation11 + $0x28] sm:$0xff]  }
 0x74b   :  { %v1982_v6 = vpop.f32.mrf.mxu0  ;;  %7853 = vmatprep.mubr.f32.mxu1 %v2092_v16  ;;  %v6631_v16 = vld [vmem:[#allocation11 + $0x20] sm:$0xff]  }
 0x74c   :  { %v9834_v39 = vadd.f32 %v1982_v6, %v1765_v13  ;;  %7854 = vmatmul.mubr.f32.gmra.mxu1 %v7817_v32  ;;  %v6019_v6 = vunpack.c.l.bf16 %v6632_v58  ;;  %v6015_v19 = vunpack.c.l.bf16 %v6631_v16 }
 0x74d   :  { %7924 = vmatprep.mubr.msk.f32.mxu1 %vm2464_vm1, %v5995_v2  ;;  %v6095_v2 = vunpack.c.l.bf16 %v6647_v47 }
 0x755   :  { %v7874_v11 = vpop.f32.mrf.mxu0 }
 0x757   :  { %v2310_v41 = vpop.f32.mrf.mxu0 }
 0x758   :  { %7910 = vmatprep.mubr.f32.mxu0 %v2310_v41 }
 0x759   :  { %v7877_v36 = vpop.f32.mrf.mxu0  ;;  %7911 = vmatmul.mubr.f32.vlgmr.msra.gmra.mxu0 %v7874_v11  ;;  %v6630_v11 = vld [vmem:[#allocation11 + $0x18] sm:$0xff]  }
 0x75a   :  { %7974 = vmatpush3.msra.mxu0 %v6064_v29  ;;  %v6012_v41 = vunpack.c.h.bf16 %v6630_v11 }
 0x75b   :  { %v2320_v33 = vpop.f32.mrf.mxu0  ;;  %7975 = vmatprep.subr.mxu0 %v6063_v35 }
 0x75c   :  { %7913 = vmatprep.mubr.f32.mxu0 %v2320_v33  ;;  %7976 = vmatpush3.msra.mxu0 %v6063_v35  ;;  %v6629_v35 = vld [vmem:[#allocation11 + $0x10] sm:$0xff]   ;;  %v6628_v33 = vld [vmem:[#allocation11 + $0x8] sm:$0xff]  }
 0x75d   :  { %7914 = vmatmul.mubr.f32.gmra.mxu0 %v7877_v36  ;;  %7977 = vmatprep.subr.mxu0 %v6060_v10  ;;  %v6011_v36 = vunpack.c.l.bf16 %v6630_v11  ;;  %v6004_v14 = vunpack.c.h.bf16 %v6628_v33 }
 0x75e   :  { %7978 = vmatpush3.msra.mxu0 %v6060_v10  ;;  %v6008_v10 = vunpack.c.h.bf16 %v6629_v35 }
 0x75f   :  { %7979 = vmatprep.subr.mxu0 %v6059_v21 }
 0x760   :  { %7980 = vmatpush3.msra.mxu0 %v6059_v21  ;;  %v6007_v21 = vunpack.c.l.bf16 %v6629_v35 }
 0x761   :  { %7981 = vmatprep.subr.mxu0 %v6056_v43 }
 0x762   :  { %7982 = vmatpush3.msra.mxu0 %v6056_v43  ;;  %v5998_v43 = vld [vmem:[#allocation11] sm:$0xff]  }
 0x763   :  { %7983 = vmatprep.subr.mxu0 %v6055_v23  ;;  %v6000_v18 = vunpack.c.h.bf16 %v5998_v43 }
 0x764   :  { %7984 = vmatpush3.msra.mxu0 %v6055_v23  ;;  %v6003_v23 = vunpack.c.l.bf16 %v6628_v33 }
 0x765   :  { %7985 = vmatprep.subr.mxu0 %v6052_v34 }
 0x766   :  { %7986 = vmatpush3.msra.mxu0 %v6052_v34  ;;  %v5999_v34 = vunpack.c.l.bf16 %v5998_v43 }
 0x767   :  { %7987 = vmatprep.subr.mxu0 %v6051_v45 }
 0x768   :  { %7988 = vmatpush3.msra.mxu0 %v6051_v45  ;;  %v6030_v45 = vld [vmem:[#allocation10 + $0x8] sm:$0xff]  }
 0x769   :  { %7989 = vmatprep.subr.mxu0 %v6048_v38 }
 0x76a   :  { %7990 = vmatpush3.msra.mxu0 %v6048_v38  ;;  %v6031_v38 = vunpack.c.l.bf16 %v6030_v45 }
 0x76b   :  { %7991 = vmatprep.subr.mxu0 %v6047_v40 }
 0x76c   :  { %7992 = vmatpush3.msra.mxu0 %v6047_v40  ;;  %v6066_v40 = vld [vmem:[#allocation10 + $0x10] sm:$0xff]  }
 0x76d   :  { %7993 = vmatprep.subr.mxu0 %v6044_v42 }
 0x76e   :  { %7994 = vmatpush3.msra.mxu0 %v6044_v42  ;;  %v6032_v42 = vunpack.c.h.bf16 %v6030_v45 }
 0x76f   :  { %7995 = vmatprep.subr.mxu0 %v6043_v44 }
 0x770   :  { %7996 = vmatpush3.msra.mxu0 %v6043_v44  ;;  %v6067_v44 = vunpack.c.l.bf16 %v6066_v40 }
 0x771   :  { %7997 = vmatprep.subr.mxu0 %v6040_v31 }
 0x772   :  { %7998 = vmatpush3.msra.mxu0 %v6040_v31  ;;  %v6068_v31 = vunpack.c.h.bf16 %v6066_v40 }
 0x773   :  { %7999 = vmatprep.subr.mxu0 %v6039_v46 }
 0x774   :  { %8000 = vmatpush3.msra.mxu0 %v6039_v46  ;;  %v6100_v46 = vunpack.c.h.bf16 %v6648_v30 }
 0x775   :  { %8001 = vmatprep.subr.mxu0 %v6036_v0 }
 0x776   :  { %8002 = vmatpush3.msra.mxu0 %v6036_v0  ;;  %v6099_v0 = vunpack.c.l.bf16 %v6648_v30 }
 0x777   :  { %8003 = vmatprep.subr.mxu0 %v6035_v1 }
 0x778   :  { %8004 = vmatpush3.msra.mxu0 %v6035_v1  ;;  %v6096_v1 = vunpack.c.h.bf16 %v6647_v47  ;;  %v9222_v47 = vmov 0.0  }
 0x808   :  { %v7852_v3 = vpop.f32.mrf.mxu1 }
 0x809   :  { %v2220_v20 = vadd.f32 %v7852_v3, %v9828_v61  ;;  %v6092_v3 = vunpack.c.h.bf16 %v6646_v48 }
 0x80a   :  { %v2200_v5 = vpop.f32.mrf.mxu1 }
 0x80b   :  { %v2219_v25 = vadd.f32 %v2200_v5, %v9830_v7  ;;  %v6633_v7 = vld [vmem:[#allocation11 + $0x30] sm:$0xff]   ;;  %v6645_v5 = vld [vmem:[#allocation11 + $0xa0] sm:$0xff]  }
 0x80c   :  { %v7855_v9 = vpop.f32.mrf.mxu1  ;;  %v6024_v32 = vunpack.c.h.bf16 %v6633_v7  ;;  %v6023_v13 = vunpack.c.l.bf16 %v6633_v7  ;;  %v6655_v7 = vld [vmem:[#allocation11 + $0xf8] sm:$0xff]  }
 0x80d   :  { %v2222_v22 = vadd.f32 %v7855_v9, %v9832_v62  ;;  %v6020_v62 = vunpack.c.h.bf16 %v6632_v58  ;;  %v6091_v9 = vunpack.c.l.bf16 %v6646_v48  ;;  %v6136_v58 = vunpack.c.h.bf16 %v6655_v7 }
 0x80e   :  { %v2210_v15 = vpop.f32.mrf.mxu1 }
 0x80f   :  { %v2221_v26 = vadd.f32 %v2210_v15, %v9834_v39  ;;  %v6016_v39 = vunpack.c.h.bf16 %v6631_v16  ;;  %v6087_v15 = vunpack.c.l.bf16 %v6645_v5  ;;  %v6653_v16 = vld [vmem:[#allocation11 + $0xe8] sm:$0xff]  }
 0x810   :  { %v6127_v11 = vunpack.c.l.bf16 %v6653_v16 }
 0x819   :  { %v7912_v12 = vpop.f32.mrf.mxu0 }
 0x81a   :  { %v2448_v27 = vadd.f32 %v7912_v12, %v2220_v20  ;;  %v6088_v12 = vunpack.c.h.bf16 %v6645_v5 }
 0x81b   :  { %v2428_v17 = vpop.f32.mrf.mxu0 }
 0x81c   :  { %v2447_v29 = vadd.f32 %v2428_v17, %v2219_v25  ;;  %v2452_v53 = vmul.f32 0.01, %v2448_v27  ;;  %v6644_v17 = vld [vmem:[#allocation11 + $0x98] sm:$0xff]  }
 0x81d   :  { %v7915_v24 = vpop.f32.mrf.mxu0  ;;  %v6084_v20 = vunpack.c.h.bf16 %v6644_v17 }
 0x81e   :  { %v2450_v49 = vadd.f32 %v7915_v24, %v2222_v22  ;;  %v2451_v56 = vmul.f32 0.01, %v2447_v29  ;;  %v9848_v60 = vmax.f32 %v2448_v27, %v2452_v53  ;;  %v6083_v22 = vunpack.c.l.bf16 %v6644_v17  ;;  %v6643_v24 = vld [vmem:[#allocation11 + $0x90] sm:$0xff]   ;;  %v6642_v27 = vld [vmem:[#allocation11 + $0x88] sm:$0xff]   ;;  %v3254_v17 = vld [vmem:[%s10258_s8] sm:$0xff]  }
 0x81f   :  { %v2438_v50 = vpop.f32.mrf.mxu0  ;;  %v6080_v25 = vunpack.c.h.bf16 %v6643_v24 }
 0x820   :  { %v2454_v51 = vmul.f32 0.01, %v2450_v49  ;;  %v2449_v52 = vadd.f32 %v2438_v50, %v2221_v26  ;;  %v9852_v61 = vmax.f32 %v2447_v29, %v2451_v56  ;;  %v6079_v26 = vunpack.c.l.bf16 %v6643_v24  ;;  %v6070_v29 = vld [vmem:[#allocation11 + $0x80] sm:$0xff]   ;;  %v6102_v56 = vld [vmem:[#allocation10 + $0x18] sm:$0xff]  }
 0x821   :  { %v6075_v50 = vunpack.c.l.bf16 %v6642_v27  ;;  %v6662_v24 = vld [vmem:[#allocation14 + $0x38] sm:$0xff]  }
 0x822   :  { %v9841_v54 = vmax.f32 %v2450_v49, %v2454_v51  ;;  %v2453_v55 = vmul.f32 0.01, %v2449_v52  ;;  %v6076_v49 = vunpack.c.h.bf16 %v6642_v27  ;;  %v6072_v51 = vunpack.c.h.bf16 %v6070_v29 }
 0x823   :  { %v3441_v27 = vunpack.c.h.bf16 %v3254_v17 }
 0x824   :  { %v9843_v57 = vmax.f32 %v2449_v52, %v2453_v55  ;;  %7916 = vmatprep.subr.mxu1 %v9841_v54  ;;  %8054 = vmatprep.subr.mxu0 %v9841_v54  ;;  %v6071_v52 = vunpack.c.l.bf16 %v6070_v29 }
 0x825   :  { %7917 = vmatpush3.msra.mxu1 %v9841_v54 }
 0x826   :  { %7918 = vmatprep.subr.mxu1 %v9843_v57 }
 0x827   :  { %7919 = vmatpush3.msra.mxu1 %v9843_v57 }
 0x828   :  { %7920 = vmatprep.subr.mxu1 %v9848_v60 }
 0x829   :  { %7921 = vmatpush3.msra.mxu1 %v9848_v60 }
 0x82a   :  { %7922 = vmatprep.subr.mxu1 %v9852_v61 }
 0x82b   :  { %7923 = vmatpush3.msra.mxu1 %v9852_v61 }
 0x82c   :  { %7925 = vmatmul.mubr.msk.f32.vlgmr.msra.gmra.mxu1 %vm2464_vm1, %v5996_v63  ;;  %7927 = vmatprep.subr.mxu1 %v6028_v4  ;;  %v6103_v63 = vunpack.c.l.bf16 %v6102_v56 }
 0x82d   :  { %7928 = vmatpush3.msra.mxu1 %v6028_v4 }
 0x82e   :  { %7929 = vmatprep.subr.mxu1 %v6027_v8 }
 0x82f   :  { %7930 = vmatpush3.msra.mxu1 %v6027_v8 }
 0x830   :  { %7931 = vmatprep.subr.mxu1 %v6024_v32 }
 0x831   :  { %7932 = vmatpush3.msra.mxu1 %v6024_v32  ;;  %v6104_v32 = vunpack.c.h.bf16 %v6102_v56 }
 0x832   :  { %7933 = vmatprep.subr.mxu1 %v6023_v13 }
 0x833   :  { %7934 = vmatpush3.msra.mxu1 %v6023_v13 }
 0x834   :  { %7935 = vmatprep.subr.mxu1 %v6020_v62 }
 0x835   :  { %7936 = vmatpush3.msra.mxu1 %v6020_v62  ;;  %v6654_v62 = vld [vmem:[#allocation11 + $0xf0] sm:$0xff]  }
 0x836   :  { %7937 = vmatprep.subr.mxu1 %v6019_v6 }
 0x837   :  { %7938 = vmatpush3.msra.mxu1 %v6019_v6  ;;  %v6131_v6 = vunpack.c.l.bf16 %v6654_v62 }
 0x838   :  { %7939 = vmatprep.subr.mxu1 %v6016_v39 }
 0x839   :  { %7940 = vmatpush3.msra.mxu1 %v6016_v39  ;;  %v6652_v39 = vld [vmem:[#allocation11 + $0xe0] sm:$0xff]  }
 0x83a   :  { %7941 = vmatprep.subr.mxu1 %v6015_v19 }
 0x83b   :  { %7942 = vmatpush3.msra.mxu1 %v6015_v19  ;;  %v6651_v19 = vld [vmem:[#allocation11 + $0xd8] sm:$0xff]  }
 0x83c   :  { %7943 = vmatprep.subr.mxu1 %v6012_v41  ;;  %v6120_v35 = vunpack.c.h.bf16 %v6651_v19 }
 0x83d   :  { %7944 = vmatpush3.msra.mxu1 %v6012_v41  ;;  %v6123_v41 = vunpack.c.l.bf16 %v6652_v39 }
 0x83e   :  { %7945 = vmatprep.subr.mxu1 %v6011_v36 }
 0x83f   :  { %7946 = vmatpush3.msra.mxu1 %v6011_v36  ;;  %v6650_v36 = vld [vmem:[#allocation11 + $0xd0] sm:$0xff]  }
 0x840   :  { %7947 = vmatprep.subr.mxu1 %v6008_v10  ;;  %v6116_v33 = vunpack.c.h.bf16 %v6650_v36 }
 0x841   :  { %7948 = vmatpush3.msra.mxu1 %v6008_v10  ;;  %v6119_v10 = vunpack.c.l.bf16 %v6651_v19 }
 0x842   :  { %7949 = vmatprep.subr.mxu1 %v6007_v21 }
 0x843   :  { %7950 = vmatpush3.msra.mxu1 %v6007_v21  ;;  %v6115_v21 = vunpack.c.l.bf16 %v6650_v36  ;;  %v6664_v36 = vld [vmem:[#allocation14 + $0x50] sm:$0xff]  }
 0x844   :  { %7951 = vmatprep.subr.mxu1 %v6004_v14 }
 0x845   :  { %7952 = vmatpush3.msra.mxu1 %v6004_v14  ;;  %v6649_v14 = vld [vmem:[#allocation11 + $0xc8] sm:$0xff]  }
 0x846   :  { %7953 = vmatprep.subr.mxu1 %v6003_v23  ;;  %v6112_v43 = vunpack.c.h.bf16 %v6649_v14 }
 0x847   :  { %7954 = vmatpush3.msra.mxu1 %v6003_v23  ;;  %v6111_v23 = vunpack.c.l.bf16 %v6649_v14  ;;  %v6180_v14 = vunpack.c.h.bf16 %v6664_v36 }
 0x848   :  { %7955 = vmatprep.subr.mxu1 %v6000_v18 }
 0x849   :  { %7956 = vmatpush3.msra.mxu1 %v6000_v18  ;;  %v6106_v18 = vld [vmem:[#allocation11 + $0xc0] sm:$0xff]  }
 0x84a   :  { %7957 = vmatprep.subr.mxu1 %v5999_v34  ;;  %v6107_v45 = vunpack.c.l.bf16 %v6106_v18 }
 0x84b   :  { %7958 = vmatpush3.msra.mxu1 %v5999_v34  ;;  %v6108_v34 = vunpack.c.h.bf16 %v6106_v18 }
 0x84c   :  { %7962 = vmatprep.subr.mxu1 %v9841_v54 }
 0x8ec   :  { %v7926_v37 = vpop.f32.mrf.mxu1 }
 0x8ee   :  { %v2537_v28 = vpop.f32.mrf.mxu1 }
 0x8ef   :  { %7959 = vmatprep.mubr.f32.mxu1 %v2537_v28 }
 0x8f0   :  { %7960 = vmatmul.mubr.f32.vlgmr.msra.gmra.mxu1 %v7926_v37  ;;  %v5673_v37 = vld [vmem:[#allocation13] ss:$0 sm:$0xff] }
 0x8f1   :  { %7963 = vmatpush3.msra.mxu1 %v9841_v54  ;;  %7970 = vmatprep.mubr.msk.f32.mxu1 %vm2464_vm1, %v6031_v38 }
 0x8f2   :  { %7964 = vmatprep.subr.mxu1 %v9843_v57 }
 0x8f3   :  { %7965 = vmatpush3.msra.mxu1 %v9843_v57 }
 0x8f4   :  { %7966 = vmatprep.subr.mxu1 %v9848_v60 }
 0x8f5   :  { %7967 = vmatpush3.msra.mxu1 %v9848_v60 }
 0x8f6   :  { %7968 = vmatprep.subr.mxu1 %v9852_v61 }
 0x8f7   :  { %7969 = vmatpush3.msra.mxu1 %v9852_v61 }
 0x8f8   :  { %7971 = vmatmul.mubr.msk.f32.vlgmr.msra.gmra.mxu1 %vm2464_vm1, %v6032_v42  ;;  %8008 = vmatprep.subr.mxu1 %v9841_v54 }
 0x8f9   :  { %8009 = vmatpush3.msra.mxu1 %v9841_v54  ;;  %8016 = vmatprep.mubr.msk.f32.mxu1 %vm2464_vm1, %v6067_v44 }
 0x8fa   :  { %8010 = vmatprep.subr.mxu1 %v9843_v57 }
 0x8fb   :  { %8011 = vmatpush3.msra.mxu1 %v9843_v57 }
 0x8fc   :  { %8012 = vmatprep.subr.mxu1 %v9848_v60 }
 0x8fd   :  { %8013 = vmatpush3.msra.mxu1 %v9848_v60 }
 0x8fe   :  { %8014 = vmatprep.subr.mxu1 %v9852_v61 }
 0x8ff   :  { %8015 = vmatpush3.msra.mxu1 %v9852_v61 }
 0x900   :  { %8017 = vmatmul.mubr.msk.f32.vlgmr.msra.gmra.mxu1 %vm2464_vm1, %v6068_v31  ;;  %8019 = vmatprep.subr.mxu1 %v6100_v46 }
 0x901   :  { %8020 = vmatpush3.msra.mxu1 %v6100_v46 }
 0x902   :  { %8021 = vmatprep.subr.mxu1 %v6099_v0 }
 0x903   :  { %8022 = vmatpush3.msra.mxu1 %v6099_v0 }
 0x904   :  { %8023 = vmatprep.subr.mxu1 %v6096_v1 }
 0x905   :  { %8024 = vmatpush3.msra.mxu1 %v6096_v1 }
 0x906   :  { %8025 = vmatprep.subr.mxu1 %v6095_v2 }
 0x907   :  { %8026 = vmatpush3.msra.mxu1 %v6095_v2 }
 0x908   :  { %8027 = vmatprep.subr.mxu1 %v6092_v3 }
 0x909   :  { %8028 = vmatpush3.msra.mxu1 %v6092_v3 }
 0x90a   :  { %8029 = vmatprep.subr.mxu1 %v6091_v9 }
 0x90b   :  { %8030 = vmatpush3.msra.mxu1 %v6091_v9 }
 0x90c   :  { %8031 = vmatprep.subr.mxu1 %v6088_v12 }
 0x90d   :  { %8032 = vmatpush3.msra.mxu1 %v6088_v12 }
 0x90e   :  { %8033 = vmatprep.subr.mxu1 %v6087_v15 }
 0x90f   :  { %8034 = vmatpush3.msra.mxu1 %v6087_v15 }
 0x910   :  { %8035 = vmatprep.subr.mxu1 %v6084_v20 }
 0x911   :  { %8036 = vmatpush3.msra.mxu1 %v6084_v20 }
 0x912   :  { %8037 = vmatprep.subr.mxu1 %v6083_v22 }
 0x913   :  { %8038 = vmatpush3.msra.mxu1 %v6083_v22 }
 0x914   :  { %8039 = vmatprep.subr.mxu1 %v6080_v25 }
 0x915   :  { %8040 = vmatpush3.msra.mxu1 %v6080_v25  ;;  %v6669_v25 = vld [vmem:[#allocation14 + $0x78] sm:$0xff]  }
 0x916   :  { %8041 = vmatprep.subr.mxu1 %v6079_v26  ;;  %v6200_v29 = vunpack.c.h.bf16 %v6669_v25 }
 0x917   :  { %8042 = vmatpush3.msra.mxu1 %v6079_v26  ;;  %v3255_v26 = vunpack.c.l.bf16 %v3254_v17 }
 0x918   :  { %8043 = vmatprep.subr.mxu1 %v6076_v49 }
 0x919   :  { %8044 = vmatpush3.msra.mxu1 %v6076_v49 }
 0x91a   :  { %8045 = vmatprep.subr.mxu1 %v6075_v50 }
 0x91b   :  { %8046 = vmatpush3.msra.mxu1 %v6075_v50  ;;  %v6168_v50 = vunpack.c.h.bf16 %v6662_v24 }
 0x91c   :  { %8047 = vmatprep.subr.mxu1 %v6072_v51 }
 0x91d   :  { %8048 = vmatpush3.msra.mxu1 %v6072_v51  ;;  %v6661_v51 = vld [vmem:[#allocation14 + $0x30] sm:$0xff]  }
 0x91e   :  { %8049 = vmatprep.subr.mxu1 %v6071_v52  ;;  %v6164_v56 = vunpack.c.h.bf16 %v6661_v51 }
 0x91f   :  { %8050 = vmatpush3.msra.mxu1 %v6071_v52  ;;  %v6668_v52 = vld [vmem:[#allocation14 + $0x70] sm:$0xff]  }
 0x920   :  { %8100 = vmatprep.subr.mxu1 %v9222_v47 }
 0x9b0   :  { %v9879_v53 = vpop.f32.mrf.mxu1 }
 0x9b1   :  { %v2660_v38 = vadd.f32 %v9879_v53, %v5673_v37  ;;  %v6167_v53 = vunpack.c.l.bf16 %v6662_v24  ;;  %v6682_v24 = vld [vmem:[#allocation14 + $0xf0] sm:$0xff]  }
 0x9b2   :  { %v9881_v55 = vpop.f32.mrf.mxu1 }
 0x9b3   :  { %v2659_v40 = vadd.f32 %v5673_v37, %v9881_v55  ;;  %v6199_v55 = vunpack.c.l.bf16 %v6669_v25 }
 0x9b8   :  { %v7972_v59 = vpop.f32.mrf.mxu1 }
 0x9ba   :  { %v2738_v4 = vpop.f32.mrf.mxu1 }
 0x9bb   :  { %8005 = vmatprep.mubr.f32.mxu0 %v2738_v4  ;;  %v6667_v4 = vld [vmem:[#allocation14 + $0x68] sm:$0xff]  }
 0x9bc   :  { %8006 = vmatmul.mubr.f32.vlgmr.msra.gmra.mxu0 %v7972_v59  ;;  %v6196_v59 = vunpack.c.h.bf16 %v6668_v52 }
 0x9bd   :  { %8055 = vmatpush3.msra.mxu0 %v9841_v54  ;;  %8062 = vmatprep.mubr.msk.f32.mxu0 %vm2464_vm1, %v6103_v63  ;;  %v6135_v54 = vunpack.c.l.bf16 %v6655_v7  ;;  %v6660_v63 = vld [vmem:[#allocation14 + $0x28] sm:$0xff]   ;;  %v6163_v7 = vunpack.c.l.bf16 %v6661_v51 }
 0x9be   :  { %8056 = vmatprep.subr.mxu0 %v9843_v57 }
 0x9bf   :  { %8057 = vmatpush3.msra.mxu0 %v9843_v57  ;;  %v6132_v57 = vunpack.c.h.bf16 %v6654_v62  ;;  %v6666_v62 = vld [vmem:[#allocation14 + $0x60] sm:$0xff]  }
 0x9c0   :  { %8058 = vmatprep.subr.mxu0 %v9848_v60  ;;  %v8018_v8 = vpop.f32.mrf.mxu1 }
 0x9c1   :  { %8059 = vmatpush3.msra.mxu0 %v9848_v60  ;;  %v6128_v60 = vunpack.c.h.bf16 %v6653_v16 }
 0x9c2   :  { %8060 = vmatprep.subr.mxu0 %v9852_v61  ;;  %v2934_v13 = vpop.f32.mrf.mxu1 }
 0x9c3   :  { %8061 = vmatpush3.msra.mxu0 %v9852_v61  ;;  %8051 = vmatprep.mubr.f32.mxu1 %v2934_v13  ;;  %v6124_v61 = vunpack.c.h.bf16 %v6652_v39  ;;  %v6659_v13 = vld [vmem:[#allocation14 + $0x20] sm:$0xff]   ;;  %v6665_v39 = vld [vmem:[#allocation14 + $0x58] sm:$0xff]  }
 0x9c4   :  { %8063 = vmatmul.mubr.msk.f32.vlgmr.msra.gmra.mxu0 %vm2464_vm1, %v6104_v32  ;;  %8052 = vmatmul.mubr.f32.vlgmr.msra.gmra.mxu1 %v8018_v8  ;;  %v6195_v8 = vunpack.c.l.bf16 %v6668_v52  ;;  %v6160_v32 = vunpack.c.h.bf16 %v6660_v63  ;;  %v6156_v16 = vunpack.c.h.bf16 %v6659_v13  ;;  %v6259_v52 = vunpack.c.l.bf16 %v6682_v24 }
 0x9c5   :  { %8065 = vmatprep.subr.mxu0 %v6136_v58  ;;  %8104 = vmatprep.mubr.msk.f32.mxu1 %vm9223_vm2, %v9222_v47 }
 0x9c6   :  { %8066 = vmatpush3.msra.mxu0 %v6136_v58  ;;  %v6192_v58 = vunpack.c.h.bf16 %v6667_v4 }
 0x9c7   :  { %8067 = vmatprep.subr.mxu0 %v6135_v54 }
 0x9c8   :  { %8068 = vmatpush3.msra.mxu0 %v6135_v54  ;;  %v6159_v54 = vunpack.c.l.bf16 %v6660_v63 }
 0x9c9   :  { %8069 = vmatprep.subr.mxu0 %v6132_v57 }
 0x9ca   :  { %8070 = vmatpush3.msra.mxu0 %v6132_v57  ;;  %v6191_v57 = vunpack.c.l.bf16 %v6667_v4 }
 0x9cb   :  { %8071 = vmatprep.subr.mxu0 %v6131_v6 }
 0x9cc   :  { %8072 = vmatpush3.msra.mxu0 %v6131_v6  ;;  %v6188_v6 = vunpack.c.h.bf16 %v6666_v62 }
 0x9cd   :  { %8073 = vmatprep.subr.mxu0 %v6128_v60 }
 0x9ce   :  { %8074 = vmatpush3.msra.mxu0 %v6128_v60  ;;  %v6658_v60 = vld [vmem:[#allocation14 + $0x18] sm:$0xff]  }
 0x9cf   :  { %8075 = vmatprep.subr.mxu0 %v6127_v11  ;;  %v6152_v19 = vunpack.c.h.bf16 %v6658_v60 }
 0x9d0   :  { %8076 = vmatpush3.msra.mxu0 %v6127_v11  ;;  %v6155_v11 = vunpack.c.l.bf16 %v6659_v13 }
 0x9d1   :  { %8077 = vmatprep.subr.mxu0 %v6124_v61 }
 0x9d2   :  { %8078 = vmatpush3.msra.mxu0 %v6124_v61  ;;  %v6187_v61 = vunpack.c.l.bf16 %v6666_v62 }
 0x9d3   :  { %8079 = vmatprep.subr.mxu0 %v6123_v41 }
 0x9d4   :  { %8080 = vmatpush3.msra.mxu0 %v6123_v41  ;;  %v6184_v41 = vunpack.c.h.bf16 %v6665_v39 }
 0x9d5   :  { %8081 = vmatprep.subr.mxu0 %v6120_v35 }
 0x9d6   :  { %8082 = vmatpush3.msra.mxu0 %v6120_v35  ;;  %v6657_v35 = vld [vmem:[#allocation14 + $0x10] sm:$0xff]  }
 0x9d7   :  { %8083 = vmatprep.subr.mxu0 %v6119_v10  ;;  %v6147_v18 = vunpack.c.l.bf16 %v6657_v35 }
 0x9d8   :  { %8084 = vmatpush3.msra.mxu0 %v6119_v10  ;;  %v6151_v10 = vunpack.c.l.bf16 %v6658_v60 }
 0x9d9   :  { %8085 = vmatprep.subr.mxu0 %v6116_v33 }
 0x9da   :  { %8086 = vmatpush3.msra.mxu0 %v6116_v33  ;;  %v6183_v33 = vunpack.c.l.bf16 %v6665_v39 }
 0x9db   :  { %8087 = vmatprep.subr.mxu0 %v6115_v21 }
 0x9dc   :  { %8088 = vmatpush3.msra.mxu0 %v6115_v21  ;;  %v6148_v21 = vunpack.c.h.bf16 %v6657_v35 }
 0x9dd   :  { %8089 = vmatprep.subr.mxu0 %v6112_v43 }
 0x9de   :  { %8090 = vmatpush3.msra.mxu0 %v6112_v43  ;;  %v6656_v43 = vld [vmem:[#allocation14 + $0x8] sm:$0xff]  }
 0x9df   :  { %8091 = vmatprep.subr.mxu0 %v6111_v23 }
 0x9e0   :  { %8092 = vmatpush3.msra.mxu0 %v6111_v23  ;;  %v6663_v23 = vld [vmem:[#allocation14 + $0x48] sm:$0xff]  }
 0x9e1   :  { %8093 = vmatprep.subr.mxu0 %v6108_v34  ;;  %v6176_v37 = vunpack.c.h.bf16 %v6663_v23 }
 0x9e2   :  { %8094 = vmatpush3.msra.mxu0 %v6108_v34  ;;  %v6179_v34 = vunpack.c.l.bf16 %v6664_v36 }
 0x9e3   :  { %8095 = vmatprep.subr.mxu0 %v6107_v45 }
 0x9e4   :  { %8096 = vmatpush3.msra.mxu0 %v6107_v45  ;;  %v6144_v45 = vunpack.c.h.bf16 %v6656_v43 }
 0x9e5   :  { %8142 = vmatprep.subr.mxu0 %v9222_v47 }
 0xa7c   :  { %v8007_v28 = vpop.f32.mrf.mxu0 }
 0xa7d   :  { %v2856_v42 = vadd.f32 %v8007_v28, %v2660_v38  ;;  %v6138_v38 = vld [vmem:[#allocation14] sm:$0xff]  }
 0xa7e   :  { %v2846_v44 = vpop.f32.mrf.mxu0  ;;  %v6170_v28 = vld [vmem:[#allocation14 + $0x40] sm:$0xff]  }
 0xa7f   :  { %v2855_v30 = vadd.f32 %v2846_v44, %v2659_v40  ;;  %v6143_v40 = vunpack.c.l.bf16 %v6656_v43  ;;  %v6140_v44 = vunpack.c.h.bf16 %v6138_v38  ;;  %v6202_v43 = vld [vmem:[#allocation14 + $0x80] sm:$0xff]  }
 0xa84   :  { %v8064_v31 = vpop.f32.mrf.mxu0  ;;  %v8053_v0 = vpop.f32.mrf.mxu1 }
 0xa85   :  { %v3052_v48 = vadd.f32 %v8053_v0, %v2856_v42  ;;  %v6175_v42 = vunpack.c.l.bf16 %v6663_v23  ;;  %v5684_v0 = vld [vmem:[%s10258_s8 + $0x8] sm:$0xff]  }
 0xa86   :  { %v3130_v46 = vpop.f32.mrf.mxu0  ;;  %v3042_v1 = vpop.f32.mrf.mxu1  ;;  %v6234_v23 = vld [vmem:[#allocation14 + $0xc0] sm:$0xff]  }
 0xa87   :  { %8097 = vmatprep.mubr.f32.mxu0 %v3130_v46  ;;  %v3051_v3 = vadd.f32 %v3042_v1, %v2855_v30  ;;  %v6172_v30 = vunpack.c.h.bf16 %v6170_v28  ;;  %v6171_v46 = vunpack.c.l.bf16 %v6170_v28 }
 0xa88   :  { %8098 = vmatmul.mubr.f32.vlgmr.msra.gmra.mxu0 %v8064_v31  ;;  %v6139_v31 = vunpack.c.l.bf16 %v6138_v38  ;;  %v5681_v38 = vld [vmem:[#allocation16] ss:$0 sm:$0xff] }
 0xa89   :  { %8146 = vmatprep.mubr.msk.f32.mxu0 %vm9223_vm2, %v9222_v47 }
 0xb48   :  { %v8099_v2 = vpop.f32.mrf.mxu0 }
 0xb49   :  { %v3248_v5 = vadd.f32 %v8099_v2, %v3052_v48  ;;  %v6676_v2 = vld [vmem:[#allocation14 + $0xb8] sm:$0xff]  }
 0xb4a   :  { %v3238_v9 = vpop.f32.mrf.mxu0  ;;  %v6232_v17 = vunpack.c.h.bf16 %v6676_v2  ;;  %v6231_v25 = vunpack.c.l.bf16 %v6676_v2 }
 0xb4b   :  { %v3250_v12 = vmul.f32 0.01, %v3248_v5  ;;  %v3247_v15 = vadd.f32 %v3238_v9, %v3051_v3  ;;  %v6683_v3 = vld [vmem:[#allocation14 + $0xf8] sm:$0xff]  }
 0xb4d   :  { %v9901_v20 = vmax.f32 %v3248_v5, %v3250_v12  ;;  %v3249_v22 = vmul.f32 0.01, %v3247_v15  ;;  %v3621_v12 = vunpack.c.l.bf16 %v5684_v0 }
 0xb4f   :  { %v9903_v49 = vmax.f32 %v3247_v15, %v3249_v22  ;;  %8101 = vmatpush3.msra.mxu1 %v9901_v20  ;;  %8143 = vmatpush3.msra.mxu0 %v9901_v20  ;;  %v3801_v15 = vunpack.c.h.bf16 %v5684_v0  ;;  %v6264_v22 = vunpack.c.h.bf16 %v6683_v3 }
 0xb50   :  { %8102 = vmatprep.subr.mxu1 %v9222_v47  ;;  %8144 = vmatprep.subr.mxu0 %v9222_v47 }
 0xb51   :  { %8103 = vmatpush3.msra.mxu1 %v9903_v49  ;;  %8145 = vmatpush3.msra.mxu0 %v9903_v49 }
 0xb52   :  { %8105 = vmatmul.mubr.msk.f32.vlgmr.msra.gmra.mxu1 %vm3256_vm3, %v3255_v26  ;;  %8147 = vmatmul.mubr.msk.f32.vlgmr.msra.gmra.mxu0 %vm3256_vm3, %v3441_v27  ;;  %v6263_v26 = vunpack.c.l.bf16 %v6683_v3 }
 0xb53   :  { %8107 = vmatprep.subr.mxu1 %v9222_v47  ;;  %8149 = vmatprep.subr.mxu0 %v9222_v47 }
 0xb54   :  { %8108 = vmatpush3.msra.mxu1 %v6168_v50  ;;  %8150 = vmatpush3.msra.mxu0 %v6200_v29  ;;  %v6674_v50 = vld [vmem:[#allocation14 + $0xa8] sm:$0xff]  }
 0xb55   :  { %8109 = vmatprep.subr.mxu1 %v9222_v47  ;;  %8151 = vmatprep.subr.mxu0 %v9222_v47  ;;  %v6681_v29 = vld [vmem:[#allocation14 + $0xe8] sm:$0xff]   ;;  %v6223_v63 = vunpack.c.l.bf16 %v6674_v50 }
 0xb56   :  { %8110 = vmatpush3.msra.mxu1 %v6167_v53  ;;  %8152 = vmatpush3.msra.mxu0 %v6199_v55  ;;  %v6224_v53 = vunpack.c.h.bf16 %v6674_v50  ;;  %v6256_v55 = vunpack.c.h.bf16 %v6681_v29  ;;  %v6255_v4 = vunpack.c.l.bf16 %v6681_v29 }
 0xb57   :  { %8111 = vmatprep.subr.mxu1 %v9222_v47  ;;  %8153 = vmatprep.subr.mxu0 %v9222_v47 }
 0xb58   :  { %8112 = vmatpush3.msra.mxu1 %v6164_v56  ;;  %8154 = vmatpush3.msra.mxu0 %v6196_v59  ;;  %v6673_v56 = vld [vmem:[#allocation14 + $0xa0] sm:$0xff]  }
 0xb59   :  { %8113 = vmatprep.subr.mxu1 %v9222_v47  ;;  %8155 = vmatprep.subr.mxu0 %v9222_v47  ;;  %v6680_v59 = vld [vmem:[#allocation14 + $0xe0] sm:$0xff]   ;;  %v6219_v13 = vunpack.c.l.bf16 %v6673_v56 }
 0xb5a   :  { %8114 = vmatpush3.msra.mxu1 %v6163_v7  ;;  %8156 = vmatpush3.msra.mxu0 %v6195_v8  ;;  %v6220_v7 = vunpack.c.h.bf16 %v6673_v56  ;;  %v6252_v8 = vunpack.c.h.bf16 %v6680_v59  ;;  %v6251_v62 = vunpack.c.l.bf16 %v6680_v59 }
 0xb5b   :  { %8115 = vmatprep.subr.mxu1 %v9222_v47  ;;  %8157 = vmatprep.subr.mxu0 %v9222_v47 }
 0xb5c   :  { %8116 = vmatpush3.msra.mxu1 %v6160_v32  ;;  %8158 = vmatpush3.msra.mxu0 %v6192_v58  ;;  %v6672_v32 = vld [vmem:[#allocation14 + $0x98] sm:$0xff]  }
 0xb5d   :  { %8117 = vmatprep.subr.mxu1 %v9222_v47  ;;  %8159 = vmatprep.subr.mxu0 %v9222_v47  ;;  %v6679_v58 = vld [vmem:[#allocation14 + $0xd8] sm:$0xff]   ;;  %v6215_v60 = vunpack.c.l.bf16 %v6672_v32 }
 0xb5e   :  { %8118 = vmatpush3.msra.mxu1 %v6159_v54  ;;  %8160 = vmatpush3.msra.mxu0 %v6191_v57  ;;  %v6216_v54 = vunpack.c.h.bf16 %v6672_v32  ;;  %v6248_v57 = vunpack.c.h.bf16 %v6679_v58  ;;  %v6247_v39 = vunpack.c.l.bf16 %v6679_v58 }
 0xb5f   :  { %8119 = vmatprep.subr.mxu1 %v9222_v47  ;;  %8161 = vmatprep.subr.mxu0 %v9222_v47 }
 0xb60   :  { %8120 = vmatpush3.msra.mxu1 %v6156_v16  ;;  %8162 = vmatpush3.msra.mxu0 %v6188_v6  ;;  %v6671_v16 = vld [vmem:[#allocation14 + $0x90] sm:$0xff]  }
 0xb61   :  { %8121 = vmatprep.subr.mxu1 %v9222_v47  ;;  %8163 = vmatprep.subr.mxu0 %v9222_v47  ;;  %v6678_v6 = vld [vmem:[#allocation14 + $0xd0] sm:$0xff]   ;;  %v6211_v35 = vunpack.c.l.bf16 %v6671_v16 }
 0xb62   :  { %8122 = vmatpush3.msra.mxu1 %v6155_v11  ;;  %8164 = vmatpush3.msra.mxu0 %v6187_v61  ;;  %v6212_v11 = vunpack.c.h.bf16 %v6671_v16  ;;  %v6244_v61 = vunpack.c.h.bf16 %v6678_v6  ;;  %v6243_v36 = vunpack.c.l.bf16 %v6678_v6 }
 0xb63   :  { %8123 = vmatprep.subr.mxu1 %v9222_v47  ;;  %8165 = vmatprep.subr.mxu0 %v9222_v47 }
 0xb64   :  { %8124 = vmatpush3.msra.mxu1 %v6152_v19  ;;  %8166 = vmatpush3.msra.mxu0 %v6184_v41  ;;  %v6670_v19 = vld [vmem:[#allocation14 + $0x88] sm:$0xff]  }
 0xb65   :  { %8125 = vmatprep.subr.mxu1 %v9222_v47  ;;  %8167 = vmatprep.subr.mxu0 %v9222_v47  ;;  %v6677_v41 = vld [vmem:[#allocation14 + $0xc8] sm:$0xff]  }
 0xb66   :  { %8126 = vmatpush3.msra.mxu1 %v6151_v10  ;;  %8168 = vmatpush3.msra.mxu0 %v6183_v33  ;;  %v6208_v10 = vunpack.c.h.bf16 %v6670_v19  ;;  %v6240_v33 = vunpack.c.h.bf16 %v6677_v41 }
 0xb67   :  { %8127 = vmatprep.subr.mxu1 %v9222_v47  ;;  %8169 = vmatprep.subr.mxu0 %v9222_v47 }
 0xb68   :  { %8128 = vmatpush3.msra.mxu1 %v6148_v21  ;;  %8170 = vmatpush3.msra.mxu0 %v6180_v14  ;;  %v6207_v21 = vunpack.c.l.bf16 %v6670_v19  ;;  %v6239_v14 = vunpack.c.l.bf16 %v6677_v41 }
 0xb69   :  { %8129 = vmatprep.subr.mxu1 %v9222_v47  ;;  %8171 = vmatprep.subr.mxu0 %v9222_v47 }
 0xb6a   :  { %8130 = vmatpush3.msra.mxu1 %v6147_v18  ;;  %8172 = vmatpush3.msra.mxu0 %v6179_v34  ;;  %v6204_v18 = vunpack.c.h.bf16 %v6202_v43  ;;  %v6236_v34 = vunpack.c.h.bf16 %v6234_v23 }
 0xb6b   :  { %8131 = vmatprep.subr.mxu1 %v9222_v47  ;;  %8173 = vmatprep.subr.mxu0 %v9222_v47 }
 0xb6c   :  { %8132 = vmatpush3.msra.mxu1 %v6144_v45  ;;  %8174 = vmatpush3.msra.mxu0 %v6176_v37  ;;  %v6203_v45 = vunpack.c.l.bf16 %v6202_v43  ;;  %v6235_v37 = vunpack.c.l.bf16 %v6234_v23  ;;  %v6684_v43 = vld [vmem:[#allocation19 + $0x8] sm:$0xff]  }
 0xb6d   :  { %8133 = vmatprep.subr.mxu1 %v9222_v47  ;;  %8175 = vmatprep.subr.mxu0 %v9222_v47  ;;  %v6691_v23 = vld [vmem:[#allocation19 + $0x48] sm:$0xff]  }
 0xb6e   :  { %8134 = vmatpush3.msra.mxu1 %v6143_v40  ;;  %8176 = vmatpush3.msra.mxu0 %v6175_v42 }
 0xb6f   :  { %8135 = vmatprep.subr.mxu1 %v9222_v47  ;;  %8177 = vmatprep.subr.mxu0 %v9222_v47 }
 0xb70   :  { %8136 = vmatpush3.msra.mxu1 %v6140_v44  ;;  %8178 = vmatpush3.msra.mxu0 %v6172_v30 }
 0xb71   :  { %8137 = vmatprep.subr.mxu1 %v9222_v47  ;;  %8179 = vmatprep.subr.mxu0 %v9222_v47 }
 0xb72   :  { %8138 = vmatpush3.msra.mxu1 %v6139_v31  ;;  %8180 = vmatpush3.msra.mxu0 %v6171_v46 }
 0xb73   :  { %8139 = vmatprep.mubr.msk.f32.mxu1 %vm9223_vm2, %v9222_v47  ;;  %8181 = vmatprep.mubr.msk.f32.mxu0 %vm9223_vm2, %v9222_v47 }
 0xb74   :  { %8184 = vmatprep.subr.mxu1 %v9222_v47  ;;  %8226 = vmatprep.subr.mxu0 %v9222_v47 }
 0xc12   :  { %v3326_v1 = vpop.f32.mrf.mxu1  ;;  %v3511_v48 = vpop.f32.mrf.mxu0 }
 0xc13   :  { %8140 = vmatmul.mubr.f32.vlgmr.msra.gmra.mxu1 %v3326_v1  ;;  %8182 = vmatmul.mubr.f32.vlgmr.msra.gmra.mxu0 %v3511_v48 }
 0xc14   :  { %8185 = vmatpush3.msra.mxu1 %v9901_v20  ;;  %8227 = vmatpush3.msra.mxu0 %v9901_v20  ;;  %v8106_v5 = vpop.f32.mrf.mxu1  ;;  %v8148_v9 = vpop.f32.mrf.mxu0  ;;  %v6675_v20 = vld [vmem:[#allocation14 + $0xb0] sm:$0xff]  }
 0xc15   :  { %8186 = vmatprep.subr.mxu1 %v9222_v47  ;;  %8228 = vmatprep.subr.mxu0 %v9222_v47  ;;  %v6228_v27 = vunpack.c.h.bf16 %v6675_v20  ;;  %v6227_v51 = vunpack.c.l.bf16 %v6675_v20 }
 0xc16   :  { %8187 = vmatpush3.msra.mxu1 %v9903_v49  ;;  %8229 = vmatpush3.msra.mxu0 %v9903_v49  ;;  %v6260_v49 = vunpack.c.h.bf16 %v6682_v24  ;;  %v6690_v24 = vld [vmem:[#allocation19 + $0x38] sm:$0xff]  }
 0xc17   :  { %8188 = vmatprep.mubr.msk.f32.mxu1 %vm9223_vm2, %v9222_v47  ;;  %8230 = vmatprep.mubr.msk.f32.mxu0 %vm9223_vm2, %v9222_v47  ;;  %v6296_v50 = vunpack.c.h.bf16 %v6690_v24 }
 0xc18   :  { %8189 = vmatmul.mubr.msk.f32.vlgmr.msra.gmra.mxu1 %vm3256_vm3, %v3621_v12  ;;  %8231 = vmatmul.mubr.msk.f32.vlgmr.msra.gmra.mxu0 %vm3256_vm3, %v3801_v15 }
 0xc19   :  { %8191 = vmatprep.subr.mxu1 %v9222_v47  ;;  %8233 = vmatprep.subr.mxu0 %v9222_v47 }
 0xc1a   :  { %8192 = vmatpush3.msra.mxu1 %v6232_v17  ;;  %8234 = vmatpush3.msra.mxu0 %v6264_v22  ;;  %v3982_v17 = vld [vmem:[#allocation17] sm:$0x3]  ;;  %v4168_v22 = vld [vmem:[#allocation17 + $0x2] sm:$0x3] }
 0xc1b   :  { %8193 = vmatprep.subr.mxu1 %v9222_v47  ;;  %8235 = vmatprep.subr.mxu0 %v9222_v47 }
 0xc1c   :  { %8194 = vmatpush3.msra.mxu1 %v6231_v25  ;;  %8236 = vmatpush3.msra.mxu0 %v6263_v26  ;;  %v6697_v25 = vld [vmem:[#allocation19 + $0x78] sm:$0xff]   ;;  %v3983_v26 = vunpack.c.l.bf16 %v3982_v17 }
 0xc1d   :  { %8195 = vmatprep.subr.mxu1 %v9222_v47  ;;  %8237 = vmatprep.subr.mxu0 %v9222_v47  ;;  %v6328_v29 = vunpack.c.h.bf16 %v6697_v25 }
 0xc1e   :  { %8196 = vmatpush3.msra.mxu1 %v6228_v27  ;;  %8238 = vmatpush3.msra.mxu0 %v6260_v49  ;;  %v4169_v27 = vunpack.c.l.bf16 %v4168_v22 }
 0xc1f   :  { %8197 = vmatprep.subr.mxu1 %v9222_v47  ;;  %8239 = vmatprep.subr.mxu0 %v9222_v47 }
 0xc20   :  { %8198 = vmatpush3.msra.mxu1 %v6227_v51  ;;  %8240 = vmatpush3.msra.mxu0 %v6259_v52  ;;  %v6689_v51 = vld [vmem:[#allocation19 + $0x30] sm:$0xff]  }
 0xc21   :  { %8199 = vmatprep.subr.mxu1 %v9222_v47  ;;  %8241 = vmatprep.subr.mxu0 %v9222_v47  ;;  %v6696_v52 = vld [vmem:[#allocation19 + $0x70] sm:$0xff]   ;;  %v6292_v56 = vunpack.c.h.bf16 %v6689_v51 }
 0xc22   :  { %8200 = vmatpush3.msra.mxu1 %v6224_v53  ;;  %8242 = vmatpush3.msra.mxu0 %v6256_v55  ;;  %v6295_v53 = vunpack.c.l.bf16 %v6690_v24  ;;  %v6327_v55 = vunpack.c.l.bf16 %v6697_v25  ;;  %v6324_v59 = vunpack.c.h.bf16 %v6696_v52  ;;  %v6703_v24 = vld [vmem:[#allocation19 + $0xb0] sm:$0xff]  }
 0xc23   :  { %8201 = vmatprep.subr.mxu1 %v9222_v47  ;;  %8243 = vmatprep.subr.mxu0 %v9222_v47  ;;  %v6710_v25 = vld [vmem:[#allocation19 + $0xf0] sm:$0xff]  }
 0xc24   :  { %8202 = vmatpush3.msra.mxu1 %v6223_v63  ;;  %8244 = vmatpush3.msra.mxu0 %v6255_v4  ;;  %v6688_v63 = vld [vmem:[#allocation19 + $0x28] sm:$0xff]  }
 0xc25   :  { %8203 = vmatprep.subr.mxu1 %v9222_v47  ;;  %8245 = vmatprep.subr.mxu0 %v9222_v47  ;;  %v6695_v4 = vld [vmem:[#allocation19 + $0x68] sm:$0xff]   ;;  %v6288_v32 = vunpack.c.h.bf16 %v6688_v63 }
 0xc26   :  { %8204 = vmatpush3.msra.mxu1 %v6220_v7  ;;  %8246 = vmatpush3.msra.mxu0 %v6252_v8  ;;  %v6291_v7 = vunpack.c.l.bf16 %v6689_v51  ;;  %v6323_v8 = vunpack.c.l.bf16 %v6696_v52  ;;  %v6320_v58 = vunpack.c.h.bf16 %v6695_v4  ;;  %v6709_v51 = vld [vmem:[#allocation19 + $0xe8] sm:$0xff]   ;;  %v6355_v52 = vunpack.c.l.bf16 %v6703_v24 }
 0xc27   :  { %8205 = vmatprep.subr.mxu1 %v9222_v47  ;;  %8247 = vmatprep.subr.mxu0 %v9222_v47 }
 0xc28   :  { %8206 = vmatpush3.msra.mxu1 %v6219_v13  ;;  %8248 = vmatpush3.msra.mxu0 %v6251_v62  ;;  %v6687_v13 = vld [vmem:[#allocation19 + $0x20] sm:$0xff]  }
 0xc29   :  { %8207 = vmatprep.subr.mxu1 %v9222_v47  ;;  %8249 = vmatprep.subr.mxu0 %v9222_v47  ;;  %v6694_v62 = vld [vmem:[#allocation19 + $0x60] sm:$0xff]   ;;  %v6284_v16 = vunpack.c.h.bf16 %v6687_v13 }
 0xc2a   :  { %8208 = vmatpush3.msra.mxu1 %v6216_v54  ;;  %8250 = vmatpush3.msra.mxu0 %v6248_v57  ;;  %v6287_v54 = vunpack.c.l.bf16 %v6688_v63  ;;  %v6319_v57 = vunpack.c.l.bf16 %v6695_v4  ;;  %v6316_v6 = vunpack.c.h.bf16 %v6694_v62  ;;  %v6708_v63 = vld [vmem:[#allocation19 + $0xe0] sm:$0xff]  }
 0xc2b   :  { %8209 = vmatprep.subr.mxu1 %v9222_v47  ;;  %8251 = vmatprep.subr.mxu0 %v9222_v47 }
 0xc2c   :  { %8210 = vmatpush3.msra.mxu1 %v6215_v60  ;;  %8252 = vmatpush3.msra.mxu0 %v6247_v39  ;;  %v6686_v60 = vld [vmem:[#allocation19 + $0x18] sm:$0xff]  }
 0xc2d   :  { %8211 = vmatprep.subr.mxu1 %v9222_v47  ;;  %8253 = vmatprep.subr.mxu0 %v9222_v47  ;;  %v6693_v39 = vld [vmem:[#allocation19 + $0x58] sm:$0xff]   ;;  %v6280_v19 = vunpack.c.h.bf16 %v6686_v60 }
 0xc2e   :  { %8212 = vmatpush3.msra.mxu1 %v6212_v11  ;;  %8254 = vmatpush3.msra.mxu0 %v6244_v61  ;;  %v6283_v11 = vunpack.c.l.bf16 %v6687_v13  ;;  %v6315_v61 = vunpack.c.l.bf16 %v6694_v62  ;;  %v6312_v41 = vunpack.c.h.bf16 %v6693_v39  ;;  %v6707_v13 = vld [vmem:[#allocation19 + $0xd8] sm:$0xff]  }
 0xc2f   :  { %8213 = vmatprep.subr.mxu1 %v9222_v47  ;;  %8255 = vmatprep.subr.mxu0 %v9222_v47 }
 0xc30   :  { %8214 = vmatpush3.msra.mxu1 %v6211_v35  ;;  %8256 = vmatpush3.msra.mxu0 %v6243_v36  ;;  %v6685_v35 = vld [vmem:[#allocation19 + $0x10] sm:$0xff]  }
 0xc31   :  { %8215 = vmatprep.subr.mxu1 %v9222_v47  ;;  %8257 = vmatprep.subr.mxu0 %v9222_v47  ;;  %v6692_v36 = vld [vmem:[#allocation19 + $0x50] sm:$0xff]  }
 0xc32   :  { %8216 = vmatpush3.msra.mxu1 %v6208_v10  ;;  %8258 = vmatpush3.msra.mxu0 %v6240_v33  ;;  %v6279_v10 = vunpack.c.l.bf16 %v6686_v60  ;;  %v6311_v33 = vunpack.c.l.bf16 %v6693_v39  ;;  %v6706_v60 = vld [vmem:[#allocation19 + $0xd0] sm:$0xff]  }
 0xc33   :  { %8217 = vmatprep.subr.mxu1 %v9222_v47  ;;  %8259 = vmatprep.subr.mxu0 %v9222_v47 }
 0xc34   :  { %8223 = vmatprep.mubr.msk.f32.mxu1 %vm9223_vm2, %v9222_v47  ;;  %8265 = vmatprep.mubr.msk.f32.mxu0 %vm9223_vm2, %v9222_v47 }
 0xc35   :  { %8218 = vmatpush3.msra.mxu1 %v6207_v21  ;;  %8260 = vmatpush3.msra.mxu0 %v6239_v14  ;;  %v6276_v21 = vunpack.c.h.bf16 %v6685_v35  ;;  %v6308_v14 = vunpack.c.h.bf16 %v6692_v36 }
 0xc36   :  { %8219 = vmatprep.subr.mxu1 %v9222_v47  ;;  %8261 = vmatprep.subr.mxu0 %v9222_v47 }
 0xc37   :  { %8220 = vmatpush3.msra.mxu1 %v6204_v18  ;;  %8262 = vmatpush3.msra.mxu0 %v6236_v34  ;;  %v6275_v18 = vunpack.c.l.bf16 %v6685_v35  ;;  %v6307_v34 = vunpack.c.l.bf16 %v6692_v36  ;;  %v6705_v35 = vld [vmem:[#allocation19 + $0xc8] sm:$0xff]  }
 0xc38   :  { %8221 = vmatprep.subr.mxu1 %v9222_v47  ;;  %8263 = vmatprep.subr.mxu0 %v9222_v47 }
 0xc39   :  { %8222 = vmatpush3.msra.mxu1 %v6203_v45  ;;  %8264 = vmatpush3.msra.mxu0 %v6235_v37  ;;  %v6272_v45 = vunpack.c.h.bf16 %v6684_v43  ;;  %v6304_v37 = vunpack.c.h.bf16 %v6691_v23 }
 0xc3a   :  { %8268 = vmatprep.subr.mxu1 %v9222_v47  ;;  %8308 = vmatprep.subr.mxu0 %v9222_v47 }
 0xcd3   :  { %v3428_v28 = vpop.f32.mrf.mxu1  ;;  %v3614_v40 = vpop.f32.mrf.mxu0 }
 0xcd4   :  { %v3438_v42 = vadd.f32 %v5681_v38, %v3428_v28  ;;  %v6266_v38 = vld [vmem:[#allocation19] sm:$0xff]  }
 0xcd5   :  { %v8141_v44 = vpop.f32.mrf.mxu1  ;;  %v8183_v30 = vpop.f32.mrf.mxu0  ;;  %v6298_v28 = vld [vmem:[#allocation19 + $0x40] sm:$0xff]  }
 0xcd6   :  { %v3618_v31 = vadd.f32 %v3614_v40, %v3438_v42  ;;  %v6271_v40 = vunpack.c.l.bf16 %v6684_v43  ;;  %v6303_v42 = vunpack.c.l.bf16 %v6691_v23  ;;  %v6268_v44 = vunpack.c.h.bf16 %v6266_v38  ;;  %v6330_v23 = vld [vmem:[#allocation19 + $0x80] sm:$0xff]  }
 0xcd7   :  { %v6300_v30 = vunpack.c.h.bf16 %v6298_v28  ;;  %v6367_v43 = vunpack.c.l.bf16 %v6705_v35 }
 0xcd8   :  { %v3691_v46 = vpop.f32.mrf.mxu1  ;;  %v3871_v0 = vpop.f32.mrf.mxu0 }
 0xcd9   :  { %8224 = vmatmul.mubr.f32.vlgmr.msra.gmra.mxu1 %v3691_v46  ;;  %8266 = vmatmul.mubr.f32.vlgmr.msra.gmra.mxu0 %v3871_v0  ;;  %v6299_v46 = vunpack.c.l.bf16 %v6298_v28  ;;  %v4348_v0 = vld [vmem:[#allocation17 + $0x4] sm:$0x3]  ;;  %v5689_v28 = vld [vmem:[#allocation20] ss:$0 sm:$0xff] }
 0xcda   :  { %v8190_v1 = vpop.f32.mrf.mxu1  ;;  %v8232_v48 = vpop.f32.mrf.mxu0  ;;  %8270 = vmatprep.mubr.msk.f32.mxu1 %vm9223_vm2, %v9222_v47  ;;  %8310 = vmatprep.mubr.msk.f32.mxu0 %vm9223_vm2, %v9222_v47 }
 0xcdb   :  { %v4528_v1 = vld [vmem:[#allocation17 + $0x6] sm:$0x3] }
 0xcdc   :  { %v6704_v48 = vld [vmem:[#allocation19 + $0xb8] sm:$0xff]  }
 0xcdd   :  { %v6360_v22 = vunpack.c.h.bf16 %v6704_v48 }
 0xd99   :  { %v3794_v2 = vpop.f32.mrf.mxu1  ;;  %v3974_v3 = vpop.f32.mrf.mxu0 }
 0xd9a   :  { %v3798_v5 = vadd.f32 %v3794_v2, %v3618_v31  ;;  %v6267_v31 = vunpack.c.l.bf16 %v6266_v38  ;;  %v6711_v2 = vld [vmem:[#allocation19 + $0xf8] sm:$0xff]  }
 0xd9b   :  { %v8225_v9 = vpop.f32.mrf.mxu1  ;;  %v8267_v12 = vpop.f32.mrf.mxu0 }
 0xd9c   :  { %v3978_v15 = vadd.f32 %v3974_v3, %v3798_v5  ;;  %v4349_v9 = vunpack.c.l.bf16 %v4348_v0  ;;  %v4529_v12 = vunpack.c.l.bf16 %v4528_v1 }
 0xd9e   :  { %v3979_v20 = vmul.f32 0.01, %v3978_v15 }
 0xda0   :  { %v10006_v49 = vmax.f32 %v3978_v15, %v3979_v20  ;;  %v6392_v20 = vunpack.c.h.bf16 %v6711_v2 }
 0xda2   :  { %8269 = vmatpush3.msra.mxu1 %v10006_v49  ;;  %8309 = vmatpush3.msra.mxu0 %v10006_v49 }
 0xda3   :  { %8271 = vmatmul.mubr.msk.f32.vlgmr.msra.gmra.mxu1 %vm3984_vm4, %v3983_v26  ;;  %8311 = vmatmul.mubr.msk.f32.vlgmr.msra.gmra.mxu0 %vm3984_vm4, %v4169_v27  ;;  %v6359_v26 = vunpack.c.l.bf16 %v6704_v48  ;;  %v6391_v27 = vunpack.c.l.bf16 %v6711_v2 }
 0xda4   :  { %8273 = vmatprep.subr.mxu1 %v9222_v47  ;;  %8313 = vmatprep.subr.mxu0 %v9222_v47 }
 0xda5   :  { %8274 = vmatpush3.msra.mxu1 %v6296_v50  ;;  %8314 = vmatpush3.msra.mxu0 %v6328_v29  ;;  %v6388_v50 = vunpack.c.h.bf16 %v6710_v25  ;;  %v6702_v29 = vld [vmem:[#allocation19 + $0xa8] sm:$0xff]  }
 0xda6   :  { %8275 = vmatprep.subr.mxu1 %v9222_v47  ;;  %8315 = vmatprep.subr.mxu0 %v9222_v47  ;;  %v6351_v4 = vunpack.c.l.bf16 %v6702_v29 }
 0xda7   :  { %8276 = vmatpush3.msra.mxu1 %v6295_v53  ;;  %8316 = vmatpush3.msra.mxu0 %v6327_v55  ;;  %v6387_v53 = vunpack.c.l.bf16 %v6710_v25  ;;  %v6352_v55 = vunpack.c.h.bf16 %v6702_v29  ;;  %v6718_v25 = vld [vmem:[#allocation22 + $0x38] sm:$0xff]  }
 0xda8   :  { %8277 = vmatprep.subr.mxu1 %v9222_v47  ;;  %8317 = vmatprep.subr.mxu0 %v9222_v47  ;;  %v6424_v29 = vunpack.c.h.bf16 %v6718_v25 }
 0xda9   :  { %8278 = vmatpush3.msra.mxu1 %v6292_v56  ;;  %8318 = vmatpush3.msra.mxu0 %v6324_v59  ;;  %v6384_v56 = vunpack.c.h.bf16 %v6709_v51  ;;  %v6701_v59 = vld [vmem:[#allocation19 + $0xa0] sm:$0xff]  }
 0xdaa   :  { %8279 = vmatprep.subr.mxu1 %v9222_v47  ;;  %8319 = vmatprep.subr.mxu0 %v9222_v47  ;;  %v6347_v62 = vunpack.c.l.bf16 %v6701_v59 }
 0xdab   :  { %8280 = vmatpush3.msra.mxu1 %v6291_v7  ;;  %8320 = vmatpush3.msra.mxu0 %v6323_v8  ;;  %v6383_v7 = vunpack.c.l.bf16 %v6709_v51  ;;  %v6348_v8 = vunpack.c.h.bf16 %v6701_v59 }
 0xdac   :  { %8281 = vmatprep.subr.mxu1 %v9222_v47  ;;  %8321 = vmatprep.subr.mxu0 %v9222_v47 }
 0xdad   :  { %8282 = vmatpush3.msra.mxu1 %v6288_v32  ;;  %8322 = vmatpush3.msra.mxu0 %v6320_v58  ;;  %v6380_v32 = vunpack.c.h.bf16 %v6708_v63  ;;  %v6700_v58 = vld [vmem:[#allocation19 + $0x98] sm:$0xff]  }
 0xdae   :  { %8283 = vmatprep.subr.mxu1 %v9222_v47  ;;  %8323 = vmatprep.subr.mxu0 %v9222_v47  ;;  %v6343_v39 = vunpack.c.l.bf16 %v6700_v58 }
 0xdaf   :  { %8284 = vmatpush3.msra.mxu1 %v6287_v54  ;;  %8324 = vmatpush3.msra.mxu0 %v6319_v57  ;;  %v6379_v54 = vunpack.c.l.bf16 %v6708_v63  ;;  %v6344_v57 = vunpack.c.h.bf16 %v6700_v58 }
 0xdb0   :  { %8285 = vmatprep.subr.mxu1 %v9222_v47  ;;  %8325 = vmatprep.subr.mxu0 %v9222_v47 }
 0xdb1   :  { %8286 = vmatpush3.msra.mxu1 %v6284_v16  ;;  %8326 = vmatpush3.msra.mxu0 %v6316_v6  ;;  %v6376_v16 = vunpack.c.h.bf16 %v6707_v13  ;;  %v6699_v6 = vld [vmem:[#allocation19 + $0x90] sm:$0xff]  }
 0xdb2   :  { %8287 = vmatprep.subr.mxu1 %v9222_v47  ;;  %8327 = vmatprep.subr.mxu0 %v9222_v47  ;;  %v6339_v36 = vunpack.c.l.bf16 %v6699_v6 }
 0xdb3   :  { %8288 = vmatpush3.msra.mxu1 %v6283_v11  ;;  %8328 = vmatpush3.msra.mxu0 %v6315_v61  ;;  %v6375_v11 = vunpack.c.l.bf16 %v6707_v13  ;;  %v6340_v61 = vunpack.c.h.bf16 %v6699_v6 }
 0xdb4   :  { %8289 = vmatprep.subr.mxu1 %v9222_v47  ;;  %8329 = vmatprep.subr.mxu0 %v9222_v47 }
 0xdb5   :  { %8290 = vmatpush3.msra.mxu1 %v6280_v19  ;;  %8330 = vmatpush3.msra.mxu0 %v6312_v41  ;;  %v6372_v19 = vunpack.c.h.bf16 %v6706_v60  ;;  %v6698_v41 = vld [vmem:[#allocation19 + $0x88] sm:$0xff]  }
 0xdb6   :  { %8291 = vmatprep.subr.mxu1 %v9222_v47  ;;  %8331 = vmatprep.subr.mxu0 %v9222_v47 }
 0xdb7   :  { %8292 = vmatpush3.msra.mxu1 %v6279_v10  ;;  %8332 = vmatpush3.msra.mxu0 %v6311_v33  ;;  %v6371_v10 = vunpack.c.l.bf16 %v6706_v60  ;;  %v6336_v33 = vunpack.c.h.bf16 %v6698_v41 }
 0xdb8   :  { %8293 = vmatprep.subr.mxu1 %v9222_v47  ;;  %8333 = vmatprep.subr.mxu0 %v9222_v47 }
 0xdb9   :  { %8294 = vmatpush3.msra.mxu1 %v6276_v21  ;;  %8334 = vmatpush3.msra.mxu0 %v6308_v14  ;;  %v6368_v21 = vunpack.c.h.bf16 %v6705_v35  ;;  %v6335_v14 = vunpack.c.l.bf16 %v6698_v41 }
 0xdba   :  { %8295 = vmatprep.subr.mxu1 %v9222_v47  ;;  %8335 = vmatprep.subr.mxu0 %v9222_v47 }
 0xdbb   :  { %8296 = vmatpush3.msra.mxu1 %v6275_v18  ;;  %8336 = vmatpush3.msra.mxu0 %v6307_v34  ;;  %v6362_v18 = vld [vmem:[#allocation19 + $0xc0] sm:$0xff]   ;;  %v6332_v34 = vunpack.c.h.bf16 %v6330_v23 }
 0xdbc   :  { %8297 = vmatprep.subr.mxu1 %v9222_v47  ;;  %8337 = vmatprep.subr.mxu0 %v9222_v47  ;;  %v6363_v38 = vunpack.c.l.bf16 %v6362_v18 }
 0xdbd   :  { %8298 = vmatpush3.msra.mxu1 %v6272_v45  ;;  %8338 = vmatpush3.msra.mxu0 %v6304_v37  ;;  %v6364_v45 = vunpack.c.h.bf16 %v6362_v18  ;;  %v6331_v37 = vunpack.c.l.bf16 %v6330_v23  ;;  %v6712_v23 = vld [vmem:[#allocation22 + $0x8] sm:$0xff]  }
 0xdbe   :  { %8299 = vmatprep.subr.mxu1 %v9222_v47  ;;  %8339 = vmatprep.subr.mxu0 %v9222_v47  ;;  %v6719_v18 = vld [vmem:[#allocation22 + $0x48] sm:$0xff]  }
 0xdbf   :  { %8300 = vmatpush3.msra.mxu1 %v6271_v40  ;;  %8340 = vmatpush3.msra.mxu0 %v6303_v42 }
 0xdc0   :  { %8301 = vmatprep.subr.mxu1 %v9222_v47  ;;  %8341 = vmatprep.subr.mxu0 %v9222_v47 }
 0xdc1   :  { %8302 = vmatpush3.msra.mxu1 %v6268_v44  ;;  %8342 = vmatpush3.msra.mxu0 %v6300_v30 }
 0xdc2   :  { %8303 = vmatprep.subr.mxu1 %v9222_v47  ;;  %8343 = vmatprep.subr.mxu0 %v9222_v47 }
 0xdc3   :  { %8304 = vmatpush3.msra.mxu1 %v6267_v31  ;;  %8344 = vmatpush3.msra.mxu0 %v6299_v46 }
 0xdc4   :  { %8305 = vmatprep.mubr.msk.f32.mxu1 %vm9223_vm2, %v9222_v47  ;;  %8345 = vmatprep.mubr.msk.f32.mxu0 %vm9223_vm2, %v9222_v47 }
 0xdc5   :  { %8348 = vmatprep.subr.mxu1 %v9222_v47  ;;  %8388 = vmatprep.subr.mxu0 %v9222_v47 }
 0xe63   :  { %v4054_v3 = vpop.f32.mrf.mxu1  ;;  %v4239_v5 = vpop.f32.mrf.mxu0 }
 0xe64   :  { %8306 = vmatmul.mubr.f32.vlgmr.msra.gmra.mxu1 %v4054_v3  ;;  %8346 = vmatmul.mubr.f32.vlgmr.msra.gmra.mxu0 %v4239_v5 }
 0xe65   :  { %8349 = vmatpush3.msra.mxu1 %v10006_v49  ;;  %8389 = vmatpush3.msra.mxu0 %v10006_v49  ;;  %v8272_v15 = vpop.f32.mrf.mxu1  ;;  %v8312_v17 = vpop.f32.mrf.mxu0  ;;  %v6356_v49 = vunpack.c.h.bf16 %v6703_v24 }
 0xe66   :  { %8350 = vmatprep.mubr.msk.f32.mxu1 %vm9223_vm2, %v9222_v47  ;;  %8390 = vmatprep.mubr.msk.f32.mxu0 %vm9223_vm2, %v9222_v47 }
 0xe67   :  { %8353 = vmatprep.subr.mxu1 %v9222_v47  ;;  %8393 = vmatprep.subr.mxu0 %v9222_v47 }
 0xe68   :  { %8351 = vmatmul.mubr.msk.f32.vlgmr.msra.gmra.mxu1 %vm3984_vm4, %v4349_v9  ;;  %8391 = vmatmul.mubr.msk.f32.vlgmr.msra.gmra.mxu0 %vm3984_vm4, %v4529_v12 }
 0xe69   :  { %8354 = vmatpush3.msra.mxu1 %v6360_v22  ;;  %8394 = vmatpush3.msra.mxu0 %v6392_v20  ;;  %v4710_v22 = vld [vmem:[%s10259_s14] sm:$0x1]  ;;  %v5696_v20 = vld [vmem:[%s10259_s14 + $0x1] sm:$0x1] }
 0xe6a   :  { %8355 = vmatprep.subr.mxu1 %v9222_v47  ;;  %8395 = vmatprep.subr.mxu0 %v9222_v47 }
 0xe6b   :  { %8356 = vmatpush3.msra.mxu1 %v6359_v26  ;;  %8396 = vmatpush3.msra.mxu0 %v6391_v27  ;;  %v6725_v26 = vld [vmem:[#allocation22 + $0x78] sm:$0xff]   ;;  %v4711_v27 = vunpack.c.l.bf16 %v4710_v22 }
 0xe6c   :  { %8357 = vmatprep.subr.mxu1 %v9222_v47  ;;  %8397 = vmatprep.subr.mxu0 %v9222_v47  ;;  %v6456_v51 = vunpack.c.h.bf16 %v6725_v26  ;;  %v6730_v22 = vld [vmem:[%s10260_s28 + $0x28] sm:$0xff]  }
 0xe6d   :  { %8358 = vmatpush3.msra.mxu1 %v6356_v49  ;;  %8398 = vmatpush3.msra.mxu0 %v6388_v50  ;;  %v4901_v49 = vunpack.c.l.bf16 %v5696_v20 }
 0xe6e   :  { %8359 = vmatprep.subr.mxu1 %v9222_v47  ;;  %8399 = vmatprep.subr.mxu0 %v9222_v47 }
 0xe6f   :  { %8360 = vmatpush3.msra.mxu1 %v6355_v52  ;;  %8400 = vmatpush3.msra.mxu0 %v6387_v53  ;;  %v6717_v52 = vld [vmem:[#allocation22 + $0x30] sm:$0xff]  }
 0xe70   :  { %8361 = vmatprep.subr.mxu1 %v9222_v47  ;;  %8401 = vmatprep.subr.mxu0 %v9222_v47  ;;  %v6724_v53 = vld [vmem:[#allocation22 + $0x70] sm:$0xff]   ;;  %v6420_v59 = vunpack.c.h.bf16 %v6717_v52 }
 0xe71   :  { %8362 = vmatpush3.msra.mxu1 %v6352_v55  ;;  %8402 = vmatpush3.msra.mxu0 %v6384_v56  ;;  %v6423_v55 = vunpack.c.l.bf16 %v6718_v25  ;;  %v6455_v56 = vunpack.c.l.bf16 %v6725_v26  ;;  %v6452_v63 = vunpack.c.h.bf16 %v6724_v53  ;;  %v6729_v25 = vld [vmem:[%s10260_s28 + $0x20] sm:$0xff]   ;;  %v6479_v26 = vunpack.c.l.bf16 %v6730_v22 }
 0xe72   :  { %8363 = vmatprep.subr.mxu1 %v9222_v47  ;;  %8403 = vmatprep.subr.mxu0 %v9222_v47 }
 0xe73   :  { %8364 = vmatpush3.msra.mxu1 %v6351_v4  ;;  %8404 = vmatpush3.msra.mxu0 %v6383_v7  ;;  %v6716_v4 = vld [vmem:[#allocation22 + $0x28] sm:$0xff]  }
 0xe74   :  { %8365 = vmatprep.subr.mxu1 %v9222_v47  ;;  %8405 = vmatprep.subr.mxu0 %v9222_v47  ;;  %v6723_v7 = vld [vmem:[#allocation22 + $0x68] sm:$0xff]   ;;  %v6416_v58 = vunpack.c.h.bf16 %v6716_v4 }
 0xe75   :  { %8366 = vmatpush3.msra.mxu1 %v6348_v8  ;;  %8406 = vmatpush3.msra.mxu0 %v6380_v32  ;;  %v6419_v8 = vunpack.c.l.bf16 %v6717_v52  ;;  %v6451_v32 = vunpack.c.l.bf16 %v6724_v53  ;;  %v6448_v13 = vunpack.c.h.bf16 %v6723_v7 }
 0xe76   :  { %8367 = vmatprep.subr.mxu1 %v9222_v47  ;;  %8407 = vmatprep.subr.mxu0 %v9222_v47 }
 0xe77   :  { %8368 = vmatpush3.msra.mxu1 %v6347_v62  ;;  %8408 = vmatpush3.msra.mxu0 %v6379_v54  ;;  %v6715_v62 = vld [vmem:[#allocation22 + $0x20] sm:$0xff]  }
 0xe78   :  { %8369 = vmatprep.subr.mxu1 %v9222_v47  ;;  %8409 = vmatprep.subr.mxu0 %v9222_v47  ;;  %v6722_v54 = vld [vmem:[#allocation22 + $0x60] sm:$0xff]   ;;  %v6412_v6 = vunpack.c.h.bf16 %v6715_v62 }
 0xe79   :  { %8370 = vmatpush3.msra.mxu1 %v6344_v57  ;;  %8410 = vmatpush3.msra.mxu0 %v6376_v16  ;;  %v6415_v57 = vunpack.c.l.bf16 %v6716_v4  ;;  %v6447_v16 = vunpack.c.l.bf16 %v6723_v7  ;;  %v6444_v60 = vunpack.c.h.bf16 %v6722_v54  ;;  %v6458_v4 = vld [vmem:[%s10260_s28] sm:$0xff]  }
 0xe7a   :  { %8371 = vmatprep.subr.mxu1 %v9222_v47  ;;  %8411 = vmatprep.subr.mxu0 %v9222_v47  ;;  %v6460_v7 = vunpack.c.h.bf16 %v6458_v4 }
 0xe7b   :  { %8372 = vmatpush3.msra.mxu1 %v6343_v39  ;;  %8412 = vmatpush3.msra.mxu0 %v6375_v11  ;;  %v6714_v39 = vld [vmem:[#allocation22 + $0x18] sm:$0xff]  }
 0xe7c   :  { %8373 = vmatprep.subr.mxu1 %v9222_v47  ;;  %8413 = vmatprep.subr.mxu0 %v9222_v47  ;;  %v6721_v11 = vld [vmem:[#allocation22 + $0x58] sm:$0xff]   ;;  %v6408_v41 = vunpack.c.h.bf16 %v6714_v39 }
 0xe7d   :  { %8374 = vmatpush3.msra.mxu1 %v6340_v61  ;;  %8414 = vmatpush3.msra.mxu0 %v6372_v19  ;;  %v6411_v61 = vunpack.c.l.bf16 %v6715_v62  ;;  %v6443_v19 = vunpack.c.l.bf16 %v6722_v54  ;;  %v6440_v35 = vunpack.c.h.bf16 %v6721_v11 }
 0xe7e   :  { %8375 = vmatprep.subr.mxu1 %v9222_v47  ;;  %8415 = vmatprep.subr.mxu0 %v9222_v47 }
 0xe7f   :  { %8376 = vmatpush3.msra.mxu1 %v6339_v36  ;;  %8416 = vmatpush3.msra.mxu0 %v6371_v10  ;;  %v6713_v36 = vld [vmem:[#allocation22 + $0x10] sm:$0xff]  }
 0xe80   :  { %8377 = vmatprep.subr.mxu1 %v9222_v47  ;;  %8417 = vmatprep.subr.mxu0 %v9222_v47  ;;  %v6720_v10 = vld [vmem:[#allocation22 + $0x50] sm:$0xff]  }
 0xe81   :  { %8378 = vmatpush3.msra.mxu1 %v6336_v33  ;;  %8418 = vmatpush3.msra.mxu0 %v6368_v21  ;;  %v6407_v33 = vunpack.c.l.bf16 %v6714_v39  ;;  %v6439_v21 = vunpack.c.l.bf16 %v6721_v11  ;;  %v6735_v39 = vld [vmem:[#allocation26 + $0x18] sm:$0xff]  }
 0xe82   :  { %8379 = vmatprep.subr.mxu1 %v9222_v47  ;;  %8419 = vmatprep.subr.mxu0 %v9222_v47  ;;  %v6504_v11 = vunpack.c.h.bf16 %v6735_v39 }
 0xe83   :  { %8385 = vmatprep.mubr.msk.f32.mxu1 %vm9223_vm2, %v9222_v47  ;;  %8425 = vmatprep.mubr.msk.f32.mxu0 %vm9223_vm2, %v9222_v47 }
 0xe84   :  { %8380 = vmatpush3.msra.mxu1 %v6335_v14  ;;  %8420 = vmatpush3.msra.mxu0 %v6367_v43  ;;  %v6404_v14 = vunpack.c.h.bf16 %v6713_v36  ;;  %v6436_v43 = vunpack.c.h.bf16 %v6720_v10 }
 0xe85   :  { %8381 = vmatprep.subr.mxu1 %v9222_v47  ;;  %8421 = vmatprep.subr.mxu0 %v9222_v47 }
 0xe86   :  { %8382 = vmatpush3.msra.mxu1 %v6332_v34  ;;  %8422 = vmatpush3.msra.mxu0 %v6364_v45  ;;  %v6403_v34 = vunpack.c.l.bf16 %v6713_v36  ;;  %v6435_v45 = vunpack.c.l.bf16 %v6720_v10 }
 0xe87   :  { %8383 = vmatprep.subr.mxu1 %v9222_v47  ;;  %8423 = vmatprep.subr.mxu0 %v9222_v47 }
 0xe88   :  { %8384 = vmatpush3.msra.mxu1 %v6331_v37  ;;  %8424 = vmatpush3.msra.mxu0 %v6363_v38  ;;  %v6400_v37 = vunpack.c.h.bf16 %v6712_v23  ;;  %v6432_v38 = vunpack.c.h.bf16 %v6719_v18 }
 0xe89   :  { %8428 = vmatprep.subr.mxu1 %v9222_v47  ;;  %8468 = vmatprep.subr.mxu0 %v9222_v47 }
 0xf24   :  { %v4156_v40 = vpop.f32.mrf.mxu1  ;;  %v4342_v42 = vpop.f32.mrf.mxu0 }
 0xf25   :  { %v4166_v44 = vadd.f32 %v5689_v28, %v4156_v40  ;;  %v6394_v28 = vld [vmem:[#allocation22] sm:$0xff]   ;;  %v6399_v40 = vunpack.c.l.bf16 %v6712_v23 }
 0xf26   :  { %v8307_v30 = vpop.f32.mrf.mxu1  ;;  %v8347_v31 = vpop.f32.mrf.mxu0  ;;  %v6742_v23 = vld [vmem:[#allocation29 + $0x38] sm:$0xff]  }
 0xf27   :  { %v4346_v46 = vadd.f32 %v4342_v42, %v4166_v44  ;;  %v6431_v42 = vunpack.c.l.bf16 %v6719_v18  ;;  %v6396_v44 = vunpack.c.h.bf16 %v6394_v28  ;;  %v6426_v30 = vld [vmem:[#allocation22 + $0x40] sm:$0xff]   ;;  %v6741_v18 = vld [vmem:[#allocation29 + $0x30] sm:$0xff]  }
 0xf28   :  { %v4419_v0 = vpop.f32.mrf.mxu1  ;;  %v4599_v1 = vpop.f32.mrf.mxu0  ;;  %v6428_v31 = vunpack.c.h.bf16 %v6426_v30 }
 0xf29   :  { %8386 = vmatmul.mubr.f32.vlgmr.msra.gmra.mxu1 %v4419_v0  ;;  %8426 = vmatmul.mubr.f32.vlgmr.msra.gmra.mxu0 %v4599_v1  ;;  %v6427_v0 = vunpack.c.l.bf16 %v6426_v30  ;;  %v6732_v1 = vld [vmem:[%s10260_s28 + $0x38] sm:$0xff]  }
 0xf2a   :  { %v8352_v48 = vpop.f32.mrf.mxu1  ;;  %v8392_v2 = vpop.f32.mrf.mxu0  ;;  %8430 = vmatprep.mubr.msk.f32.mxu1 %vm9223_vm2, %v9222_v47  ;;  %8470 = vmatprep.mubr.msk.f32.mxu0 %vm9223_vm2, %v9222_v47 }
 0xf2b   :  { %v6488_v48 = vunpack.c.h.bf16 %v6732_v1  ;;  %v6731_v2 = vld [vmem:[%s10260_s28 + $0x30] sm:$0xff]  }
 0xf2c   :  { %v6483_v20 = vunpack.c.l.bf16 %v6731_v2 }
 0xfe9   :  { %v4522_v3 = vpop.f32.mrf.mxu1  ;;  %v4702_v5 = vpop.f32.mrf.mxu0 }
 0xfea   :  { %v4526_v9 = vadd.f32 %v4522_v3, %v4346_v46  ;;  %v6395_v46 = vunpack.c.l.bf16 %v6394_v28  ;;  %v6531_v28 = vunpack.c.l.bf16 %v6741_v18 }
 0xfeb   :  { %v8387_v12 = vpop.f32.mrf.mxu1  ;;  %v8427_v15 = vpop.f32.mrf.mxu0 }
 0xfec   :  { %v4706_v17 = vadd.f32 %v4702_v5, %v4526_v9  ;;  %v6487_v9 = vunpack.c.l.bf16 %v6732_v1 }
 0xfee   :  { %v4707_v24 = vmul.f32 0.01, %v4706_v17 }
 0xff0   :  { %v4708_v50 = vmax.f32 %v4706_v17, %v4707_v24  ;;  %v6484_v17 = vunpack.c.h.bf16 %v6731_v2  ;;  %v6480_v24 = vunpack.c.h.bf16 %v6730_v22 }
 0xff2   :  { %8429 = vmatpush3.msk.msra.mxu1 %vm4716_vm5, %v4708_v50  ;;  %8469 = vmatpush3.msk.msra.mxu0 %vm4716_vm5, %v4708_v50  ;;  %v6475_v50 = vunpack.c.l.bf16 %v6729_v25 }
 0xff3   :  { %8431 = vmatmul.mubr.msk.f32.vlgmr.msra.gmra.mxu1 %vm4712_vm6, %v4711_v27  ;;  %8471 = vmatmul.mubr.msk.f32.vlgmr.msra.gmra.mxu0 %vm4712_vm6, %v4901_v49  ;;  %v6476_v27 = vunpack.c.h.bf16 %v6729_v25  ;;  %v6728_v49 = vld [vmem:[%s10260_s28 + $0x18] sm:$0xff]  }
 0xff4   :  { %8433 = vmatprep.subr.mxu1 %v9222_v47  ;;  %8473 = vmatprep.subr.mxu0 %v9222_v47  ;;  %v6471_v52 = vunpack.c.l.bf16 %v6728_v49  ;;  %v6736_v25 = vld [vmem:[#allocation29 + $0x8] sm:$0xff]  }
 0xff5   :  { %8434 = vmatpush3.msra.mxu1 %v6424_v29  ;;  %8474 = vmatpush3.msra.mxu0 %v6456_v51  ;;  %v6472_v29 = vunpack.c.h.bf16 %v6728_v49  ;;  %v6727_v51 = vld [vmem:[%s10260_s28 + $0x10] sm:$0xff]  }
 0xff6   :  { %8435 = vmatprep.subr.mxu1 %v9222_v47  ;;  %8475 = vmatprep.subr.mxu0 %v9222_v47  ;;  %v6468_v53 = vunpack.c.h.bf16 %v6727_v51  ;;  %v6506_v49 = vld [vmem:[#allocation29] sm:$0xff]  }
 0xff7   :  { %8436 = vmatpush3.msra.mxu1 %v6423_v55  ;;  %8476 = vmatpush3.msra.mxu0 %v6455_v56  ;;  %v6467_v55 = vunpack.c.l.bf16 %v6727_v51  ;;  %v6726_v56 = vld [vmem:[%s10260_s28 + $0x8] sm:$0xff]   ;;  %v6507_v51 = vunpack.c.l.bf16 %v6506_v49 }
 0xff8   :  { %8437 = vmatprep.subr.mxu1 %v9222_v47  ;;  %8477 = vmatprep.subr.mxu0 %v9222_v47 }
 0xff9   :  { %8438 = vmatpush3.msra.mxu1 %v6420_v59  ;;  %8478 = vmatpush3.msra.mxu0 %v6452_v63  ;;  %v6464_v59 = vunpack.c.h.bf16 %v6726_v56  ;;  %v6463_v63 = vunpack.c.l.bf16 %v6726_v56 }
 0xffa   :  { %8439 = vmatprep.subr.mxu1 %v9222_v47  ;;  %8479 = vmatprep.subr.mxu0 %v9222_v47 }
 0xffb   :  { %8440 = vmatpush3.msra.mxu1 %v6419_v8  ;;  %8480 = vmatpush3.msra.mxu0 %v6451_v32  ;;  %v6459_v8 = vunpack.c.l.bf16 %v6458_v4  ;;  %v5695_v32 = vld [vmem:[#allocation23] ss:$0 sm:$0xff] }
 0xffc   :  { %8441 = vmatprep.subr.mxu1 %v9222_v47  ;;  %8481 = vmatprep.subr.mxu0 %v9222_v47 }
 0xffd   :  { %8442 = vmatpush3.msra.mxu1 %v6416_v58  ;;  %8482 = vmatpush3.msra.mxu0 %v6448_v13 }
 0xffe   :  { %8443 = vmatprep.subr.mxu1 %v9222_v47  ;;  %8483 = vmatprep.subr.mxu0 %v9222_v47 }
 0xfff   :  { %8444 = vmatpush3.msra.mxu1 %v6415_v57  ;;  %8484 = vmatpush3.msra.mxu0 %v6447_v16 }
0x1000   :  { %8445 = vmatprep.subr.mxu1 %v9222_v47  ;;  %8485 = vmatprep.subr.mxu0 %v9222_v47 }
0x1001   :  { %8446 = vmatpush3.msra.mxu1 %v6412_v6  ;;  %8486 = vmatpush3.msra.mxu0 %v6444_v60 }
0x1002   :  { %8447 = vmatprep.subr.mxu1 %v9222_v47  ;;  %8487 = vmatprep.subr.mxu0 %v9222_v47 }
0x1003   :  { %8448 = vmatpush3.msra.mxu1 %v6411_v61  ;;  %8488 = vmatpush3.msra.mxu0 %v6443_v19  ;;  %v6503_v61 = vunpack.c.l.bf16 %v6735_v39  ;;  %v6734_v19 = vld [vmem:[#allocation26 + $0x10] sm:$0xff]  }
0x1004   :  { %8449 = vmatprep.subr.mxu1 %v9222_v47  ;;  %8489 = vmatprep.subr.mxu0 %v9222_v47  ;;  %v6499_v36 = vunpack.c.l.bf16 %v6734_v19 }
0x1005   :  { %8450 = vmatpush3.msra.mxu1 %v6408_v41  ;;  %8490 = vmatpush3.msra.mxu0 %v6440_v35  ;;  %v6500_v41 = vunpack.c.h.bf16 %v6734_v19  ;;  %v6733_v35 = vld [vmem:[#allocation26 + $0x8] sm:$0xff]  }
0x1006   :  { %8451 = vmatprep.subr.mxu1 %v9222_v47  ;;  %8491 = vmatprep.subr.mxu0 %v9222_v47  ;;  %v6496_v10 = vunpack.c.h.bf16 %v6733_v35 }
0x1007   :  { %8452 = vmatpush3.msra.mxu1 %v6407_v33  ;;  %8492 = vmatpush3.msra.mxu0 %v6439_v21  ;;  %v6490_v33 = vld [vmem:[#allocation26] sm:$0xff]   ;;  %v6495_v21 = vunpack.c.l.bf16 %v6733_v35 }
0x1008   :  { %8453 = vmatprep.subr.mxu1 %v9222_v47  ;;  %8493 = vmatprep.subr.mxu0 %v9222_v47 }
0x1009   :  { %8454 = vmatpush3.msra.mxu1 %v6404_v14  ;;  %8494 = vmatpush3.msra.mxu0 %v6436_v43  ;;  %v6492_v14 = vunpack.c.h.bf16 %v6490_v33  ;;  %v6491_v43 = vunpack.c.l.bf16 %v6490_v33 }
0x100a   :  { %8455 = vmatprep.subr.mxu1 %v9222_v47  ;;  %8495 = vmatprep.subr.mxu0 %v9222_v47 }
0x100b   :  { %8456 = vmatpush3.msra.mxu1 %v6403_v34  ;;  %8496 = vmatpush3.msra.mxu0 %v6435_v45  ;;  %v6536_v34 = vunpack.c.h.bf16 %v6742_v23  ;;  %v6535_v45 = vunpack.c.l.bf16 %v6742_v23  ;;  %v5522_v23 = vlaneseq }
0x100c   :  { %8457 = vmatprep.subr.mxu1 %v9222_v47  ;;  %8497 = vmatprep.subr.mxu0 %v9222_v47 }
0x100d   :  { %8458 = vmatpush3.msra.mxu1 %v6400_v37  ;;  %8498 = vmatpush3.msra.mxu0 %v6432_v38  ;;  %v6532_v37 = vunpack.c.h.bf16 %v6741_v18  ;;  %v6740_v38 = vld [vmem:[#allocation29 + $0x28] sm:$0xff]  }
0x100e   :  { %8459 = vmatprep.subr.mxu1 %v9222_v47  ;;  %8499 = vmatprep.subr.mxu0 %v9222_v47 }
0x100f   :  { %8460 = vmatpush3.msra.mxu1 %v6399_v40  ;;  %8500 = vmatpush3.msra.mxu0 %v6431_v42  ;;  %v6528_v40 = vunpack.c.h.bf16 %v6740_v38  ;;  %v6739_v42 = vld [vmem:[#allocation29 + $0x20] sm:$0xff]  }
0x1010   :  { %8461 = vmatprep.subr.mxu1 %v9222_v47  ;;  %8501 = vmatprep.subr.mxu0 %v9222_v47  ;;  %v6524_v30 = vunpack.c.h.bf16 %v6739_v42 }
0x1011   :  { %8462 = vmatpush3.msra.mxu1 %v6396_v44  ;;  %8465 = vmatprep.mubr.msk.f32.mxu1 %vm9223_vm2, %v9222_v47  ;;  %v6527_v44 = vunpack.c.l.bf16 %v6740_v38 }
0x1012   :  { %8463 = vmatprep.subr.mxu1 %v9222_v47  ;;  %8505 = vmatprep.mubr.msk.f32.mxu0 %vm9223_vm2, %v9222_v47 }
0x1013   :  { %8502 = vmatpush3.msra.mxu0 %v6428_v31  ;;  %8464 = vmatpush3.msra.mxu1 %v6395_v46  ;;  %v5699_v31 = vld [vmem:[#allocation25] ss:$0 sm:$0xff] }
0x1014   :  { %8503 = vmatprep.subr.mxu0 %v9222_v47  ;;  %8508 = vmatprep.subr.mxu1 %v9222_v47 }
0x1015   :  { %8504 = vmatpush3.msra.mxu0 %v6427_v0 }
0x1016   :  { %8543 = vmatprep.subr.mxu0 %v9222_v47 }
0x10b3   :  { %v4786_v3 = vpop.f32.mrf.mxu1  ;;  %v4971_v5 = vpop.f32.mrf.mxu0 }
0x10b4   :  { %8466 = vmatmul.mubr.f32.vlgmr.msra.gmra.mxu1 %v4786_v3  ;;  %8506 = vmatmul.mubr.f32.vlgmr.msra.gmra.mxu0 %v4971_v5 }
0x10b5   :  { %v8432_v12 = vpop.f32.mrf.mxu1  ;;  %v8472_v15 = vpop.f32.mrf.mxu0  ;;  %8509 = vmatpush3.msra.mxu1 %v6488_v48  ;;  %8540 = vmatprep.mubr.msk.f32.mxu1 %vm9223_vm2, %v9222_v47 }
0x10b6   :  { %8510 = vmatprep.subr.mxu1 %v9222_v47  ;;  %8559 = vmatprep.mubr.msk.f32.mxu0 %vm9223_vm2, %v9222_v47  ;;  %v6523_v12 = vunpack.c.l.bf16 %v6739_v42  ;;  %v6738_v15 = vld [vmem:[#allocation29 + $0x18] sm:$0xff]  }
0x10b7   :  { %8511 = vmatpush3.msra.mxu1 %v6487_v9  ;;  %8544 = vmatpush3.msra.mxu0 %v6504_v11  ;;  %v6519_v22 = vunpack.c.l.bf16 %v6738_v15 }
0x10b8   :  { %8512 = vmatprep.subr.mxu1 %v9222_v47  ;;  %8545 = vmatprep.subr.mxu0 %v9222_v47 }
0x10b9   :  { %8513 = vmatpush3.msra.mxu1 %v6484_v17  ;;  %8546 = vmatpush3.msra.mxu0 %v6503_v61  ;;  %v6520_v17 = vunpack.c.h.bf16 %v6738_v15  ;;  %v6744_v61 = vld [vmem:[%s10261_s0 + $0x10] sm:$0xff]  }
0x10ba   :  { %8514 = vmatprep.subr.mxu1 %v9222_v47  ;;  %8547 = vmatprep.subr.mxu0 %v9222_v47  ;;  %v6548_v19 = vunpack.c.h.bf16 %v6744_v61  ;;  %v6547_v35 = vunpack.c.l.bf16 %v6744_v61 }
0x10bb   :  { %8515 = vmatpush3.msra.mxu1 %v6483_v20  ;;  %8548 = vmatpush3.msra.mxu0 %v6500_v41  ;;  %v6737_v20 = vld [vmem:[#allocation29 + $0x10] sm:$0xff]  }
0x10bc   :  { %8516 = vmatprep.subr.mxu1 %v9222_v47  ;;  %8549 = vmatprep.subr.mxu0 %v9222_v47  ;;  %v6743_v41 = vld [vmem:[%s10261_s0 + $0x8] sm:$0xff]  }
0x10bd   :  { %8517 = vmatpush3.msra.mxu1 %v6480_v24  ;;  %8550 = vmatpush3.msra.mxu0 %v6499_v36  ;;  %v6516_v24 = vunpack.c.h.bf16 %v6737_v20  ;;  %v6544_v36 = vunpack.c.h.bf16 %v6743_v41  ;;  %v6543_v33 = vunpack.c.l.bf16 %v6743_v41 }
0x10be   :  { %8518 = vmatprep.subr.mxu1 %v9222_v47  ;;  %8551 = vmatprep.subr.mxu0 %v9222_v47 }
0x10bf   :  { %8519 = vmatpush3.msra.mxu1 %v6479_v26  ;;  %8552 = vmatpush3.msra.mxu0 %v6496_v10  ;;  %v6515_v26 = vunpack.c.l.bf16 %v6737_v20  ;;  %v6538_v10 = vld [vmem:[%s10261_s0] sm:$0xff]  }
0x10c0   :  { %8520 = vmatprep.subr.mxu1 %v9222_v47  ;;  %8553 = vmatprep.subr.mxu0 %v9222_v47 }
0x10c1   :  { %8521 = vmatpush3.msra.mxu1 %v6476_v27  ;;  %8554 = vmatpush3.msra.mxu0 %v6495_v21  ;;  %v6512_v27 = vunpack.c.h.bf16 %v6736_v25  ;;  %v6540_v21 = vunpack.c.h.bf16 %v6538_v10 }
0x10c2   :  { %8522 = vmatprep.subr.mxu1 %v9222_v47  ;;  %8555 = vmatprep.subr.mxu0 %v9222_v47 }
0x10c3   :  { %8523 = vmatpush3.msra.mxu1 %v6475_v50  ;;  %8556 = vmatpush3.msra.mxu0 %v6492_v14  ;;  %v6511_v50 = vunpack.c.l.bf16 %v6736_v25  ;;  %v6539_v14 = vunpack.c.l.bf16 %v6538_v10 }
0x10c4   :  { %8524 = vmatprep.subr.mxu1 %v9222_v47  ;;  %8557 = vmatprep.subr.mxu0 %v9222_v47 }
0x10c5   :  { %8525 = vmatpush3.msra.mxu1 %v6472_v29  ;;  %8558 = vmatpush3.msra.mxu0 %v6491_v43  ;;  %v6508_v29 = vunpack.c.h.bf16 %v6506_v49  ;;  %v5518_v43 = vld [vmem:[%s9374_s27] sm:$0x3]  ;;  %s9224_s27 = smov [#allocation35]  }
0x10c6   :  { %8526 = vmatprep.subr.mxu1 %v9222_v47  ;;  %8597 = vmatprep.subr.mxu0 %v9222_v47  ;;  %v5531_v18 = vmul.f32 -0.5, %v5518_v43  ;;  %s5551_s17 = sshll.u32 %s9224_s27, 4  ;;  %s5552_s17 = int_to_ptr.vmem [resolvable:$true] %s5551_s17 }
0x10c7   :  { %8527 = vmatpush3.msra.mxu1 %v6471_v52  ;;  %v6749_v52 = vld [vmem:[%s10261_s0 + $0x38] sm:$0xff]   ;;  %s9122_s21 = scalar_lea.vmem %s5552_s17, 32  ;;  %p9127_p8 = scmp.lt.s32.totalorder %s5552_s17, %s5552_s17 }
0x10c8   :  { %8528 = vmatprep.subr.mxu1 %v9222_v47  ;;  %v6567_v56 = vunpack.c.l.bf16 %v6749_v52  ;;  %v5532_v38 = vmul.f32 %v5531_v18, %v5518_v43  ;;  %p9123_p7 = scmp.ne.s32.totalorder %s5552_s17, %s9122_s21  ;;  %p9128_p9 = scmp.lt.s32.totalorder %s9122_s21, %s9122_s21 }
0x10c9   :  { %8529 = vmatpush3.msra.mxu1 %v6468_v53  ;;  %v6748_v53 = vld [vmem:[%s10261_s0 + $0x30] sm:$0xff]  }
0x10ca   :  { %8530 = vmatprep.subr.mxu1 %v9222_v47  ;;  %v6563_v4 = vunpack.c.l.bf16 %v6748_v53  ;;  %p9129_p10 = por %p9128_p9, %p9127_p8 }
0x10cb   :  { %8531 = vmatpush3.msra.mxu1 %v6467_v55  ;;  %v6568_v55 = vunpack.c.h.bf16 %v6749_v52 }
0x10cc   :  { %8532 = vmatprep.subr.mxu1 %v9222_v47  ;;  %p9130_p11 = pnand %p9129_p10, %p9123_p7 }
0x10cd   :  { %8533 = vmatpush3.msra.mxu1 %v6464_v59  ;;  %v6564_v59 = vunpack.c.h.bf16 %v6748_v53 }
0x10ce   :  { %8534 = vmatprep.subr.mxu1 %v9222_v47 }
0x10cf   :  { %8535 = vmatpush3.msra.mxu1 %v6463_v63  ;;  %v6747_v63 = vld [vmem:[%s10261_s0 + $0x28] sm:$0xff]  }
0x10d0   :  { %8536 = vmatprep.subr.mxu1 %v9222_v47 }
0x10d1   :  { %8537 = vmatpush3.msra.mxu1 %v6460_v7  ;;  %v6560_v7 = vunpack.c.h.bf16 %v6747_v63 }
0x10d2   :  { %8538 = vmatprep.subr.mxu1 %v9222_v47 }
0x10d3   :  { %8539 = vmatpush3.msra.mxu1 %v6459_v8  ;;  %v6746_v8 = vld [vmem:[%s10261_s0 + $0x20] sm:$0xff]  }
0x10d4   :  { %8562 = vmatprep.subr.mxu1 %v9222_v47 }
0x1174   :  { %v4888_v58 = vpop.f32.mrf.mxu1  ;;  %v5074_v13 = vpop.f32.mrf.mxu0 }
0x1175   :  { %v4898_v62 = vadd.f32 %v5695_v32, %v4888_v58  ;;  %v6559_v32 = vunpack.c.l.bf16 %v6747_v63  ;;  %v6556_v58 = vunpack.c.h.bf16 %v6746_v8 }
0x1176   :  { %v8467_v54 = vpop.f32.mrf.mxu1  ;;  %v8507_v57 = vpop.f32.mrf.mxu0 }
0x1177   :  { %v5078_v16 = vadd.f32 %v5074_v13, %v4898_v62  ;;  %v5700_v13 = vld [vmem:[#allocation28] ss:$0 sm:$0xff] }
0x1179   :  { %v5079_v6 = vmul.f32 0.01, %v5078_v16 }
0x117b   :  { %v5080_v60 = vmax.f32 %v5078_v16, %v5079_v6  ;;  %v6555_v6 = vunpack.c.l.bf16 %v6746_v8 }
0x117d   :  { %8541 = vmatmul.mubr.f32.vlgmr.msra.gmra.mxu1 %v5080_v60  ;;  %v6745_v60 = vld [vmem:[%s10261_s0 + $0x18] sm:$0xff]  }
0x117e   :  { %8594 = vmatprep.mubr.msk.f32.mxu1 %vm9223_vm2, %v9222_v47  ;;  %8563 = vmatpush3.msra.mxu1 %v6536_v34  ;;  %v6552_v39 = vunpack.c.h.bf16 %v6745_v60  ;;  %v6551_v11 = vunpack.c.l.bf16 %v6745_v60  ;;  %v5523_v34 = vshrl.u32 %v5522_v23, 7 }
0x117f   :  { %8564 = vmatprep.subr.mxu1 %v9222_v47 }
0x1180   :  { %8565 = vmatpush3.msra.mxu1 %v6535_v45  ;;  %v5517_v45 = vld [vmem:[#allocation34] sm:$0x1] }
0x1181   :  { %8566 = vmatprep.subr.mxu1 %v9222_v47 }
0x1182   :  { %8567 = vmatpush3.msra.mxu1 %v6532_v37  ;;  %v5524_v37 = vsub.s32 0, %v5523_v34 }
0x1183   :  { %8568 = vmatprep.subr.mxu1 %v9222_v47 }
0x1184   :  { %8569 = vmatpush3.msra.mxu1 %v6531_v28  ;;  %v5537_v28 = vrot.slane %v5517_v45, %v5524_v37 }
0x1185   :  { %8570 = vmatprep.subr.mxu1 %v9222_v47 }
0x1186   :  { %8571 = vmatpush3.msra.mxu1 %v6528_v40  ;;  %v5539_v40 = vsub.f32 %v5532_v38, %v5537_v28 }
0x1187   :  { %8572 = vmatprep.subr.mxu1 %v9222_v47 }
0x1188   :  { %8573 = vmatpush3.msra.mxu1 %v6527_v44  ;;  %v5704_v42 = vadd.f32 -0.9189385, %v5539_v40 }
0x1189   :  { %8574 = vmatprep.subr.mxu1 %v9222_v47 }
0x118a   :  { %8575 = vmatpush3.msra.mxu1 %v6524_v30  ;;  %v5541_v44 = vsel %vm5529_vm7, %v5704_v42, 0.0  ;;  %v5702_v30 = vld [vmem:[#allocation31] ss:$0 sm:$0xff] }
0x118b   :  { %8576 = vmatprep.subr.mxu1 %v9222_v47  ;;  %5542 = vadd.xlane.f32.xlu0 %v5541_v44 }
0x118c   :  { %8577 = vmatpush3.msra.mxu1 %v6523_v12 }
0x118d   :  { %8578 = vmatprep.subr.mxu1 %v9222_v47 }
0x118e   :  { %8579 = vmatpush3.msra.mxu1 %v6520_v17 }
0x118f   :  { %8580 = vmatprep.subr.mxu1 %v9222_v47 }
0x1190   :  { %8581 = vmatpush3.msra.mxu1 %v6519_v22 }
0x1191   :  { %8582 = vmatprep.subr.mxu1 %v9222_v47 }
0x1192   :  { %8583 = vmatpush3.msra.mxu1 %v6516_v24 }
0x1193   :  { %8584 = vmatprep.subr.mxu1 %v9222_v47 }
0x1194   :  { %8585 = vmatpush3.msra.mxu1 %v6515_v26 }
0x1195   :  { %8586 = vmatprep.subr.mxu1 %v9222_v47 }
0x1196   :  { %8587 = vmatpush3.msra.mxu1 %v6512_v27 }
0x1197   :  { %8588 = vmatprep.subr.mxu1 %v9222_v47 }
0x1198   :  { %8589 = vmatpush3.msra.mxu1 %v6511_v50 }
0x1199   :  { %8590 = vmatprep.subr.mxu1 %v9222_v47 }
0x119a   :  { %8591 = vmatpush3.msra.mxu1 %v6508_v29 }
0x119b   :  { %8592 = vmatprep.subr.mxu1 %v9222_v47 }
0x119c   :  { %8593 = vmatpush3.msra.mxu1 %v6507_v51 }
0x123d   :  { %v5186_v46 = vpop.f32.mrf.mxu1 }
0x123e   :  { %v5187_v0 = vadd.f32 %v5699_v31, %v5186_v46 }
0x123f   :  { %v8542_v1 = vpop.f32.mrf.mxu1 }
0x1240   :  { %v5190_v48 = vsub.f32 0.0, %v5187_v0  ;;  %v5543_v1 = vpop.xlane.xlu0 %5542 }
0x1241   :  { %5544 = vst.msk [vmem:[%s9389_s12] sm:$0x3] %vm5515_vm8, %v5543_v1 }
0x1242   :  { %v5191_v2 = vmul.f32 1.442695, %v5190_v48  ;;  %v5519_v48 = vmul.f32 1.442695, %v5517_v45 }
0x1244   :  { %8692 = vpow2.f32 %v5191_v2 }
0x1251   :  { %v8693_v3 = vpop.eup %8692 }
0x1252   :  { %v5193_v5 = vadd.f32 1.0, %v8693_v3 }
0x1254   :  { %8694 = vrcp.f32 %v5193_v5  ;;  %v5703_v5 = vld [vmem:[#allocation32] ss:$0 sm:$0xff] }
0x1261   :  { %v8695_v9 = vpop.eup %8694 }
0x1262   :  { %8560 = vmatmul.mubr.msk.f32.vlgmr.msra.gmra.mxu0 %vm546_vm0, %v8695_v9 }
0x1263   :  { %8629 = vmatprep.mubr.msk.f32.mxu0 %vm9223_vm2, %v9222_v47  ;;  %8598 = vmatpush3.msra.mxu0 %v6568_v55 }
0x1264   :  { %8599 = vmatprep.subr.mxu0 %v9222_v47 }
0x1265   :  { %8600 = vmatpush3.msra.mxu0 %v6567_v56 }
0x1266   :  { %8601 = vmatprep.subr.mxu0 %v9222_v47 }
0x1267   :  { %8602 = vmatpush3.msra.mxu0 %v6564_v59 }
0x1268   :  { %8603 = vmatprep.subr.mxu0 %v9222_v47 }
0x1269   :  { %8604 = vmatpush3.msra.mxu0 %v6563_v4 }
0x126a   :  { %8605 = vmatprep.subr.mxu0 %v9222_v47 }
0x126b   :  { %8606 = vmatpush3.msra.mxu0 %v6560_v7 }
0x126c   :  { %8607 = vmatprep.subr.mxu0 %v9222_v47 }
0x126d   :  { %8608 = vmatpush3.msra.mxu0 %v6559_v32 }
0x126e   :  { %8609 = vmatprep.subr.mxu0 %v9222_v47 }
0x126f   :  { %8610 = vmatpush3.msra.mxu0 %v6556_v58 }
0x1270   :  { %8611 = vmatprep.subr.mxu0 %v9222_v47 }
0x1271   :  { %8612 = vmatpush3.msra.mxu0 %v6555_v6 }
0x1272   :  { %8613 = vmatprep.subr.mxu0 %v9222_v47 }
0x1273   :  { %8614 = vmatpush3.msra.mxu0 %v6552_v39 }
0x1274   :  { %8615 = vmatprep.subr.mxu0 %v9222_v47 }
0x1275   :  { %8616 = vmatpush3.msra.mxu0 %v6551_v11 }
0x1276   :  { %8617 = vmatprep.subr.mxu0 %v9222_v47 }
0x1277   :  { %8618 = vmatpush3.msra.mxu0 %v6548_v19 }
0x1278   :  { %8619 = vmatprep.subr.mxu0 %v9222_v47 }
0x1279   :  { %8620 = vmatpush3.msra.mxu0 %v6547_v35 }
0x127a   :  { %8621 = vmatprep.subr.mxu0 %v9222_v47 }
0x127b   :  { %8622 = vmatpush3.msra.mxu0 %v6544_v36 }
0x127c   :  { %8623 = vmatprep.subr.mxu0 %v9222_v47 }
0x127d   :  { %8624 = vmatpush3.msra.mxu0 %v6543_v33 }
0x127e   :  { %8625 = vmatprep.subr.mxu0 %v9222_v47 }
0x127f   :  { %8626 = vmatpush3.msra.mxu0 %v6540_v21 }
0x1280   :  { %8627 = vmatprep.subr.mxu0 %v9222_v47 }
0x1281   :  { %8628 = vmatpush3.msra.mxu0 %v6539_v14 }
0x1322   :  { %v5287_v62 = vpop.f32.mrf.mxu0 }
0x1323   :  { %v5288_v54 = vadd.f32 %v5700_v13, %v5287_v62 }
0x1324   :  { %v8561_v57 = vpop.f32.mrf.mxu0 }
0x1325   :  { %8696 = vtanh.f32 %v5288_v54 }
0x1332   :  { %v8697_v16 = vpop.eup %8696 }
0x1333   :  { %8595 = vmatmul.mubr.f32.vlgmr.msra.gmra.mxu1 %v8697_v16 }
0x13f3   :  { %v5397_v31 = vpop.f32.mrf.mxu1 }
0x13f4   :  { %v5398_v46 = vadd.f32 %v5702_v30, %v5397_v31 }
0x13f5   :  { %v8596_v47 = vpop.f32.mrf.mxu1 }
0x13f6   :  { %8698 = vtanh.f32 %v5398_v46 }
0x13f7   :  { %8700 = vpow2.f32 %v5519_v48 }
0x1403   :  { %v8699_v0 = vpop.eup %8698 }
0x1404   :  { %8630 = vmatmul.mubr.f32.vlgmr.msra.gmra.mxu0 %v8699_v0  ;;  %v8701_v2 = vpop.eup %8700 }
0x1405   :  { %v5525_v3 = vrot.slane %v8701_v2, %v5524_v37 }
0x1407   :  { %v5527_v9 = vmul.f32 %v5525_v3, %v5518_v43 }
0x14c4   :  { %v5507_v12 = vpop.f32.mrf.mxu0 }
0x14c5   :  { %v5508_v15 = vadd.f32 %v5703_v5, %v5507_v12 }
0x14c6   :  { %v8631_v17 = vpop.f32.mrf.mxu0 }
0x14c7   :  { %v5528_v22 = vadd.f32 %v5527_v9, %v5508_v15  ;;  %5512 = vrot.lane.b32.xlu0 %v5508_v15, %s9225_s7 }
0x14c9   :  { %5530 = vst.msk [vmem:[#allocation35] sm:$0x3] %vm5529_vm7, %v5528_v22 }
0x14ca   :  { %9133 = shalt.err (!%p9130_p11)
}
0x14cb   :  { %5554 = dma.vmem_to_hbm [thread:$0]  %s5552_s17, 32, %s9379_s4, [#allocation4]  }
0x1539   :  { %v5513_v20 = vpop.permute.xlu0 %5512 }
0x153a   :  { %5516 = vst.msk [vmem:[%s9384_s30] sm:$0x3] %vm5515_vm8, %v5513_v20 }
0x153b   :  { %9164 = dma.done.wait [#allocation4], 32  }
0x153c   :  { %9165 = vsyncadd [#allocation4], 4294967264 }
0x153d   :  { %5566 = vsyncpa [#allocation3], 1 }
0x153e   :  { %5567 = vsyncpa [#allocation6], 1 }
0x153f   :  { %5568 = vsyncpa [#allocation9], 1 }
0x1540   :  { %5569 = vsyncpa [#allocation12], 1 }
0x1541   :  { %5570 = vsyncpa [#allocation15], 1 }
0x1542   :  { %5571 = vsyncpa [#allocation18], 1 }
0x1543   :  { %5572 = vsyncpa [#allocation21], 1 }
0x1544   :  { %5573 = vsyncpa [#allocation24], 1 }
0x1545   :  { %5574 = vsyncpa [#allocation27], 1 }
0x1546   :  { %5575 = vsyncpa [#allocation30], 1 }
0x1547   :  { %5576 = vsyncpa [#allocation33], 1 }
0x1548   :  { %5577 = vsyncpa [#allocation4], 1 }

</bundles_post_ra>
